<compile_context>
chip_gen: v6e
topology: v6e:2x2x1
jax: 0.10.0
libtpu: 0.0.40
codegen_flags: <defaults>
</compile_context>

<pallas_src>
import functools
import math

import jax
import jax.numpy as jnp
from jax.experimental import pallas as pl
from jax.experimental.pallas import tpu as pltpu

LN_EPS = 1e-12
MM_PREC = jax.lax.Precision.HIGHEST  # full-f32 MXU passes -> parity with torch f32

VMEM = pl.BlockSpec(memory_space=pltpu.MemorySpace.VMEM)
SMEM = pl.BlockSpec(memory_space=pltpu.MemorySpace.SMEM)

CFG = dict(
    vocab_size=100,
    hidden_size=32,
    num_hidden_layers=2,
    num_attention_heads=2,
    intermediate_size=64,
    max_position_embeddings=64,
    type_vocab_size=2,
    num_labels=2,
    pad_token_id=0,
)


def _gelu_exact(x):
    # matches torch.nn.GELU() (erf form, not tanh approximation)
    return 0.5 * x * (1.0 + jax.lax.erf(x * (1.0 / math.sqrt(2.0))))


def _layernorm(x, gamma, beta):
    mean = jnp.mean(x, axis=-1, keepdims=True)
    var = jnp.mean(jnp.square(x - mean), axis=-1, keepdims=True)
    return (x - mean) * jax.lax.rsqrt(var + LN_EPS) * gamma + beta


def _matmul(a, b):
    return jnp.dot(a, b, preferred_element_type=jnp.float32, precision=MM_PREC)


# ---------------------------------------------------------------------------
# Fused whole-model encoder kernel
# ---------------------------------------------------------------------------
def model_kernel(
    conv_w_ref,                 # SMEM (18,)  flattened conv weight, idx = c*9+dy*3+dx
    taps_ref,                   # (9, B, 2, S, H) pre-shifted, zero-padded conv taps
    mask_ref,                   # (B, S) attention mask (1=keep, 0=pad), f32
    emb_g_ref, emb_b_ref,       # (1, H) embedding LayerNorm gamma/beta
    wqkv_ref, bqkv_ref,         # (L, H, 3H), (L, 1, 3H)  fused QKV projection
    wo_ref, bo_ref,             # (L, H, H), (L, 1, H)    attention output proj
    ln1g_ref, ln1b_ref,         # (L, 1, H)
    wi_ref, bi_ref,             # (L, H, I), (L, 1, I)    FFN intermediate
    wo2_ref, bo2_ref,           # (L, I, H), (L, 1, H)    FFN output
    ln2g_ref, ln2b_ref,         # (L, 1, H)
    *out_refs,
    num_layers, num_heads, output_hidden_states, output_attentions,
):
    seq_ref = out_refs[0]                      # (B, S, H) final hidden states
    ridx = 1
    hs_ref = None
    probs_ref = None
    if output_hidden_states:
        hs_ref = out_refs[ridx]; ridx += 1     # (L+1, B, S, H)
    if output_attentions:
        probs_ref = out_refs[ridx]; ridx += 1  # (L, B, nH, S, S)

    _, B, C, S, H = taps_ref.shape
    L = num_layers
    nH = num_heads
    dh = H // nH
    scale = 1.0 / math.sqrt(dh)

    # ---- Conv2DEmbeddings: 2-in / 1-out 3x3 "same" conv + GELU + LayerNorm ----
    acc = jnp.zeros((B, S, H), jnp.float32)
    for dy in range(3):
        for dx in range(3):
            for c in range(C):
                tap = taps_ref[dy * 3 + dx, :, c]              # (B, S, H), aligned
                acc = acc + conv_w_ref[c * 9 + dy * 3 + dx] * tap
    g = _gelu_exact(acc).reshape(B * S, H)
    x2d = _layernorm(g, emb_g_ref[...], emb_b_ref[...])        # (B*S, H)

    if hs_ref is not None:
        hs_ref[0] = x2d.reshape(B, S, H)

    # additive attention bias built in-kernel from the (B, S) mask
    bias = ((1.0 - mask_ref[...]) * -10000.0)[:, None, :]      # (B, 1, S)

    # ---- Transformer encoder layers (all weights VMEM-resident) ----
    for l in range(L):
        qkv = _matmul(x2d, wqkv_ref[l]) + bqkv_ref[l]          # (B*S, 3H)

        attn_out = bo_ref[l]                                   # (1, H), broadcasts
        for h in range(nH):
            q = qkv[:, 0 * H + h * dh: 0 * H + (h + 1) * dh].reshape(B, S, dh)
            k = qkv[:, 1 * H + h * dh: 1 * H + (h + 1) * dh].reshape(B, S, dh)
            v = qkv[:, 2 * H + h * dh: 2 * H + (h + 1) * dh].reshape(B, S, dh)

            s = jnp.einsum("bqd,bkd->bqk", q, k,
                           preferred_element_type=jnp.float32, precision=MM_PREC)
            s = s * scale + bias
            m = jnp.max(s, axis=-1, keepdims=True)
            e = jnp.exp(s - m)
            p = e * pl.reciprocal(jnp.sum(e, axis=-1, keepdims=True), approx=True)
            if probs_ref is not None:
                probs_ref[l, :, h, :, :] = p

            ctx = jnp.einsum("bqk,bkd->bqd", p, v,
                             preferred_element_type=jnp.float32,
                             precision=MM_PREC).reshape(B * S, dh)
            # head-merge fused into the output projection:
            #   ctx_full @ W_o == sum_h ctx_h @ W_o[h*dh:(h+1)*dh, :]
            attn_out = attn_out + _matmul(ctx, wo_ref[l, h * dh:(h + 1) * dh, :])

        h1 = _layernorm(attn_out + x2d, ln1g_ref[l], ln1b_ref[l])

        inter = _gelu_exact(_matmul(h1, wi_ref[l]) + bi_ref[l])
        ffn = _matmul(inter, wo2_ref[l]) + bo2_ref[l]
        x2d = _layernorm(ffn + h1, ln2g_ref[l], ln2b_ref[l])

        if hs_ref is not None:
            hs_ref[l + 1] = x2d.reshape(B, S, H)

    seq_ref[...] = x2d.reshape(B, S, H)


# ---------------------------------------------------------------------------
# JAX-side glue
# ---------------------------------------------------------------------------
def _conv_taps(combined):
    """(B, 2, S, H) -> (9, B, 2, S, H) zero-padded 3x3 taps, lane-aligned views."""
    B, C, S, H = combined.shape
    xpad = jnp.pad(combined, ((0, 0), (0, 0), (1, 1), (1, 1)))
    taps = [xpad[:, :, dy:dy + S, dx:dx + H] for dy in range(3) for dx in range(3)]
    return jnp.stack(taps, axis=0)


@functools.partial(jax.jit, static_argnames=("output_hidden_states", "output_attentions"))
def forward(params, input_ids, token_type_ids=None, attention_mask=None,
            output_hidden_states=True, output_attentions=True):
    B, S = input_ids.shape
    H = CFG["hidden_size"]
    L = CFG["num_hidden_layers"]
    nH = CFG["num_attention_heads"]

    if attention_mask is None:
        attention_mask = jnp.ones((B, S), jnp.float32)
    # token_type_ids are accepted but (exactly as in the PyTorch
    # Conv2DEmbeddings.forward) the token_type embedding is never added.

    # --- embedding gathers + conv-tap pre-shift stay in XLA (fused under jit) ---
    word_embeds = params["word_emb"][input_ids]                          # (B, S, H)
    pos_embeds = jnp.broadcast_to(params["pos_emb"][:S][None], (B, S, H))
    combined = jnp.stack([word_embeds, pos_embeds], axis=1)              # (B, 2, S, H)
    taps = _conv_taps(combined)                                          # (9, B, 2, S, H)
    mask = attention_mask.astype(jnp.float32)

    out_shapes = [jax.ShapeDtypeStruct((B, S, H), jnp.float32)]
    if output_hidden_states:
        out_shapes.append(jax.ShapeDtypeStruct((L + 1, B, S, H), jnp.float32))
    if output_attentions:
        out_shapes.append(jax.ShapeDtypeStruct((L, B, nH, S, S), jnp.float32))

    kernel = functools.partial(
        model_kernel, num_layers=L, num_heads=nH,
        output_hidden_states=output_hidden_states,
        output_attentions=output_attentions)

    outs = pl.pallas_call(
        kernel,
        out_shape=tuple(out_shapes),
        in_specs=[SMEM] + [VMEM] * 16,
        out_specs=tuple([VMEM] * len(out_shapes)),
    )(
        params["conv_w"].reshape(-1),
        taps, mask,
        params["emb_ln_g"], params["emb_ln_b"],
        params["wqkv"], params["bqkv"],
        params["wo"], params["bo"],
        params["ln1_g"], params["ln1_b"],
        params["wi"], params["bi"],
        params["wo2"], params["bo2"],
        params["ln2_g"], params["ln2_b"],
    )

    seq_out = outs[0]
    idx = 1
    hidden_states = None
    attentions = None
    if output_hidden_states:
        hs = outs[idx]; idx += 1
        hidden_states = tuple(hs[i] for i in range(L + 1))
    if output_attentions:
        at = outs[idx]; idx += 1
        attentions = tuple(at[i] for i in range(L))

    # --- pooler + classifier head: N=2 lanes -> plain XLA dots (fused by jit) ---
    cls_tok = seq_out[:, 0, :]                                           # (B, H)
    pooled = jnp.tanh(cls_tok @ params["pool_w"] + params["pool_b"])
    logits = pooled @ params["cls_w"] + params["cls_b"]
    # TODO(synk): hidden/attention/classifier dropout modelled as identity (eval mode)

    return logits, hidden_states, attentions


# ---------------------------------------------------------------------------
# Deterministic parameter init (fused-QKV, layer-stacked layout)
# ---------------------------------------------------------------------------
def init_params(key):
    H = CFG["hidden_size"]
    I = CFG["intermediate_size"]
    L = CFG["num_hidden_layers"]

    def nrm(k, shape, scale=0.02):
        return scale * jax.random.normal(k, shape, jnp.float32)

    keys = iter(jax.random.split(key, 64))
    p = {}
    word = nrm(next(keys), (CFG["vocab_size"], H))
    p["word_emb"] = word.at[CFG["pad_token_id"]].set(0.0)   # padding_idx behaviour
    p["pos_emb"] = nrm(next(keys), (CFG["max_position_embeddings"], H))
    # token_type_embeddings exists in the module but is never added in forward
    p["type_emb"] = nrm(next(keys), (CFG["type_vocab_size"], H))
    p["conv_w"] = nrm(next(keys), (1, 2, 3, 3))
    p["emb_ln_g"] = jnp.ones((1, H), jnp.float32)
    p["emb_ln_b"] = jnp.zeros((1, H), jnp.float32)

    wqkv, wo, wi, wo2 = [], [], [], []
    for _ in range(L):
        wq, wk, wv = (nrm(next(keys), (H, H)) for _ in range(3))
        wqkv.append(jnp.concatenate([wq, wk, wv], axis=1))   # fused QKV (H, 3H)
        wo.append(nrm(next(keys), (H, H)))
        wi.append(nrm(next(keys), (H, I)))
        wo2.append(nrm(next(keys), (I, H)))
    p["wqkv"] = jnp.stack(wqkv)                              # (L, H, 3H)
    p["bqkv"] = jnp.zeros((L, 1, 3 * H), jnp.float32)
    p["wo"] = jnp.stack(wo)                                  # (L, H, H)
    p["bo"] = jnp.zeros((L, 1, H), jnp.float32)
    p["ln1_g"] = jnp.ones((L, 1, H), jnp.float32)
    p["ln1_b"] = jnp.zeros((L, 1, H), jnp.float32)
    p["wi"] = jnp.stack(wi)                                  # (L, H, I)
    p["bi"] = jnp.zeros((L, 1, I), jnp.float32)
    p["wo2"] = jnp.stack(wo2)                                # (L, I, H)
    p["bo2"] = jnp.zeros((L, 1, H), jnp.float32)
    p["ln2_g"] = jnp.ones((L, 1, H), jnp.float32)
    p["ln2_b"] = jnp.zeros((L, 1, H), jnp.float32)

    p["pool_w"] = nrm(next(keys), (H, H))
    p["pool_b"] = jnp.zeros((H,), jnp.float32)
    p["cls_w"] = nrm(next(keys), (H, CFG["num_labels"]))
    p["cls_b"] = jnp.zeros((CFG["num_labels"],), jnp.float32)
    return p


# ---------------------------------------------------------------------------
if __name__ == "__main__":
    key = jax.random.PRNGKey(0)
    pkey, dkey = jax.random.split(key)
    params = init_params(pkey)

    B, S = 2, 8
    input_ids = jax.random.randint(dkey, (B, S), 1, CFG["vocab_size"], dtype=jnp.int32)
    token_type_ids = jnp.zeros((B, S), jnp.int32)
    attention_mask = jnp.ones((B, S), jnp.float32).at[1, -2:].set(0.0)

    logits, hidden_states, attentions = forward(
        params, input_ids, token_type_ids, attention_mask)

    jax.block_until_ready(logits)
    jax.block_until_ready(hidden_states)
    jax.block_until_ready(attentions)

    assert logits.shape == (B, CFG["num_labels"])
    assert len(hidden_states) == CFG["num_hidden_layers"] + 1
    assert len(attentions) == CFG["num_hidden_layers"]
    assert attentions[0].shape == (B, CFG["num_attention_heads"], S, S)
    print("KERNEL_OK")
</pallas_src>

<mosaic_0001>
module attributes {stable_mosaic.version = 11 : i64} {
  func.func @model_kernel(%arg0: memref<18xf32, #tpu.memory_space<smem>>, %arg1: memref<9x2x2x8x32xf32, #tpu.memory_space<vmem>>, %arg2: memref<2x8xf32, #tpu.memory_space<vmem>>, %arg3: memref<1x32xf32, #tpu.memory_space<vmem>>, %arg4: memref<1x32xf32, #tpu.memory_space<vmem>>, %arg5: memref<2x32x96xf32, #tpu.memory_space<vmem>>, %arg6: memref<2x1x96xf32, #tpu.memory_space<vmem>>, %arg7: memref<2x32x32xf32, #tpu.memory_space<vmem>>, %arg8: memref<2x1x32xf32, #tpu.memory_space<vmem>>, %arg9: memref<2x1x32xf32, #tpu.memory_space<vmem>>, %arg10: memref<2x1x32xf32, #tpu.memory_space<vmem>>, %arg11: memref<2x32x64xf32, #tpu.memory_space<vmem>>, %arg12: memref<2x1x64xf32, #tpu.memory_space<vmem>>, %arg13: memref<2x64x32xf32, #tpu.memory_space<vmem>>, %arg14: memref<2x1x32xf32, #tpu.memory_space<vmem>>, %arg15: memref<2x1x32xf32, #tpu.memory_space<vmem>>, %arg16: memref<2x1x32xf32, #tpu.memory_space<vmem>>, %arg17: memref<2x8x32xf32, #tpu.memory_space<vmem>>, %arg18: memref<3x2x8x32xf32, #tpu.memory_space<vmem>>, %arg19: memref<2x2x2x8x8xf32, #tpu.memory_space<vmem>>) attributes {dimension_semantics = [], scalar_prefetch = 0 : i64, scratch_operands = 0 : i64, tpu.core_type = #tpu.core_type<tc>} {
    %cst = arith.constant 0.000000e+00 : f32
    %0 = vector.broadcast %cst : f32 to vector<2x8x32xf32>
    %c0 = arith.constant 0 : index
    %c0_0 = arith.constant 0 : index
    %c0_1 = arith.constant 0 : index
    %c0_2 = arith.constant 0 : index
    %c0_3 = arith.constant 0 : index
    %1 = vector.load %arg1[%c0, %c0_0, %c0_1, %c0_2, %c0_3] : memref<9x2x2x8x32xf32, #tpu.memory_space<vmem>>, vector<1x2x1x8x32xf32>
    %2 = vector.shape_cast %1 : vector<1x2x1x8x32xf32> to vector<2x8x32xf32>
    %c0_4 = arith.constant 0 : index
    %3 = memref.load %arg0[%c0_4] : memref<18xf32, #tpu.memory_space<smem>>
    %4 = vector.broadcast %3 : f32 to vector<2x8x32xf32>
    %5 = arith.mulf %4, %2 : vector<2x8x32xf32>
    %6 = arith.addf %0, %5 : vector<2x8x32xf32>
    %c0_5 = arith.constant 0 : index
    %c0_6 = arith.constant 0 : index
    %c1 = arith.constant 1 : index
    %c0_7 = arith.constant 0 : index
    %c0_8 = arith.constant 0 : index
    %7 = vector.load %arg1[%c0_5, %c0_6, %c1, %c0_7, %c0_8] : memref<9x2x2x8x32xf32, #tpu.memory_space<vmem>>, vector<1x2x1x8x32xf32>
    %8 = vector.shape_cast %7 : vector<1x2x1x8x32xf32> to vector<2x8x32xf32>
    %c9 = arith.constant 9 : index
    %9 = memref.load %arg0[%c9] : memref<18xf32, #tpu.memory_space<smem>>
    %10 = vector.broadcast %9 : f32 to vector<2x8x32xf32>
    %11 = arith.mulf %10, %8 : vector<2x8x32xf32>
    %12 = arith.addf %6, %11 : vector<2x8x32xf32>
    %c1_9 = arith.constant 1 : index
    %c0_10 = arith.constant 0 : index
    %c0_11 = arith.constant 0 : index
    %c0_12 = arith.constant 0 : index
    %c0_13 = arith.constant 0 : index
    %13 = vector.load %arg1[%c1_9, %c0_10, %c0_11, %c0_12, %c0_13] : memref<9x2x2x8x32xf32, #tpu.memory_space<vmem>>, vector<1x2x1x8x32xf32>
    %14 = vector.shape_cast %13 : vector<1x2x1x8x32xf32> to vector<2x8x32xf32>
    %c1_14 = arith.constant 1 : index
    %15 = memref.load %arg0[%c1_14] : memref<18xf32, #tpu.memory_space<smem>>
    %16 = vector.broadcast %15 : f32 to vector<2x8x32xf32>
    %17 = arith.mulf %16, %14 : vector<2x8x32xf32>
    %18 = arith.addf %12, %17 : vector<2x8x32xf32>
    %c1_15 = arith.constant 1 : index
    %c0_16 = arith.constant 0 : index
    %c1_17 = arith.constant 1 : index
    %c0_18 = arith.constant 0 : index
    %c0_19 = arith.constant 0 : index
    %19 = vector.load %arg1[%c1_15, %c0_16, %c1_17, %c0_18, %c0_19] : memref<9x2x2x8x32xf32, #tpu.memory_space<vmem>>, vector<1x2x1x8x32xf32>
    %20 = vector.shape_cast %19 : vector<1x2x1x8x32xf32> to vector<2x8x32xf32>
    %c10 = arith.constant 10 : index
    %21 = memref.load %arg0[%c10] : memref<18xf32, #tpu.memory_space<smem>>
    %22 = vector.broadcast %21 : f32 to vector<2x8x32xf32>
    %23 = arith.mulf %22, %20 : vector<2x8x32xf32>
    %24 = arith.addf %18, %23 : vector<2x8x32xf32>
    %c2 = arith.constant 2 : index
    %c0_20 = arith.constant 0 : index
    %c0_21 = arith.constant 0 : index
    %c0_22 = arith.constant 0 : index
    %c0_23 = arith.constant 0 : index
    %25 = vector.load %arg1[%c2, %c0_20, %c0_21, %c0_22, %c0_23] : memref<9x2x2x8x32xf32, #tpu.memory_space<vmem>>, vector<1x2x1x8x32xf32>
    %26 = vector.shape_cast %25 : vector<1x2x1x8x32xf32> to vector<2x8x32xf32>
    %c2_24 = arith.constant 2 : index
    %27 = memref.load %arg0[%c2_24] : memref<18xf32, #tpu.memory_space<smem>>
    %28 = vector.broadcast %27 : f32 to vector<2x8x32xf32>
    %29 = arith.mulf %28, %26 : vector<2x8x32xf32>
    %30 = arith.addf %24, %29 : vector<2x8x32xf32>
    %c2_25 = arith.constant 2 : index
    %c0_26 = arith.constant 0 : index
    %c1_27 = arith.constant 1 : index
    %c0_28 = arith.constant 0 : index
    %c0_29 = arith.constant 0 : index
    %31 = vector.load %arg1[%c2_25, %c0_26, %c1_27, %c0_28, %c0_29] : memref<9x2x2x8x32xf32, #tpu.memory_space<vmem>>, vector<1x2x1x8x32xf32>
    %32 = vector.shape_cast %31 : vector<1x2x1x8x32xf32> to vector<2x8x32xf32>
    %c11 = arith.constant 11 : index
    %33 = memref.load %arg0[%c11] : memref<18xf32, #tpu.memory_space<smem>>
    %34 = vector.broadcast %33 : f32 to vector<2x8x32xf32>
    %35 = arith.mulf %34, %32 : vector<2x8x32xf32>
    %36 = arith.addf %30, %35 : vector<2x8x32xf32>
    %c3 = arith.constant 3 : index
    %c0_30 = arith.constant 0 : index
    %c0_31 = arith.constant 0 : index
    %c0_32 = arith.constant 0 : index
    %c0_33 = arith.constant 0 : index
    %37 = vector.load %arg1[%c3, %c0_30, %c0_31, %c0_32, %c0_33] : memref<9x2x2x8x32xf32, #tpu.memory_space<vmem>>, vector<1x2x1x8x32xf32>
    %38 = vector.shape_cast %37 : vector<1x2x1x8x32xf32> to vector<2x8x32xf32>
    %c3_34 = arith.constant 3 : index
    %39 = memref.load %arg0[%c3_34] : memref<18xf32, #tpu.memory_space<smem>>
    %40 = vector.broadcast %39 : f32 to vector<2x8x32xf32>
    %41 = arith.mulf %40, %38 : vector<2x8x32xf32>
    %42 = arith.addf %36, %41 : vector<2x8x32xf32>
    %c3_35 = arith.constant 3 : index
    %c0_36 = arith.constant 0 : index
    %c1_37 = arith.constant 1 : index
    %c0_38 = arith.constant 0 : index
    %c0_39 = arith.constant 0 : index
    %43 = vector.load %arg1[%c3_35, %c0_36, %c1_37, %c0_38, %c0_39] : memref<9x2x2x8x32xf32, #tpu.memory_space<vmem>>, vector<1x2x1x8x32xf32>
    %44 = vector.shape_cast %43 : vector<1x2x1x8x32xf32> to vector<2x8x32xf32>
    %c12 = arith.constant 12 : index
    %45 = memref.load %arg0[%c12] : memref<18xf32, #tpu.memory_space<smem>>
    %46 = vector.broadcast %45 : f32 to vector<2x8x32xf32>
    %47 = arith.mulf %46, %44 : vector<2x8x32xf32>
    %48 = arith.addf %42, %47 : vector<2x8x32xf32>
    %c4 = arith.constant 4 : index
    %c0_40 = arith.constant 0 : index
    %c0_41 = arith.constant 0 : index
    %c0_42 = arith.constant 0 : index
    %c0_43 = arith.constant 0 : index
    %49 = vector.load %arg1[%c4, %c0_40, %c0_41, %c0_42, %c0_43] : memref<9x2x2x8x32xf32, #tpu.memory_space<vmem>>, vector<1x2x1x8x32xf32>
    %50 = vector.shape_cast %49 : vector<1x2x1x8x32xf32> to vector<2x8x32xf32>
    %c4_44 = arith.constant 4 : index
    %51 = memref.load %arg0[%c4_44] : memref<18xf32, #tpu.memory_space<smem>>
    %52 = vector.broadcast %51 : f32 to vector<2x8x32xf32>
    %53 = arith.mulf %52, %50 : vector<2x8x32xf32>
    %54 = arith.addf %48, %53 : vector<2x8x32xf32>
    %c4_45 = arith.constant 4 : index
    %c0_46 = arith.constant 0 : index
    %c1_47 = arith.constant 1 : index
    %c0_48 = arith.constant 0 : index
    %c0_49 = arith.constant 0 : index
    %55 = vector.load %arg1[%c4_45, %c0_46, %c1_47, %c0_48, %c0_49] : memref<9x2x2x8x32xf32, #tpu.memory_space<vmem>>, vector<1x2x1x8x32xf32>
    %56 = vector.shape_cast %55 : vector<1x2x1x8x32xf32> to vector<2x8x32xf32>
    %c13 = arith.constant 13 : index
    %57 = memref.load %arg0[%c13] : memref<18xf32, #tpu.memory_space<smem>>
    %58 = vector.broadcast %57 : f32 to vector<2x8x32xf32>
    %59 = arith.mulf %58, %56 : vector<2x8x32xf32>
    %60 = arith.addf %54, %59 : vector<2x8x32xf32>
    %c5 = arith.constant 5 : index
    %c0_50 = arith.constant 0 : index
    %c0_51 = arith.constant 0 : index
    %c0_52 = arith.constant 0 : index
    %c0_53 = arith.constant 0 : index
    %61 = vector.load %arg1[%c5, %c0_50, %c0_51, %c0_52, %c0_53] : memref<9x2x2x8x32xf32, #tpu.memory_space<vmem>>, vector<1x2x1x8x32xf32>
    %62 = vector.shape_cast %61 : vector<1x2x1x8x32xf32> to vector<2x8x32xf32>
    %c5_54 = arith.constant 5 : index
    %63 = memref.load %arg0[%c5_54] : memref<18xf32, #tpu.memory_space<smem>>
    %64 = vector.broadcast %63 : f32 to vector<2x8x32xf32>
    %65 = arith.mulf %64, %62 : vector<2x8x32xf32>
    %66 = arith.addf %60, %65 : vector<2x8x32xf32>
    %c5_55 = arith.constant 5 : index
    %c0_56 = arith.constant 0 : index
    %c1_57 = arith.constant 1 : index
    %c0_58 = arith.constant 0 : index
    %c0_59 = arith.constant 0 : index
    %67 = vector.load %arg1[%c5_55, %c0_56, %c1_57, %c0_58, %c0_59] : memref<9x2x2x8x32xf32, #tpu.memory_space<vmem>>, vector<1x2x1x8x32xf32>
    %68 = vector.shape_cast %67 : vector<1x2x1x8x32xf32> to vector<2x8x32xf32>
    %c14 = arith.constant 14 : index
    %69 = memref.load %arg0[%c14] : memref<18xf32, #tpu.memory_space<smem>>
    %70 = vector.broadcast %69 : f32 to vector<2x8x32xf32>
    %71 = arith.mulf %70, %68 : vector<2x8x32xf32>
    %72 = arith.addf %66, %71 : vector<2x8x32xf32>
    %c6 = arith.constant 6 : index
    %c0_60 = arith.constant 0 : index
    %c0_61 = arith.constant 0 : index
    %c0_62 = arith.constant 0 : index
    %c0_63 = arith.constant 0 : index
    %73 = vector.load %arg1[%c6, %c0_60, %c0_61, %c0_62, %c0_63] : memref<9x2x2x8x32xf32, #tpu.memory_space<vmem>>, vector<1x2x1x8x32xf32>
    %74 = vector.shape_cast %73 : vector<1x2x1x8x32xf32> to vector<2x8x32xf32>
    %c6_64 = arith.constant 6 : index
    %75 = memref.load %arg0[%c6_64] : memref<18xf32, #tpu.memory_space<smem>>
    %76 = vector.broadcast %75 : f32 to vector<2x8x32xf32>
    %77 = arith.mulf %76, %74 : vector<2x8x32xf32>
    %78 = arith.addf %72, %77 : vector<2x8x32xf32>
    %c6_65 = arith.constant 6 : index
    %c0_66 = arith.constant 0 : index
    %c1_67 = arith.constant 1 : index
    %c0_68 = arith.constant 0 : index
    %c0_69 = arith.constant 0 : index
    %79 = vector.load %arg1[%c6_65, %c0_66, %c1_67, %c0_68, %c0_69] : memref<9x2x2x8x32xf32, #tpu.memory_space<vmem>>, vector<1x2x1x8x32xf32>
    %80 = vector.shape_cast %79 : vector<1x2x1x8x32xf32> to vector<2x8x32xf32>
    %c15 = arith.constant 15 : index
    %81 = memref.load %arg0[%c15] : memref<18xf32, #tpu.memory_space<smem>>
    %82 = vector.broadcast %81 : f32 to vector<2x8x32xf32>
    %83 = arith.mulf %82, %80 : vector<2x8x32xf32>
    %84 = arith.addf %78, %83 : vector<2x8x32xf32>
    %c7 = arith.constant 7 : index
    %c0_70 = arith.constant 0 : index
    %c0_71 = arith.constant 0 : index
    %c0_72 = arith.constant 0 : index
    %c0_73 = arith.constant 0 : index
    %85 = vector.load %arg1[%c7, %c0_70, %c0_71, %c0_72, %c0_73] : memref<9x2x2x8x32xf32, #tpu.memory_space<vmem>>, vector<1x2x1x8x32xf32>
    %86 = vector.shape_cast %85 : vector<1x2x1x8x32xf32> to vector<2x8x32xf32>
    %c7_74 = arith.constant 7 : index
    %87 = memref.load %arg0[%c7_74] : memref<18xf32, #tpu.memory_space<smem>>
    %88 = vector.broadcast %87 : f32 to vector<2x8x32xf32>
    %89 = arith.mulf %88, %86 : vector<2x8x32xf32>
    %90 = arith.addf %84, %89 : vector<2x8x32xf32>
    %c7_75 = arith.constant 7 : index
    %c0_76 = arith.constant 0 : index
    %c1_77 = arith.constant 1 : index
    %c0_78 = arith.constant 0 : index
    %c0_79 = arith.constant 0 : index
    %91 = vector.load %arg1[%c7_75, %c0_76, %c1_77, %c0_78, %c0_79] : memref<9x2x2x8x32xf32, #tpu.memory_space<vmem>>, vector<1x2x1x8x32xf32>
    %92 = vector.shape_cast %91 : vector<1x2x1x8x32xf32> to vector<2x8x32xf32>
    %c16 = arith.constant 16 : index
    %93 = memref.load %arg0[%c16] : memref<18xf32, #tpu.memory_space<smem>>
    %94 = vector.broadcast %93 : f32 to vector<2x8x32xf32>
    %95 = arith.mulf %94, %92 : vector<2x8x32xf32>
    %96 = arith.addf %90, %95 : vector<2x8x32xf32>
    %c8 = arith.constant 8 : index
    %c0_80 = arith.constant 0 : index
    %c0_81 = arith.constant 0 : index
    %c0_82 = arith.constant 0 : index
    %c0_83 = arith.constant 0 : index
    %97 = vector.load %arg1[%c8, %c0_80, %c0_81, %c0_82, %c0_83] : memref<9x2x2x8x32xf32, #tpu.memory_space<vmem>>, vector<1x2x1x8x32xf32>
    %98 = vector.shape_cast %97 : vector<1x2x1x8x32xf32> to vector<2x8x32xf32>
    %c8_84 = arith.constant 8 : index
    %99 = memref.load %arg0[%c8_84] : memref<18xf32, #tpu.memory_space<smem>>
    %100 = vector.broadcast %99 : f32 to vector<2x8x32xf32>
    %101 = arith.mulf %100, %98 : vector<2x8x32xf32>
    %102 = arith.addf %96, %101 : vector<2x8x32xf32>
    %c8_85 = arith.constant 8 : index
    %c0_86 = arith.constant 0 : index
    %c1_87 = arith.constant 1 : index
    %c0_88 = arith.constant 0 : index
    %c0_89 = arith.constant 0 : index
    %103 = vector.load %arg1[%c8_85, %c0_86, %c1_87, %c0_88, %c0_89] : memref<9x2x2x8x32xf32, #tpu.memory_space<vmem>>, vector<1x2x1x8x32xf32>
    %104 = vector.shape_cast %103 : vector<1x2x1x8x32xf32> to vector<2x8x32xf32>
    %c17 = arith.constant 17 : index
    %105 = memref.load %arg0[%c17] : memref<18xf32, #tpu.memory_space<smem>>
    %106 = vector.broadcast %105 : f32 to vector<2x8x32xf32>
    %107 = arith.mulf %106, %104 : vector<2x8x32xf32>
    %108 = arith.addf %102, %107 : vector<2x8x32xf32>
    %cst_90 = arith.constant 5.000000e-01 : f32
    %109 = vector.broadcast %cst_90 : f32 to vector<2x8x32xf32>
    %110 = arith.mulf %109, %108 : vector<2x8x32xf32>
    %cst_91 = arith.constant 0.707106769 : f32
    %111 = vector.broadcast %cst_91 : f32 to vector<2x8x32xf32>
    %112 = arith.mulf %108, %111 : vector<2x8x32xf32>
    %113 = math.erf %112 : vector<2x8x32xf32>
    %cst_92 = arith.constant 1.000000e+00 : f32
    %114 = vector.broadcast %cst_92 : f32 to vector<2x8x32xf32>
    %115 = arith.addf %114, %113 : vector<2x8x32xf32>
    %116 = arith.mulf %110, %115 : vector<2x8x32xf32>
    %117 = vector.shape_cast %116 : vector<2x8x32xf32> to vector<16x32xf32>
    %c0_93 = arith.constant 0 : index
    %c0_94 = arith.constant 0 : index
    %118 = vector.load %arg3[%c0_93, %c0_94] : memref<1x32xf32, #tpu.memory_space<vmem>>, vector<1x32xf32>
    %c0_95 = arith.constant 0 : index
    %c0_96 = arith.constant 0 : index
    %119 = vector.load %arg4[%c0_95, %c0_96] : memref<1x32xf32, #tpu.memory_space<vmem>>, vector<1x32xf32>
    %cst_97 = arith.constant dense<0.000000e+00> : vector<16xf32>
    %120 = vector.multi_reduction <add>, %117, %cst_97 [1] : vector<16x32xf32> to vector<16xf32>
    %121 = vector.shape_cast %120 : vector<16xf32> to vector<16x1xf32>
    %cst_98 = arith.constant 3.200000e+01 : f32
    %122 = vector.broadcast %cst_98 : f32 to vector<16x1xf32>
    %123 = arith.divf %121, %122 : vector<16x1xf32>
    %124 = vector.broadcast %123 : vector<16x1xf32> to vector<16x32xf32>
    %125 = arith.subf %117, %124 : vector<16x32xf32>
    %126 = arith.mulf %125, %125 : vector<16x32xf32>
    %cst_99 = arith.constant dense<0.000000e+00> : vector<16xf32>
    %127 = vector.multi_reduction <add>, %126, %cst_99 [1] : vector<16x32xf32> to vector<16xf32>
    %128 = vector.shape_cast %127 : vector<16xf32> to vector<16x1xf32>
    %cst_100 = arith.constant 3.200000e+01 : f32
    %129 = vector.broadcast %cst_100 : f32 to vector<16x1xf32>
    %130 = arith.divf %128, %129 : vector<16x1xf32>
    %131 = vector.broadcast %123 : vector<16x1xf32> to vector<16x32xf32>
    %132 = arith.subf %117, %131 : vector<16x32xf32>
    %cst_101 = arith.constant 9.99999996E-13 : f32
    %133 = vector.broadcast %cst_101 : f32 to vector<16x1xf32>
    %134 = arith.addf %130, %133 : vector<16x1xf32>
    %135 = math.rsqrt %134 : vector<16x1xf32>
    %136 = vector.broadcast %135 : vector<16x1xf32> to vector<16x32xf32>
    %137 = arith.mulf %132, %136 : vector<16x32xf32>
    %138 = vector.broadcast %118 : vector<1x32xf32> to vector<16x32xf32>
    %139 = arith.mulf %137, %138 : vector<16x32xf32>
    %140 = vector.broadcast %119 : vector<1x32xf32> to vector<16x32xf32>
    %141 = arith.addf %139, %140 : vector<16x32xf32>
    %142 = vector.shape_cast %141 : vector<16x32xf32> to vector<2x8x32xf32>
    %c0_102 = arith.constant 0 : index
    %c0_103 = arith.constant 0 : index
    %c0_104 = arith.constant 0 : index
    %c0_105 = arith.constant 0 : index
    %143 = vector.load %arg18[%c0_102, %c0_103, %c0_104, %c0_105] : memref<3x2x8x32xf32, #tpu.memory_space<vmem>>, vector<1x2x8x32xf32>
    %144 = vector.shape_cast %143 : vector<1x2x8x32xf32> to vector<2x8x32xf32>
    %145 = vector.shape_cast %142 : vector<2x8x32xf32> to vector<1x2x8x32xf32>
    tpu.vector_store %arg18[%c0_102, %c0_103, %c0_104, %c0_105], %145 {strides = array<i32>} : memref<3x2x8x32xf32, #tpu.memory_space<vmem>>, vector<1x2x8x32xf32>,
    %c0_106 = arith.constant 0 : index
    %c0_107 = arith.constant 0 : index
    %146 = vector.load %arg2[%c0_106, %c0_107] : memref<2x8xf32, #tpu.memory_space<vmem>>, vector<2x8xf32>
    %cst_108 = arith.constant 1.000000e+00 : f32
    %147 = vector.broadcast %cst_108 : f32 to vector<2x8xf32>
    %148 = arith.subf %147, %146 : vector<2x8xf32>
    %cst_109 = arith.constant -1.000000e+04 : f32
    %149 = vector.broadcast %cst_109 : f32 to vector<2x8xf32>
    %150 = arith.mulf %148, %149 : vector<2x8xf32>
    %151 = vector.shape_cast %150 : vector<2x8xf32> to vector<2x1x8xf32>
    %c0_110 = arith.constant 0 : index
    %c0_111 = arith.constant 0 : index
    %c0_112 = arith.constant 0 : index
    %152 = vector.load %arg5[%c0_110, %c0_111, %c0_112] : memref<2x32x96xf32, #tpu.memory_space<vmem>>, vector<1x32x96xf32>
    %153 = vector.shape_cast %152 : vector<1x32x96xf32> to vector<32x96xf32>
    %cst_113 = arith.constant dense<0.000000e+00> : vector<16x96xf32>
    %154 = tpu.matmul %141, %153, %cst_113 {dimension_numbers = #tpu.dot_dimension_numbers<[1], [0], [0], [1], [0, 0, 1, 1], [], []>, precision = #tpu.contract_precision<fp32>} : vector<16x32xf32>, vector<32x96xf32>, vector<16x96xf32> -> vector<16x96xf32>
    %c0_114 = arith.constant 0 : index
    %c0_115 = arith.constant 0 : index
    %c0_116 = arith.constant 0 : index
    %155 = vector.load %arg6[%c0_114, %c0_115, %c0_116] : memref<2x1x96xf32, #tpu.memory_space<vmem>>, vector<1x1x96xf32>
    %156 = vector.shape_cast %155 : vector<1x1x96xf32> to vector<1x96xf32>
    %157 = vector.broadcast %156 : vector<1x96xf32> to vector<16x96xf32>
    %158 = arith.addf %154, %157 : vector<16x96xf32>
    %c0_117 = arith.constant 0 : index
    %c0_118 = arith.constant 0 : index
    %c0_119 = arith.constant 0 : index
    %159 = vector.load %arg8[%c0_117, %c0_118, %c0_119] : memref<2x1x32xf32, #tpu.memory_space<vmem>>, vector<1x1x32xf32>
    %160 = vector.shape_cast %159 : vector<1x1x32xf32> to vector<1x32xf32>
    %161 = vector.extract_strided_slice %158 {offsets = [0, 0], sizes = [16, 16], strides = [1, 1]} : vector<16x96xf32> to vector<16x16xf32>
    %162 = vector.shape_cast %161 : vector<16x16xf32> to vector<2x8x16xf32>
    %163 = vector.extract_strided_slice %158 {offsets = [0, 32], sizes = [16, 16], strides = [1, 1]} : vector<16x96xf32> to vector<16x16xf32>
    %164 = vector.shape_cast %163 : vector<16x16xf32> to vector<2x8x16xf32>
    %165 = vector.extract_strided_slice %158 {offsets = [0, 64], sizes = [16, 16], strides = [1, 1]} : vector<16x96xf32> to vector<16x16xf32>
    %166 = vector.shape_cast %165 : vector<16x16xf32> to vector<2x8x16xf32>
    "tpu.trace_start"() <{level = 10 : i32, message = "bqd,bkd->bqk"}> : () -> ()
    %cst_120 = arith.constant dense<0.000000e+00> : vector<2x8x8xf32>
    %167 = tpu.matmul %162, %164, %cst_120 {dimension_numbers = #tpu.dot_dimension_numbers<[2], [2], [1], [1], [0, 0, 0, 1, 1, 1], [0], [0]>, precision = #tpu.contract_precision<fp32>} : vector<2x8x16xf32>, vector<2x8x16xf32>, vector<2x8x8xf32> -> vector<2x8x8xf32>
    "tpu.trace_stop"() : () -> ()
    %cst_121 = arith.constant 2.500000e-01 : f32
    %168 = vector.broadcast %cst_121 : f32 to vector<2x8x8xf32>
    %169 = arith.mulf %167, %168 : vector<2x8x8xf32>
    %170 = vector.broadcast %151 : vector<2x1x8xf32> to vector<2x8x8xf32>
    %171 = arith.addf %169, %170 : vector<2x8x8xf32>
    %cst_122 = arith.constant dense<0xFF800000> : vector<2x8xf32>
    %172 = vector.multi_reduction <maximumf>, %171, %cst_122 [2] : vector<2x8x8xf32> to vector<2x8xf32>
    %173 = vector.shape_cast %172 : vector<2x8xf32> to vector<2x8x1xf32>
    %174 = vector.broadcast %173 : vector<2x8x1xf32> to vector<2x8x8xf32>
    %175 = arith.subf %171, %174 : vector<2x8x8xf32>
    %176 = math.exp %175 : vector<2x8x8xf32>
    %cst_123 = arith.constant dense<0.000000e+00> : vector<2x8xf32>
    %177 = vector.multi_reduction <add>, %176, %cst_123 [2] : vector<2x8x8xf32> to vector<2x8xf32>
    %178 = vector.shape_cast %177 : vector<2x8xf32> to vector<2x8x1xf32>
    %179 = tpu.reciprocal %178 {approx = true} : vector<2x8x1xf32> -> vector<2x8x1xf32>
    %180 = vector.broadcast %179 : vector<2x8x1xf32> to vector<2x8x8xf32>
    %181 = arith.mulf %176, %180 : vector<2x8x8xf32>
    %c0_124 = arith.constant 0 : index
    %c0_125 = arith.constant 0 : index
    %c0_126 = arith.constant 0 : index
    %c0_127 = arith.constant 0 : index
    %c0_128 = arith.constant 0 : index
    %182 = vector.load %arg19[%c0_124, %c0_125, %c0_126, %c0_127, %c0_128] : memref<2x2x2x8x8xf32, #tpu.memory_space<vmem>>, vector<1x2x1x8x8xf32>
    %183 = vector.shape_cast %182 : vector<1x2x1x8x8xf32> to vector<2x8x8xf32>
    %184 = vector.shape_cast %181 : vector<2x8x8xf32> to vector<1x2x1x8x8xf32>
    tpu.vector_store %arg19[%c0_124, %c0_125, %c0_126, %c0_127, %c0_128], %184 {strides = array<i32>} : memref<2x2x2x8x8xf32, #tpu.memory_space<vmem>>, vector<1x2x1x8x8xf32>,
    "tpu.trace_start"() <{level = 10 : i32, message = "bqk,bkd->bqd"}> : () -> ()
    %cst_129 = arith.constant dense<0.000000e+00> : vector<2x8x16xf32>
    %185 = tpu.matmul %181, %166, %cst_129 {dimension_numbers = #tpu.dot_dimension_numbers<[2], [1], [1], [2], [0, 0, 0, 1, 1, 2], [0], [0]>, precision = #tpu.contract_precision<fp32>} : vector<2x8x8xf32>, vector<2x8x16xf32>, vector<2x8x16xf32> -> vector<2x8x16xf32>
    "tpu.trace_stop"() : () -> ()
    %186 = vector.shape_cast %185 : vector<2x8x16xf32> to vector<16x16xf32>
    %c0_130 = arith.constant 0 : index
    %c0_131 = arith.constant 0 : index
    %c0_132 = arith.constant 0 : index
    %187 = vector.load %arg7[%c0_130, %c0_131, %c0_132] : memref<2x32x32xf32, #tpu.memory_space<vmem>>, vector<1x16x32xf32>
    %188 = vector.shape_cast %187 : vector<1x16x32xf32> to vector<16x32xf32>
    %cst_133 = arith.constant dense<0.000000e+00> : vector<16x32xf32>
    %189 = tpu.matmul %186, %188, %cst_133 {dimension_numbers = #tpu.dot_dimension_numbers<[1], [0], [0], [1], [0, 0, 1, 1], [], []>, precision = #tpu.contract_precision<fp32>} : vector<16x16xf32>, vector<16x32xf32>, vector<16x32xf32> -> vector<16x32xf32>
    %190 = vector.broadcast %160 : vector<1x32xf32> to vector<16x32xf32>
    %191 = arith.addf %190, %189 : vector<16x32xf32>
    %192 = vector.extract_strided_slice %158 {offsets = [0, 16], sizes = [16, 16], strides = [1, 1]} : vector<16x96xf32> to vector<16x16xf32>
    %193 = vector.shape_cast %192 : vector<16x16xf32> to vector<2x8x16xf32>
    %194 = vector.extract_strided_slice %158 {offsets = [0, 48], sizes = [16, 16], strides = [1, 1]} : vector<16x96xf32> to vector<16x16xf32>
    %195 = vector.shape_cast %194 : vector<16x16xf32> to vector<2x8x16xf32>
    %196 = vector.extract_strided_slice %158 {offsets = [0, 80], sizes = [16, 16], strides = [1, 1]} : vector<16x96xf32> to vector<16x16xf32>
    %197 = vector.shape_cast %196 : vector<16x16xf32> to vector<2x8x16xf32>
    "tpu.trace_start"() <{level = 10 : i32, message = "bqd,bkd->bqk"}> : () -> ()
    %cst_134 = arith.constant dense<0.000000e+00> : vector<2x8x8xf32>
    %198 = tpu.matmul %193, %195, %cst_134 {dimension_numbers = #tpu.dot_dimension_numbers<[2], [2], [1], [1], [0, 0, 0, 1, 1, 1], [0], [0]>, precision = #tpu.contract_precision<fp32>} : vector<2x8x16xf32>, vector<2x8x16xf32>, vector<2x8x8xf32> -> vector<2x8x8xf32>
    "tpu.trace_stop"() : () -> ()
    %cst_135 = arith.constant 2.500000e-01 : f32
    %199 = vector.broadcast %cst_135 : f32 to vector<2x8x8xf32>
    %200 = arith.mulf %198, %199 : vector<2x8x8xf32>
    %201 = vector.broadcast %151 : vector<2x1x8xf32> to vector<2x8x8xf32>
    %202 = arith.addf %200, %201 : vector<2x8x8xf32>
    %cst_136 = arith.constant dense<0xFF800000> : vector<2x8xf32>
    %203 = vector.multi_reduction <maximumf>, %202, %cst_136 [2] : vector<2x8x8xf32> to vector<2x8xf32>
    %204 = vector.shape_cast %203 : vector<2x8xf32> to vector<2x8x1xf32>
    %205 = vector.broadcast %204 : vector<2x8x1xf32> to vector<2x8x8xf32>
    %206 = arith.subf %202, %205 : vector<2x8x8xf32>
    %207 = math.exp %206 : vector<2x8x8xf32>
    %cst_137 = arith.constant dense<0.000000e+00> : vector<2x8xf32>
    %208 = vector.multi_reduction <add>, %207, %cst_137 [2] : vector<2x8x8xf32> to vector<2x8xf32>
    %209 = vector.shape_cast %208 : vector<2x8xf32> to vector<2x8x1xf32>
    %210 = tpu.reciprocal %209 {approx = true} : vector<2x8x1xf32> -> vector<2x8x1xf32>
    %211 = vector.broadcast %210 : vector<2x8x1xf32> to vector<2x8x8xf32>
    %212 = arith.mulf %207, %211 : vector<2x8x8xf32>
    %c0_138 = arith.constant 0 : index
    %c0_139 = arith.constant 0 : index
    %c1_140 = arith.constant 1 : index
    %c0_141 = arith.constant 0 : index
    %c0_142 = arith.constant 0 : index
    %213 = vector.load %arg19[%c0_138, %c0_139, %c1_140, %c0_141, %c0_142] : memref<2x2x2x8x8xf32, #tpu.memory_space<vmem>>, vector<1x2x1x8x8xf32>
    %214 = vector.shape_cast %213 : vector<1x2x1x8x8xf32> to vector<2x8x8xf32>
    %215 = vector.shape_cast %212 : vector<2x8x8xf32> to vector<1x2x1x8x8xf32>
    tpu.vector_store %arg19[%c0_138, %c0_139, %c1_140, %c0_141, %c0_142], %215 {strides = array<i32>} : memref<2x2x2x8x8xf32, #tpu.memory_space<vmem>>, vector<1x2x1x8x8xf32>,
    "tpu.trace_start"() <{level = 10 : i32, message = "bqk,bkd->bqd"}> : () -> ()
    %cst_143 = arith.constant dense<0.000000e+00> : vector<2x8x16xf32>
    %216 = tpu.matmul %212, %197, %cst_143 {dimension_numbers = #tpu.dot_dimension_numbers<[2], [1], [1], [2], [0, 0, 0, 1, 1, 2], [0], [0]>, precision = #tpu.contract_precision<fp32>} : vector<2x8x8xf32>, vector<2x8x16xf32>, vector<2x8x16xf32> -> vector<2x8x16xf32>
    "tpu.trace_stop"() : () -> ()
    %217 = vector.shape_cast %216 : vector<2x8x16xf32> to vector<16x16xf32>
    %c0_144 = arith.constant 0 : index
    %c16_145 = arith.constant 16 : index
    %c0_146 = arith.constant 0 : index
    %218 = vector.load %arg7[%c0_144, %c16_145, %c0_146] : memref<2x32x32xf32, #tpu.memory_space<vmem>>, vector<1x16x32xf32>
    %219 = vector.shape_cast %218 : vector<1x16x32xf32> to vector<16x32xf32>
    %cst_147 = arith.constant dense<0.000000e+00> : vector<16x32xf32>
    %220 = tpu.matmul %217, %219, %cst_147 {dimension_numbers = #tpu.dot_dimension_numbers<[1], [0], [0], [1], [0, 0, 1, 1], [], []>, precision = #tpu.contract_precision<fp32>} : vector<16x16xf32>, vector<16x32xf32>, vector<16x32xf32> -> vector<16x32xf32>
    %221 = arith.addf %191, %220 : vector<16x32xf32>
    %222 = arith.addf %221, %141 : vector<16x32xf32>
    %c0_148 = arith.constant 0 : index
    %c0_149 = arith.constant 0 : index
    %c0_150 = arith.constant 0 : index
    %223 = vector.load %arg9[%c0_148, %c0_149, %c0_150] : memref<2x1x32xf32, #tpu.memory_space<vmem>>, vector<1x1x32xf32>
    %224 = vector.shape_cast %223 : vector<1x1x32xf32> to vector<1x32xf32>
    %c0_151 = arith.constant 0 : index
    %c0_152 = arith.constant 0 : index
    %c0_153 = arith.constant 0 : index
    %225 = vector.load %arg10[%c0_151, %c0_152, %c0_153] : memref<2x1x32xf32, #tpu.memory_space<vmem>>, vector<1x1x32xf32>
    %226 = vector.shape_cast %225 : vector<1x1x32xf32> to vector<1x32xf32>
    %cst_154 = arith.constant dense<0.000000e+00> : vector<16xf32>
    %227 = vector.multi_reduction <add>, %222, %cst_154 [1] : vector<16x32xf32> to vector<16xf32>
    %228 = vector.shape_cast %227 : vector<16xf32> to vector<16x1xf32>
    %cst_155 = arith.constant 3.200000e+01 : f32
    %229 = vector.broadcast %cst_155 : f32 to vector<16x1xf32>
    %230 = arith.divf %228, %229 : vector<16x1xf32>
    %231 = vector.broadcast %230 : vector<16x1xf32> to vector<16x32xf32>
    %232 = arith.subf %222, %231 : vector<16x32xf32>
    %233 = arith.mulf %232, %232 : vector<16x32xf32>
    %cst_156 = arith.constant dense<0.000000e+00> : vector<16xf32>
    %234 = vector.multi_reduction <add>, %233, %cst_156 [1] : vector<16x32xf32> to vector<16xf32>
    %235 = vector.shape_cast %234 : vector<16xf32> to vector<16x1xf32>
    %cst_157 = arith.constant 3.200000e+01 : f32
    %236 = vector.broadcast %cst_157 : f32 to vector<16x1xf32>
    %237 = arith.divf %235, %236 : vector<16x1xf32>
    %238 = vector.broadcast %230 : vector<16x1xf32> to vector<16x32xf32>
    %239 = arith.subf %222, %238 : vector<16x32xf32>
    %cst_158 = arith.constant 9.99999996E-13 : f32
    %240 = vector.broadcast %cst_158 : f32 to vector<16x1xf32>
    %241 = arith.addf %237, %240 : vector<16x1xf32>
    %242 = math.rsqrt %241 : vector<16x1xf32>
    %243 = vector.broadcast %242 : vector<16x1xf32> to vector<16x32xf32>
    %244 = arith.mulf %239, %243 : vector<16x32xf32>
    %245 = vector.broadcast %224 : vector<1x32xf32> to vector<16x32xf32>
    %246 = arith.mulf %244, %245 : vector<16x32xf32>
    %247 = vector.broadcast %226 : vector<1x32xf32> to vector<16x32xf32>
    %248 = arith.addf %246, %247 : vector<16x32xf32>
    %c0_159 = arith.constant 0 : index
    %c0_160 = arith.constant 0 : index
    %c0_161 = arith.constant 0 : index
    %249 = vector.load %arg11[%c0_159, %c0_160, %c0_161] : memref<2x32x64xf32, #tpu.memory_space<vmem>>, vector<1x32x64xf32>
    %250 = vector.shape_cast %249 : vector<1x32x64xf32> to vector<32x64xf32>
    %cst_162 = arith.constant dense<0.000000e+00> : vector<16x64xf32>
    %251 = tpu.matmul %248, %250, %cst_162 {dimension_numbers = #tpu.dot_dimension_numbers<[1], [0], [0], [1], [0, 0, 1, 1], [], []>, precision = #tpu.contract_precision<fp32>} : vector<16x32xf32>, vector<32x64xf32>, vector<16x64xf32> -> vector<16x64xf32>
    %c0_163 = arith.constant 0 : index
    %c0_164 = arith.constant 0 : index
    %c0_165 = arith.constant 0 : index
    %252 = vector.load %arg12[%c0_163, %c0_164, %c0_165] : memref<2x1x64xf32, #tpu.memory_space<vmem>>, vector<1x1x64xf32>
    %253 = vector.shape_cast %252 : vector<1x1x64xf32> to vector<1x64xf32>
    %254 = vector.broadcast %253 : vector<1x64xf32> to vector<16x64xf32>
    %255 = arith.addf %251, %254 : vector<16x64xf32>
    %cst_166 = arith.constant 5.000000e-01 : f32
    %256 = vector.broadcast %cst_166 : f32 to vector<16x64xf32>
    %257 = arith.mulf %256, %255 : vector<16x64xf32>
    %cst_167 = arith.constant 0.707106769 : f32
    %258 = vector.broadcast %cst_167 : f32 to vector<16x64xf32>
    %259 = arith.mulf %255, %258 : vector<16x64xf32>
    %260 = math.erf %259 : vector<16x64xf32>
    %cst_168 = arith.constant 1.000000e+00 : f32
    %261 = vector.broadcast %cst_168 : f32 to vector<16x64xf32>
    %262 = arith.addf %261, %260 : vector<16x64xf32>
    %263 = arith.mulf %257, %262 : vector<16x64xf32>
    %c0_169 = arith.constant 0 : index
    %c0_170 = arith.constant 0 : index
    %c0_171 = arith.constant 0 : index
    %264 = vector.load %arg13[%c0_169, %c0_170, %c0_171] : memref<2x64x32xf32, #tpu.memory_space<vmem>>, vector<1x64x32xf32>
    %265 = vector.shape_cast %264 : vector<1x64x32xf32> to vector<64x32xf32>
    %cst_172 = arith.constant dense<0.000000e+00> : vector<16x32xf32>
    %266 = tpu.matmul %263, %265, %cst_172 {dimension_numbers = #tpu.dot_dimension_numbers<[1], [0], [0], [1], [0, 0, 1, 1], [], []>, precision = #tpu.contract_precision<fp32>} : vector<16x64xf32>, vector<64x32xf32>, vector<16x32xf32> -> vector<16x32xf32>
    %c0_173 = arith.constant 0 : index
    %c0_174 = arith.constant 0 : index
    %c0_175 = arith.constant 0 : index
    %267 = vector.load %arg14[%c0_173, %c0_174, %c0_175] : memref<2x1x32xf32, #tpu.memory_space<vmem>>, vector<1x1x32xf32>
    %268 = vector.shape_cast %267 : vector<1x1x32xf32> to vector<1x32xf32>
    %269 = vector.broadcast %268 : vector<1x32xf32> to vector<16x32xf32>
    %270 = arith.addf %266, %269 : vector<16x32xf32>
    %271 = arith.addf %270, %248 : vector<16x32xf32>
    %c0_176 = arith.constant 0 : index
    %c0_177 = arith.constant 0 : index
    %c0_178 = arith.constant 0 : index
    %272 = vector.load %arg15[%c0_176, %c0_177, %c0_178] : memref<2x1x32xf32, #tpu.memory_space<vmem>>, vector<1x1x32xf32>
    %273 = vector.shape_cast %272 : vector<1x1x32xf32> to vector<1x32xf32>
    %c0_179 = arith.constant 0 : index
    %c0_180 = arith.constant 0 : index
    %c0_181 = arith.constant 0 : index
    %274 = vector.load %arg16[%c0_179, %c0_180, %c0_181] : memref<2x1x32xf32, #tpu.memory_space<vmem>>, vector<1x1x32xf32>
    %275 = vector.shape_cast %274 : vector<1x1x32xf32> to vector<1x32xf32>
    %cst_182 = arith.constant dense<0.000000e+00> : vector<16xf32>
    %276 = vector.multi_reduction <add>, %271, %cst_182 [1] : vector<16x32xf32> to vector<16xf32>
    %277 = vector.shape_cast %276 : vector<16xf32> to vector<16x1xf32>
    %cst_183 = arith.constant 3.200000e+01 : f32
    %278 = vector.broadcast %cst_183 : f32 to vector<16x1xf32>
    %279 = arith.divf %277, %278 : vector<16x1xf32>
    %280 = vector.broadcast %279 : vector<16x1xf32> to vector<16x32xf32>
    %281 = arith.subf %271, %280 : vector<16x32xf32>
    %282 = arith.mulf %281, %281 : vector<16x32xf32>
    %cst_184 = arith.constant dense<0.000000e+00> : vector<16xf32>
    %283 = vector.multi_reduction <add>, %282, %cst_184 [1] : vector<16x32xf32> to vector<16xf32>
    %284 = vector.shape_cast %283 : vector<16xf32> to vector<16x1xf32>
    %cst_185 = arith.constant 3.200000e+01 : f32
    %285 = vector.broadcast %cst_185 : f32 to vector<16x1xf32>
    %286 = arith.divf %284, %285 : vector<16x1xf32>
    %287 = vector.broadcast %279 : vector<16x1xf32> to vector<16x32xf32>
    %288 = arith.subf %271, %287 : vector<16x32xf32>
    %cst_186 = arith.constant 9.99999996E-13 : f32
    %289 = vector.broadcast %cst_186 : f32 to vector<16x1xf32>
    %290 = arith.addf %286, %289 : vector<16x1xf32>
    %291 = math.rsqrt %290 : vector<16x1xf32>
    %292 = vector.broadcast %291 : vector<16x1xf32> to vector<16x32xf32>
    %293 = arith.mulf %288, %292 : vector<16x32xf32>
    %294 = vector.broadcast %273 : vector<1x32xf32> to vector<16x32xf32>
    %295 = arith.mulf %293, %294 : vector<16x32xf32>
    %296 = vector.broadcast %275 : vector<1x32xf32> to vector<16x32xf32>
    %297 = arith.addf %295, %296 : vector<16x32xf32>
    %298 = vector.shape_cast %297 : vector<16x32xf32> to vector<2x8x32xf32>
    %c1_187 = arith.constant 1 : index
    %c0_188 = arith.constant 0 : index
    %c0_189 = arith.constant 0 : index
    %c0_190 = arith.constant 0 : index
    %299 = vector.load %arg18[%c1_187, %c0_188, %c0_189, %c0_190] : memref<3x2x8x32xf32, #tpu.memory_space<vmem>>, vector<1x2x8x32xf32>
    %300 = vector.shape_cast %299 : vector<1x2x8x32xf32> to vector<2x8x32xf32>
    %301 = vector.shape_cast %298 : vector<2x8x32xf32> to vector<1x2x8x32xf32>
    tpu.vector_store %arg18[%c1_187, %c0_188, %c0_189, %c0_190], %301 {strides = array<i32>} : memref<3x2x8x32xf32, #tpu.memory_space<vmem>>, vector<1x2x8x32xf32>,
    %c1_191 = arith.constant 1 : index
    %c0_192 = arith.constant 0 : index
    %c0_193 = arith.constant 0 : index
    %302 = vector.load %arg5[%c1_191, %c0_192, %c0_193] : memref<2x32x96xf32, #tpu.memory_space<vmem>>, vector<1x32x96xf32>
    %303 = vector.shape_cast %302 : vector<1x32x96xf32> to vector<32x96xf32>
    %cst_194 = arith.constant dense<0.000000e+00> : vector<16x96xf32>
    %304 = tpu.matmul %297, %303, %cst_194 {dimension_numbers = #tpu.dot_dimension_numbers<[1], [0], [0], [1], [0, 0, 1, 1], [], []>, precision = #tpu.contract_precision<fp32>} : vector<16x32xf32>, vector<32x96xf32>, vector<16x96xf32> -> vector<16x96xf32>
    %c1_195 = arith.constant 1 : index
    %c0_196 = arith.constant 0 : index
    %c0_197 = arith.constant 0 : index
    %305 = vector.load %arg6[%c1_195, %c0_196, %c0_197] : memref<2x1x96xf32, #tpu.memory_space<vmem>>, vector<1x1x96xf32>
    %306 = vector.shape_cast %305 : vector<1x1x96xf32> to vector<1x96xf32>
    %307 = vector.broadcast %306 : vector<1x96xf32> to vector<16x96xf32>
    %308 = arith.addf %304, %307 : vector<16x96xf32>
    %c1_198 = arith.constant 1 : index
    %c0_199 = arith.constant 0 : index
    %c0_200 = arith.constant 0 : index
    %309 = vector.load %arg8[%c1_198, %c0_199, %c0_200] : memref<2x1x32xf32, #tpu.memory_space<vmem>>, vector<1x1x32xf32>
    %310 = vector.shape_cast %309 : vector<1x1x32xf32> to vector<1x32xf32>
    %311 = vector.extract_strided_slice %308 {offsets = [0, 0], sizes = [16, 16], strides = [1, 1]} : vector<16x96xf32> to vector<16x16xf32>
    %312 = vector.shape_cast %311 : vector<16x16xf32> to vector<2x8x16xf32>
    %313 = vector.extract_strided_slice %308 {offsets = [0, 32], sizes = [16, 16], strides = [1, 1]} : vector<16x96xf32> to vector<16x16xf32>
    %314 = vector.shape_cast %313 : vector<16x16xf32> to vector<2x8x16xf32>
    %315 = vector.extract_strided_slice %308 {offsets = [0, 64], sizes = [16, 16], strides = [1, 1]} : vector<16x96xf32> to vector<16x16xf32>
    %316 = vector.shape_cast %315 : vector<16x16xf32> to vector<2x8x16xf32>
    "tpu.trace_start"() <{level = 10 : i32, message = "bqd,bkd->bqk"}> : () -> ()
    %cst_201 = arith.constant dense<0.000000e+00> : vector<2x8x8xf32>
    %317 = tpu.matmul %312, %314, %cst_201 {dimension_numbers = #tpu.dot_dimension_numbers<[2], [2], [1], [1], [0, 0, 0, 1, 1, 1], [0], [0]>, precision = #tpu.contract_precision<fp32>} : vector<2x8x16xf32>, vector<2x8x16xf32>, vector<2x8x8xf32> -> vector<2x8x8xf32>
    "tpu.trace_stop"() : () -> ()
    %cst_202 = arith.constant 2.500000e-01 : f32
    %318 = vector.broadcast %cst_202 : f32 to vector<2x8x8xf32>
    %319 = arith.mulf %317, %318 : vector<2x8x8xf32>
    %320 = vector.broadcast %151 : vector<2x1x8xf32> to vector<2x8x8xf32>
    %321 = arith.addf %319, %320 : vector<2x8x8xf32>
    %cst_203 = arith.constant dense<0xFF800000> : vector<2x8xf32>
    %322 = vector.multi_reduction <maximumf>, %321, %cst_203 [2] : vector<2x8x8xf32> to vector<2x8xf32>
    %323 = vector.shape_cast %322 : vector<2x8xf32> to vector<2x8x1xf32>
    %324 = vector.broadcast %323 : vector<2x8x1xf32> to vector<2x8x8xf32>
    %325 = arith.subf %321, %324 : vector<2x8x8xf32>
    %326 = math.exp %325 : vector<2x8x8xf32>
    %cst_204 = arith.constant dense<0.000000e+00> : vector<2x8xf32>
    %327 = vector.multi_reduction <add>, %326, %cst_204 [2] : vector<2x8x8xf32> to vector<2x8xf32>
    %328 = vector.shape_cast %327 : vector<2x8xf32> to vector<2x8x1xf32>
    %329 = tpu.reciprocal %328 {approx = true} : vector<2x8x1xf32> -> vector<2x8x1xf32>
    %330 = vector.broadcast %329 : vector<2x8x1xf32> to vector<2x8x8xf32>
    %331 = arith.mulf %326, %330 : vector<2x8x8xf32>
    %c1_205 = arith.constant 1 : index
    %c0_206 = arith.constant 0 : index
    %c0_207 = arith.constant 0 : index
    %c0_208 = arith.constant 0 : index
    %c0_209 = arith.constant 0 : index
    %332 = vector.load %arg19[%c1_205, %c0_206, %c0_207, %c0_208, %c0_209] : memref<2x2x2x8x8xf32, #tpu.memory_space<vmem>>, vector<1x2x1x8x8xf32>
    %333 = vector.shape_cast %332 : vector<1x2x1x8x8xf32> to vector<2x8x8xf32>
    %334 = vector.shape_cast %331 : vector<2x8x8xf32> to vector<1x2x1x8x8xf32>
    tpu.vector_store %arg19[%c1_205, %c0_206, %c0_207, %c0_208, %c0_209], %334 {strides = array<i32>} : memref<2x2x2x8x8xf32, #tpu.memory_space<vmem>>, vector<1x2x1x8x8xf32>,
    "tpu.trace_start"() <{level = 10 : i32, message = "bqk,bkd->bqd"}> : () -> ()
    %cst_210 = arith.constant dense<0.000000e+00> : vector<2x8x16xf32>
    %335 = tpu.matmul %331, %316, %cst_210 {dimension_numbers = #tpu.dot_dimension_numbers<[2], [1], [1], [2], [0, 0, 0, 1, 1, 2], [0], [0]>, precision = #tpu.contract_precision<fp32>} : vector<2x8x8xf32>, vector<2x8x16xf32>, vector<2x8x16xf32> -> vector<2x8x16xf32>
    "tpu.trace_stop"() : () -> ()
    %336 = vector.shape_cast %335 : vector<2x8x16xf32> to vector<16x16xf32>
    %c1_211 = arith.constant 1 : index
    %c0_212 = arith.constant 0 : index
    %c0_213 = arith.constant 0 : index
    %337 = vector.load %arg7[%c1_211, %c0_212, %c0_213] : memref<2x32x32xf32, #tpu.memory_space<vmem>>, vector<1x16x32xf32>
    %338 = vector.shape_cast %337 : vector<1x16x32xf32> to vector<16x32xf32>
    %cst_214 = arith.constant dense<0.000000e+00> : vector<16x32xf32>
    %339 = tpu.matmul %336, %338, %cst_214 {dimension_numbers = #tpu.dot_dimension_numbers<[1], [0], [0], [1], [0, 0, 1, 1], [], []>, precision = #tpu.contract_precision<fp32>} : vector<16x16xf32>, vector<16x32xf32>, vector<16x32xf32> -> vector<16x32xf32>
    %340 = vector.broadcast %310 : vector<1x32xf32> to vector<16x32xf32>
    %341 = arith.addf %340, %339 : vector<16x32xf32>
    %342 = vector.extract_strided_slice %308 {offsets = [0, 16], sizes = [16, 16], strides = [1, 1]} : vector<16x96xf32> to vector<16x16xf32>
    %343 = vector.shape_cast %342 : vector<16x16xf32> to vector<2x8x16xf32>
    %344 = vector.extract_strided_slice %308 {offsets = [0, 48], sizes = [16, 16], strides = [1, 1]} : vector<16x96xf32> to vector<16x16xf32>
    %345 = vector.shape_cast %344 : vector<16x16xf32> to vector<2x8x16xf32>
    %346 = vector.extract_strided_slice %308 {offsets = [0, 80], sizes = [16, 16], strides = [1, 1]} : vector<16x96xf32> to vector<16x16xf32>
    %347 = vector.shape_cast %346 : vector<16x16xf32> to vector<2x8x16xf32>
    "tpu.trace_start"() <{level = 10 : i32, message = "bqd,bkd->bqk"}> : () -> ()
    %cst_215 = arith.constant dense<0.000000e+00> : vector<2x8x8xf32>
    %348 = tpu.matmul %343, %345, %cst_215 {dimension_numbers = #tpu.dot_dimension_numbers<[2], [2], [1], [1], [0, 0, 0, 1, 1, 1], [0], [0]>, precision = #tpu.contract_precision<fp32>} : vector<2x8x16xf32>, vector<2x8x16xf32>, vector<2x8x8xf32> -> vector<2x8x8xf32>
    "tpu.trace_stop"() : () -> ()
    %cst_216 = arith.constant 2.500000e-01 : f32
    %349 = vector.broadcast %cst_216 : f32 to vector<2x8x8xf32>
    %350 = arith.mulf %348, %349 : vector<2x8x8xf32>
    %351 = vector.broadcast %151 : vector<2x1x8xf32> to vector<2x8x8xf32>
    %352 = arith.addf %350, %351 : vector<2x8x8xf32>
    %cst_217 = arith.constant dense<0xFF800000> : vector<2x8xf32>
    %353 = vector.multi_reduction <maximumf>, %352, %cst_217 [2] : vector<2x8x8xf32> to vector<2x8xf32>
    %354 = vector.shape_cast %353 : vector<2x8xf32> to vector<2x8x1xf32>
    %355 = vector.broadcast %354 : vector<2x8x1xf32> to vector<2x8x8xf32>
    %356 = arith.subf %352, %355 : vector<2x8x8xf32>
    %357 = math.exp %356 : vector<2x8x8xf32>
    %cst_218 = arith.constant dense<0.000000e+00> : vector<2x8xf32>
    %358 = vector.multi_reduction <add>, %357, %cst_218 [2] : vector<2x8x8xf32> to vector<2x8xf32>
    %359 = vector.shape_cast %358 : vector<2x8xf32> to vector<2x8x1xf32>
    %360 = tpu.reciprocal %359 {approx = true} : vector<2x8x1xf32> -> vector<2x8x1xf32>
    %361 = vector.broadcast %360 : vector<2x8x1xf32> to vector<2x8x8xf32>
    %362 = arith.mulf %357, %361 : vector<2x8x8xf32>
    %c1_219 = arith.constant 1 : index
    %c0_220 = arith.constant 0 : index
    %c1_221 = arith.constant 1 : index
    %c0_222 = arith.constant 0 : index
    %c0_223 = arith.constant 0 : index
    %363 = vector.load %arg19[%c1_219, %c0_220, %c1_221, %c0_222, %c0_223] : memref<2x2x2x8x8xf32, #tpu.memory_space<vmem>>, vector<1x2x1x8x8xf32>
    %364 = vector.shape_cast %363 : vector<1x2x1x8x8xf32> to vector<2x8x8xf32>
    %365 = vector.shape_cast %362 : vector<2x8x8xf32> to vector<1x2x1x8x8xf32>
    tpu.vector_store %arg19[%c1_219, %c0_220, %c1_221, %c0_222, %c0_223], %365 {strides = array<i32>} : memref<2x2x2x8x8xf32, #tpu.memory_space<vmem>>, vector<1x2x1x8x8xf32>,
    "tpu.trace_start"() <{level = 10 : i32, message = "bqk,bkd->bqd"}> : () -> ()
    %cst_224 = arith.constant dense<0.000000e+00> : vector<2x8x16xf32>
    %366 = tpu.matmul %362, %347, %cst_224 {dimension_numbers = #tpu.dot_dimension_numbers<[2], [1], [1], [2], [0, 0, 0, 1, 1, 2], [0], [0]>, precision = #tpu.contract_precision<fp32>} : vector<2x8x8xf32>, vector<2x8x16xf32>, vector<2x8x16xf32> -> vector<2x8x16xf32>
    "tpu.trace_stop"() : () -> ()
    %367 = vector.shape_cast %366 : vector<2x8x16xf32> to vector<16x16xf32>
    %c1_225 = arith.constant 1 : index
    %c16_226 = arith.constant 16 : index
    %c0_227 = arith.constant 0 : index
    %368 = vector.load %arg7[%c1_225, %c16_226, %c0_227] : memref<2x32x32xf32, #tpu.memory_space<vmem>>, vector<1x16x32xf32>
    %369 = vector.shape_cast %368 : vector<1x16x32xf32> to vector<16x32xf32>
    %cst_228 = arith.constant dense<0.000000e+00> : vector<16x32xf32>
    %370 = tpu.matmul %367, %369, %cst_228 {dimension_numbers = #tpu.dot_dimension_numbers<[1], [0], [0], [1], [0, 0, 1, 1], [], []>, precision = #tpu.contract_precision<fp32>} : vector<16x16xf32>, vector<16x32xf32>, vector<16x32xf32> -> vector<16x32xf32>
    %371 = arith.addf %341, %370 : vector<16x32xf32>
    %372 = arith.addf %371, %297 : vector<16x32xf32>
    %c1_229 = arith.constant 1 : index
    %c0_230 = arith.constant 0 : index
    %c0_231 = arith.constant 0 : index
    %373 = vector.load %arg9[%c1_229, %c0_230, %c0_231] : memref<2x1x32xf32, #tpu.memory_space<vmem>>, vector<1x1x32xf32>
    %374 = vector.shape_cast %373 : vector<1x1x32xf32> to vector<1x32xf32>
    %c1_232 = arith.constant 1 : index
    %c0_233 = arith.constant 0 : index
    %c0_234 = arith.constant 0 : index
    %375 = vector.load %arg10[%c1_232, %c0_233, %c0_234] : memref<2x1x32xf32, #tpu.memory_space<vmem>>, vector<1x1x32xf32>
    %376 = vector.shape_cast %375 : vector<1x1x32xf32> to vector<1x32xf32>
    %cst_235 = arith.constant dense<0.000000e+00> : vector<16xf32>
    %377 = vector.multi_reduction <add>, %372, %cst_235 [1] : vector<16x32xf32> to vector<16xf32>
    %378 = vector.shape_cast %377 : vector<16xf32> to vector<16x1xf32>
    %cst_236 = arith.constant 3.200000e+01 : f32
    %379 = vector.broadcast %cst_236 : f32 to vector<16x1xf32>
    %380 = arith.divf %378, %379 : vector<16x1xf32>
    %381 = vector.broadcast %380 : vector<16x1xf32> to vector<16x32xf32>
    %382 = arith.subf %372, %381 : vector<16x32xf32>
    %383 = arith.mulf %382, %382 : vector<16x32xf32>
    %cst_237 = arith.constant dense<0.000000e+00> : vector<16xf32>
    %384 = vector.multi_reduction <add>, %383, %cst_237 [1] : vector<16x32xf32> to vector<16xf32>
    %385 = vector.shape_cast %384 : vector<16xf32> to vector<16x1xf32>
    %cst_238 = arith.constant 3.200000e+01 : f32
    %386 = vector.broadcast %cst_238 : f32 to vector<16x1xf32>
    %387 = arith.divf %385, %386 : vector<16x1xf32>
    %388 = vector.broadcast %380 : vector<16x1xf32> to vector<16x32xf32>
    %389 = arith.subf %372, %388 : vector<16x32xf32>
    %cst_239 = arith.constant 9.99999996E-13 : f32
    %390 = vector.broadcast %cst_239 : f32 to vector<16x1xf32>
    %391 = arith.addf %387, %390 : vector<16x1xf32>
    %392 = math.rsqrt %391 : vector<16x1xf32>
    %393 = vector.broadcast %392 : vector<16x1xf32> to vector<16x32xf32>
    %394 = arith.mulf %389, %393 : vector<16x32xf32>
    %395 = vector.broadcast %374 : vector<1x32xf32> to vector<16x32xf32>
    %396 = arith.mulf %394, %395 : vector<16x32xf32>
    %397 = vector.broadcast %376 : vector<1x32xf32> to vector<16x32xf32>
    %398 = arith.addf %396, %397 : vector<16x32xf32>
    %c1_240 = arith.constant 1 : index
    %c0_241 = arith.constant 0 : index
    %c0_242 = arith.constant 0 : index
    %399 = vector.load %arg11[%c1_240, %c0_241, %c0_242] : memref<2x32x64xf32, #tpu.memory_space<vmem>>, vector<1x32x64xf32>
    %400 = vector.shape_cast %399 : vector<1x32x64xf32> to vector<32x64xf32>
    %cst_243 = arith.constant dense<0.000000e+00> : vector<16x64xf32>
    %401 = tpu.matmul %398, %400, %cst_243 {dimension_numbers = #tpu.dot_dimension_numbers<[1], [0], [0], [1], [0, 0, 1, 1], [], []>, precision = #tpu.contract_precision<fp32>} : vector<16x32xf32>, vector<32x64xf32>, vector<16x64xf32> -> vector<16x64xf32>
    %c1_244 = arith.constant 1 : index
    %c0_245 = arith.constant 0 : index
    %c0_246 = arith.constant 0 : index
    %402 = vector.load %arg12[%c1_244, %c0_245, %c0_246] : memref<2x1x64xf32, #tpu.memory_space<vmem>>, vector<1x1x64xf32>
    %403 = vector.shape_cast %402 : vector<1x1x64xf32> to vector<1x64xf32>
    %404 = vector.broadcast %403 : vector<1x64xf32> to vector<16x64xf32>
    %405 = arith.addf %401, %404 : vector<16x64xf32>
    %cst_247 = arith.constant 5.000000e-01 : f32
    %406 = vector.broadcast %cst_247 : f32 to vector<16x64xf32>
    %407 = arith.mulf %406, %405 : vector<16x64xf32>
    %cst_248 = arith.constant 0.707106769 : f32
    %408 = vector.broadcast %cst_248 : f32 to vector<16x64xf32>
    %409 = arith.mulf %405, %408 : vector<16x64xf32>
    %410 = math.erf %409 : vector<16x64xf32>
    %cst_249 = arith.constant 1.000000e+00 : f32
    %411 = vector.broadcast %cst_249 : f32 to vector<16x64xf32>
    %412 = arith.addf %411, %410 : vector<16x64xf32>
    %413 = arith.mulf %407, %412 : vector<16x64xf32>
    %c1_250 = arith.constant 1 : index
    %c0_251 = arith.constant 0 : index
    %c0_252 = arith.constant 0 : index
    %414 = vector.load %arg13[%c1_250, %c0_251, %c0_252] : memref<2x64x32xf32, #tpu.memory_space<vmem>>, vector<1x64x32xf32>
    %415 = vector.shape_cast %414 : vector<1x64x32xf32> to vector<64x32xf32>
    %cst_253 = arith.constant dense<0.000000e+00> : vector<16x32xf32>
    %416 = tpu.matmul %413, %415, %cst_253 {dimension_numbers = #tpu.dot_dimension_numbers<[1], [0], [0], [1], [0, 0, 1, 1], [], []>, precision = #tpu.contract_precision<fp32>} : vector<16x64xf32>, vector<64x32xf32>, vector<16x32xf32> -> vector<16x32xf32>
    %c1_254 = arith.constant 1 : index
    %c0_255 = arith.constant 0 : index
    %c0_256 = arith.constant 0 : index
    %417 = vector.load %arg14[%c1_254, %c0_255, %c0_256] : memref<2x1x32xf32, #tpu.memory_space<vmem>>, vector<1x1x32xf32>
    %418 = vector.shape_cast %417 : vector<1x1x32xf32> to vector<1x32xf32>
    %419 = vector.broadcast %418 : vector<1x32xf32> to vector<16x32xf32>
    %420 = arith.addf %416, %419 : vector<16x32xf32>
    %421 = arith.addf %420, %398 : vector<16x32xf32>
    %c1_257 = arith.constant 1 : index
    %c0_258 = arith.constant 0 : index
    %c0_259 = arith.constant 0 : index
    %422 = vector.load %arg15[%c1_257, %c0_258, %c0_259] : memref<2x1x32xf32, #tpu.memory_space<vmem>>, vector<1x1x32xf32>
    %423 = vector.shape_cast %422 : vector<1x1x32xf32> to vector<1x32xf32>
    %c1_260 = arith.constant 1 : index
    %c0_261 = arith.constant 0 : index
    %c0_262 = arith.constant 0 : index
    %424 = vector.load %arg16[%c1_260, %c0_261, %c0_262] : memref<2x1x32xf32, #tpu.memory_space<vmem>>, vector<1x1x32xf32>
    %425 = vector.shape_cast %424 : vector<1x1x32xf32> to vector<1x32xf32>
    %cst_263 = arith.constant dense<0.000000e+00> : vector<16xf32>
    %426 = vector.multi_reduction <add>, %421, %cst_263 [1] : vector<16x32xf32> to vector<16xf32>
    %427 = vector.shape_cast %426 : vector<16xf32> to vector<16x1xf32>
    %cst_264 = arith.constant 3.200000e+01 : f32
    %428 = vector.broadcast %cst_264 : f32 to vector<16x1xf32>
    %429 = arith.divf %427, %428 : vector<16x1xf32>
    %430 = vector.broadcast %429 : vector<16x1xf32> to vector<16x32xf32>
    %431 = arith.subf %421, %430 : vector<16x32xf32>
    %432 = arith.mulf %431, %431 : vector<16x32xf32>
    %cst_265 = arith.constant dense<0.000000e+00> : vector<16xf32>
    %433 = vector.multi_reduction <add>, %432, %cst_265 [1] : vector<16x32xf32> to vector<16xf32>
    %434 = vector.shape_cast %433 : vector<16xf32> to vector<16x1xf32>
    %cst_266 = arith.constant 3.200000e+01 : f32
    %435 = vector.broadcast %cst_266 : f32 to vector<16x1xf32>
    %436 = arith.divf %434, %435 : vector<16x1xf32>
    %437 = vector.broadcast %429 : vector<16x1xf32> to vector<16x32xf32>
    %438 = arith.subf %421, %437 : vector<16x32xf32>
    %cst_267 = arith.constant 9.99999996E-13 : f32
    %439 = vector.broadcast %cst_267 : f32 to vector<16x1xf32>
    %440 = arith.addf %436, %439 : vector<16x1xf32>
    %441 = math.rsqrt %440 : vector<16x1xf32>
    %442 = vector.broadcast %441 : vector<16x1xf32> to vector<16x32xf32>
    %443 = arith.mulf %438, %442 : vector<16x32xf32>
    %444 = vector.broadcast %423 : vector<1x32xf32> to vector<16x32xf32>
    %445 = arith.mulf %443, %444 : vector<16x32xf32>
    %446 = vector.broadcast %425 : vector<1x32xf32> to vector<16x32xf32>
    %447 = arith.addf %445, %446 : vector<16x32xf32>
    %448 = vector.shape_cast %447 : vector<16x32xf32> to vector<2x8x32xf32>
    %c2_268 = arith.constant 2 : index
    %c0_269 = arith.constant 0 : index
    %c0_270 = arith.constant 0 : index
    %c0_271 = arith.constant 0 : index
    %449 = vector.load %arg18[%c2_268, %c0_269, %c0_270, %c0_271] : memref<3x2x8x32xf32, #tpu.memory_space<vmem>>, vector<1x2x8x32xf32>
    %450 = vector.shape_cast %449 : vector<1x2x8x32xf32> to vector<2x8x32xf32>
    %451 = vector.shape_cast %448 : vector<2x8x32xf32> to vector<1x2x8x32xf32>
    tpu.vector_store %arg18[%c2_268, %c0_269, %c0_270, %c0_271], %451 {strides = array<i32>} : memref<3x2x8x32xf32, #tpu.memory_space<vmem>>, vector<1x2x8x32xf32>,
    %452 = vector.shape_cast %447 : vector<16x32xf32> to vector<2x8x32xf32>
    %c0_272 = arith.constant 0 : index
    %c0_273 = arith.constant 0 : index
    %c0_274 = arith.constant 0 : index
    %453 = vector.load %arg17[%c0_272, %c0_273, %c0_274] : memref<2x8x32xf32, #tpu.memory_space<vmem>>, vector<2x8x32xf32>
    tpu.vector_store %arg17[%c0_272, %c0_273, %c0_274], %452 {strides = array<i32>} : memref<2x8x32xf32, #tpu.memory_space<vmem>>, vector<2x8x32xf32>,
    return
  }
}

</mosaic_0001>

<bundles_post_ra>
// kernel: forward.1
= control target key start
LH: loop header
LB: loop body
LE: loop exit
PB: predicated region body
PF: predicated region fallthrough
CT: control target
= control target key end

     0   :  { %s17145_s0 = inlined_call_operand.vmem [shape: f32[18], index: 0, kind: input, shape index: {}]   ;;  %s17146_s1 = inlined_call_operand.vmem [shape: f32[9,2,2,8,32], index: 1, kind: input, shape index: {}]   ;;  %s17147_s2 = inlined_call_operand.vmem [shape: f32[2,8], index: 2, kind: input, shape index: {}]   ;;  %s17148_s3 = inlined_call_operand.vmem [shape: f32[1,32], index: 3, kind: input, shape index: {}]   ;;  %s17149_s4 = inlined_call_operand.vmem [shape: f32[1,32], index: 4, kind: input, shape index: {}]   ;;  %s17150_s5 = inlined_call_operand.vmem [shape: f32[2,32,96], index: 5, kind: input, shape index: {}]   ;;  %s17151_s6 = inlined_call_operand.vmem [shape: f32[2,1,96], index: 6, kind: input, shape index: {}]   ;;  %s17152_s7 = inlined_call_operand.vmem [shape: f32[2,32,32], index: 7, kind: input, shape index: {}]   ;;  %s17153_s8 = inlined_call_operand.vmem [shape: f32[2,1,32], index: 8, kind: input, shape index: {}]   ;;  %s17154_s9 = inlined_call_operand.vmem [shape: f32[2,1,32], index: 9, kind: input, shape index: {}]   ;;  %s17155_s10 = inlined_call_operand.vmem [shape: f32[2,1,32], index: 10, kind: input, shape index: {}]   ;;  %s17156_s11 = inlined_call_operand.vmem [shape: f32[2,32,64], index: 11, kind: input, shape index: {}]   ;;  %s17157_s12 = inlined_call_operand.vmem [shape: f32[2,1,64], index: 12, kind: input, shape index: {}]   ;;  %s17158_s13 = inlined_call_operand.vmem [shape: f32[2,64,32], index: 13, kind: input, shape index: {}]   ;;  %s17159_s14 = inlined_call_operand.vmem [shape: f32[2,1,32], index: 14, kind: input, shape index: {}]   ;;  %s17160_s15 = inlined_call_operand.vmem [shape: f32[2,1,32], index: 15, kind: input, shape index: {}]   ;;  %s17161_s16 = inlined_call_operand.vmem [shape: f32[2,1,32], index: 16, kind: input, shape index: {}]   ;;  %s17162_s17 = inlined_call_operand.vmem [shape: f32[2,8,32], index: 17, kind: output, shape index: {0}]   ;;  %s17163_s18 = inlined_call_operand.vmem [shape: f32[3,2,8,32], index: 18, kind: output, shape index: {1}]   ;;  %s17164_s19 = inlined_call_operand.vmem [shape: f32[2,2,2,8,8], index: 19, kind: output, shape index: {2}]  }
   0x1   :  { %17167 = sst [smem:[#allocation5_spill]] %s17145_s0 }
   0x2   :  { %17168 = sst [smem:[#allocation6_spill]] %s17146_s1 }
   0x3   :  { %17169 = sst [smem:[#allocation7_spill]] %s17147_s2 }
   0x4   :  { %17170 = sst [smem:[#allocation8_spill]] %s17148_s3 }
   0x5   :  { %17171 = sst [smem:[#allocation9_spill]] %s17162_s17 }
   0x6   :  { %25 = vsyncpa [#allocation3], 0  ;;  %s17172_s20 = sld [smem:[#allocation5_spill]] }
   0xc   :  { %s32_s21 = sshll.u32 %s17172_s20, 4  ;;  %s33_s21 = int_to_ptr.vmem [resolvable:$true] %s32_s21 }
   0xd   :  { %s15242_s1 = scalar_lea.vmem %s33_s21, 16  ;;  %p15247_p1 = scmp.lt.s32.totalorder %s33_s21, %s33_s21 }
   0xe   :  { %p15243_p0 = scmp.ne.s32.totalorder %s33_s21, %s15242_s1  ;;  %p15248_p2 = scmp.lt.s32.totalorder %s15242_s1, %s15242_s1 }
  0x10   :  { %p15249_p3 = por %p15248_p2, %p15247_p1 }
  0x12   :  { %p15250_p4 = pnand %p15249_p3, %p15243_p0 }
  0x14   :  { %15253 = shalt.err (!%p15250_p4)
}
  0x15   :  { %s15256_s22 = smov [#allocation2]  }
  0x16   :  { %35 = dma.vmem_to_smem %s33_s21, 16, %s15256_s22, [#allocation3]  }
  0x17   :  { %15254 = dma.done.wait [#allocation3], 16  }
  0x18   :  { %15255 = vsyncadd [#allocation3], 4294967280 }
  0x19   :  { %71 = sfence }
  0x1a   :  { %s74_s2 = sld [smem:[#allocation2]]  ;;  %vm245_vm0 = vcmask 261120   ;;  %vm15258_vm1 = vmmov 0   ;;  %vm866_vm2 = vcmask 130048   ;;  %vm1784_vm3 = vcmask 64512   ;;  %s15261_s30 = smov 64  }
  0x1b   :  { %s13372_s23 = sld [smem:[#allocation2 + $0x9]]  ;;  %vm6200_vm4 = vcmask 523264  }
  0x1c   :  { %s13375_s24 = sld [smem:[#allocation2 + $0x1]] }
  0x1d   :  { %s15368_s25 = sld [smem:[#allocation2 + $0xa]] }
  0x1e   :  { %s17173_s27 = sld [smem:[#allocation6_spill]] }
  0x1f   :  { %s15373_s28 = sld [smem:[#allocation2 + $0x2]] }
  0x20   :  { %s15381_s21 = sld [smem:[#allocation2 + $0xb]]  ;;  %v75_v3 = vstv %s74_s2 }
  0x21   :  { %s15383_s1 = sld [smem:[#allocation2 + $0x3]]  ;;  %v84_v8 = vstv %s13372_s23 }
  0x22   :  { %s15397_s2 = sld [smem:[#allocation2 + $0xc]]  ;;  %v93_v12 = vstv %s13375_s24 }
  0x23   :  { %v102_v16 = vstv %s15368_s25  ;;  %s15406_s26 = sld [smem:[#allocation2 + $0x4]] }
  0x24   :  { %v72_v0 = vld [vmem:[%s17173_s27] sm:$0xff]  ;;  %v13370_v1 = vld [vmem:[%s17173_s27 + $0x8] sm:$0xff]  ;;  %v73_v4 = vld [vmem:[%s17173_s27 + $0x10] sm:$0xff]  ;;  %s15416_s25 = sld [smem:[#allocation2 + $0xd]] }
  0x25   :  { %v13373_v2 = vld [vmem:[%s17173_s27 + $0x20] sm:$0xff]  ;;  %v13371_v5 = vld [vmem:[%s17173_s27 + $0x18] sm:$0xff]  ;;  %v13374_v6 = vld [vmem:[%s17173_s27 + $0x30] sm:$0xff]  ;;  %v76_v7 = vmul.f32 %v75_v3, %v72_v0  ;;  %v77_v10 = vmul.f32 %v75_v3, %v73_v4  ;;  %v85_v11 = vmul.f32 %v13370_v1, %v84_v8  ;;  %v111_v22 = vstv %s15373_s28  ;;  %s15425_s3 = sld [smem:[#allocation2 + $0x5]] }
  0x26   :  { %v13376_v9 = vld [vmem:[%s17173_s27 + $0x28] sm:$0xff]  ;;  %v86_v13 = vmul.f32 %v13371_v5, %v84_v8  ;;  %v13377_v14 = vld [vmem:[%s17173_s27 + $0x38] sm:$0xff]  ;;  %v94_v15 = vmul.f32 %v13373_v2, %v93_v12  ;;  %v13379_v17 = vld [vmem:[%s17173_s27 + $0x40] sm:$0xff]  ;;  %v95_v18 = vmul.f32 %v13374_v6, %v93_v12  ;;  %v120_v25 = vstv %s15381_s21  ;;  %s15434_s24 = sld [smem:[#allocation2 + $0xe]] }
  0x27   :  { %v13380_v19 = vld [vmem:[%s17173_s27 + $0x50] sm:$0xff]  ;;  %v87_v20 = vadd.f32 %v85_v11, %v76_v7  ;;  %v103_v21 = vmul.f32 %v13376_v9, %v102_v16  ;;  %v13382_v24 = vld [vmem:[%s17173_s27 + $0x48] sm:$0xff]  ;;  %v104_v26 = vmul.f32 %v13377_v14, %v102_v16  ;;  %v13383_v27 = vld [vmem:[%s17173_s27 + $0x58] sm:$0xff]  ;;  %v112_v29 = vmul.f32 %v13379_v17, %v111_v22  ;;  %s15443_s22 = sld [smem:[#allocation2 + $0x6]] }
  0x28   :  { %v88_v23 = vadd.f32 %v86_v13, %v77_v10  ;;  %v113_v31 = vmul.f32 %v13380_v19, %v111_v22  ;;  %v13385_v32 = vld [vmem:[%s17173_s27 + $0x60] sm:$0xff]  ;;  %v129_v33 = vstv %s15383_s1  ;;  %v13386_v34 = vld [vmem:[%s17173_s27 + $0x70] sm:$0xff]  ;;  %v121_v36 = vmul.f32 %v13382_v24, %v120_v25  ;;  %v13388_v39 = vld [vmem:[%s17173_s27 + $0x68] sm:$0xff]  ;;  %s15452_s29 = sld [smem:[#allocation2 + $0xf]] }
  0x29   :  { %v96_v28 = vadd.f32 %v94_v15, %v87_v20  ;;  %v122_v38 = vmul.f32 %v13383_v27, %v120_v25  ;;  %v138_v40 = vstv %s15397_s2  ;;  %v13389_v41 = vld [vmem:[%s17173_s27 + $0x78] sm:$0xff]  ;;  %v130_v43 = vmul.f32 %v13385_v32, %v129_v33  ;;  %v13391_v46 = vld [vmem:[%s17173_s27 + $0x80] sm:$0xff]  ;;  %v13392_v48 = vld [vmem:[%s17173_s27 + $0x90] sm:$0xff]  ;;  %s15461_s20 = sld [smem:[#allocation2 + $0x7]] }
  0x2a   :  { %v97_v30 = vadd.f32 %v95_v18, %v88_v23  ;;  %v131_v45 = vmul.f32 %v13386_v34, %v129_v33  ;;  %v147_v47 = vstv %s15406_s26  ;;  %v139_v50 = vmul.f32 %v13388_v39, %v138_v40  ;;  %v13394_v53 = vld [vmem:[%s17173_s27 + $0x88] sm:$0xff]  ;;  %v13395_v55 = vld [vmem:[%s17173_s27 + $0x98] sm:$0xff]  ;;  %v13397_v60 = vld [vmem:[%s17173_s27 + $0xa0] sm:$0xff]  ;;  %s15470_s21 = sld [smem:[#allocation2 + $0x10]] }
  0x2b   :  { %v105_v35 = vadd.f32 %v103_v21, %v96_v28  ;;  %v140_v52 = vmul.f32 %v13389_v41, %v138_v40  ;;  %v156_v54 = vstv %s15416_s25  ;;  %v148_v57 = vmul.f32 %v13391_v46, %v147_v47  ;;  %v13398_v62 = vld [vmem:[%s17173_s27 + $0xb0] sm:$0xff]  ;;  %v13400_v3 = vld [vmem:[%s17173_s27 + $0xa8] sm:$0xff]  ;;  %v13401_v5 = vld [vmem:[%s17173_s27 + $0xb8] sm:$0xff]  ;;  %s15479_s1 = sld [smem:[#allocation2 + $0x8]]  ;;  %s15262_s25 = smov 80  }
  0x2c   :  { %v106_v37 = vadd.f32 %v104_v26, %v97_v30  ;;  %v149_v59 = vmul.f32 %v13392_v48, %v147_v47  ;;  %v165_v61 = vstv %s15425_s3  ;;  %v157_v0 = vmul.f32 %v13394_v53, %v156_v54  ;;  %v13403_v10 = vld [vmem:[%s17173_s27 + $0xc0] sm:$0xff]  ;;  %v13404_v12 = vld [vmem:[%s17173_s27 + $0xd0] sm:$0xff]  ;;  %v13406_v17 = vld [vmem:[%s17173_s27 + $0xc8] sm:$0xff]  ;;  %s15488_s2 = sld [smem:[#allocation2 + $0x11]] }
  0x2d   :  { %v114_v42 = vadd.f32 %v112_v29, %v105_v35  ;;  %v158_v2 = vmul.f32 %v13395_v55, %v156_v54  ;;  %v174_v4 = vstv %s15434_s24  ;;  %v166_v7 = vmul.f32 %v13397_v60, %v165_v61  ;;  %v13407_v19 = vld [vmem:[%s17173_s27 + $0xd8] sm:$0xff]  ;;  %v13409_v24 = vld [vmem:[%s17173_s27 + $0xe0] sm:$0xff]  ;;  %v13410_v26 = vld [vmem:[%s17173_s27 + $0xf0] sm:$0xff]  ;;  %s17175_s24 = sld [smem:[#allocation7_spill]] }
  0x2e   :  { %v115_v44 = vadd.f32 %v113_v31, %v106_v37  ;;  %v167_v9 = vmul.f32 %v13398_v62, %v165_v61  ;;  %v183_v11 = vstv %s15443_s22  ;;  %v175_v14 = vmul.f32 %v13400_v3, %v174_v4  ;;  %v13412_v31 = vld [vmem:[%s17173_s27 + $0xe8] sm:$0xff]  ;;  %v13413_v33 = vld [vmem:[%s17173_s27 + $0xf8] sm:$0xff]  ;;  %v13416_v40 = vld [vmem:[%s17173_s27 + $0x110] sm:$0xff]  ;;  %s17174_s22 = sld [smem:[#allocation8_spill]] }
  0x2f   :  { %v123_v49 = vadd.f32 %v121_v36, %v114_v42  ;;  %v176_v16 = vmul.f32 %v13401_v5, %v174_v4  ;;  %v192_v18 = vstv %s15452_s29  ;;  %v184_v21 = vmul.f32 %v13403_v10, %v183_v11  ;;  %v13419_v47 = vld [vmem:[%s17173_s27 + $0x118] sm:$0xff] }
  0x30   :  { %v124_v51 = vadd.f32 %v122_v38, %v115_v44  ;;  %v185_v23 = vmul.f32 %v13404_v12, %v183_v11  ;;  %v201_v25 = vstv %s15461_s20  ;;  %v193_v28 = vmul.f32 %v13406_v17, %v192_v18  ;;  %v13415_v38 = vld [vmem:[%s17173_s27 + $0x100] sm:$0xff]  ;;  %s15263_s20 = smov 112  }
  0x31   :  { %v132_v56 = vadd.f32 %v130_v43, %v123_v49  ;;  %v194_v30 = vmul.f32 %v13407_v19, %v192_v18  ;;  %v210_v32 = vstv %s15470_s21  ;;  %v202_v35 = vmul.f32 %v13409_v24, %v201_v25  ;;  %v320_v18 = vld [vmem:[%s17150_s5 + $0x18] sm:$0xff] }
  0x32   :  { %v133_v58 = vadd.f32 %v131_v45, %v124_v51  ;;  %v203_v37 = vmul.f32 %v13410_v26, %v201_v25  ;;  %v219_v39 = vstv %s15479_s1  ;;  %v211_v42 = vmul.f32 %v13412_v31, %v210_v32  ;;  %v13418_v45 = vld [vmem:[%s17173_s27 + $0x108] sm:$0xff]  ;;  %s15264_s27 = smov 48  }
  0x33   :  { %v141_v63 = vadd.f32 %v139_v50, %v132_v56  ;;  %v212_v44 = vmul.f32 %v13413_v33, %v210_v32  ;;  %v228_v46 = vstv %s15488_s2  ;;  %v220_v49 = vmul.f32 %v13415_v38, %v219_v39  ;;  %s15259_s2 = smov 96  }
  0x34   :  { %v142_v1 = vadd.f32 %v140_v52, %v133_v58  ;;  %v221_v51 = vmul.f32 %v13416_v40, %v219_v39  ;;  %v229_v53 = vmul.f32 %v13418_v45, %v228_v46  ;;  %v230_v55 = vmul.f32 %v13419_v47, %v228_v46 }
  0x35   :  { %v150_v6 = vadd.f32 %v148_v57, %v141_v63  ;;  %v15528_v19 = vand.u32 4294901760, %v320_v18 }
  0x36   :  { %v151_v8 = vadd.f32 %v149_v59, %v142_v1 }
  0x37   :  { %v159_v13 = vadd.f32 %v157_v0, %v150_v6  ;;  %14029 = vmatprep.subr.mxu0 %v15528_v19 }
  0x38   :  { %v160_v15 = vadd.f32 %v158_v2, %v151_v8  ;;  %14030 = vmatpush3.msra.mxu0 %v15528_v19 }
  0x39   :  { %v168_v20 = vadd.f32 %v166_v7, %v159_v13 }
  0x3a   :  { %v169_v22 = vadd.f32 %v167_v9, %v160_v15 }
  0x3b   :  { %v177_v27 = vadd.f32 %v175_v14, %v168_v20  ;;  %v319_v20 = vld [vmem:[%s17150_s5 + $0x10] sm:$0xff] }
  0x3c   :  { %v178_v29 = vadd.f32 %v176_v16, %v169_v22  ;;  %v15536_v22 = vand.u32 4294901760, %v319_v20 }
  0x3d   :  { %v186_v34 = vadd.f32 %v184_v21, %v177_v27  ;;  %v15534_v21 = vsub.f32 %v320_v18, %v15528_v19  ;;  %v317_v27 = vld [vmem:[%s17150_s5] sm:$0xff] }
  0x3e   :  { %v187_v36 = vadd.f32 %v185_v23, %v178_v29  ;;  %v318_v23 = vld [vmem:[%s17150_s5 + $0x8] sm:$0xff]  ;;  %v15547_v25 = vsub.f32 %v319_v20, %v15536_v22  ;;  %14031 = vmatprep.subr.mxu0 %v15536_v22  ;;  %v15564_v31 = vand.u32 4294901760, %v317_v27 }
  0x3f   :  { %v195_v41 = vadd.f32 %v193_v28, %v186_v34  ;;  %v15544_v24 = vand.u32 4294901760, %v15534_v21  ;;  %v15549_v26 = vand.u32 4294901760, %v318_v23  ;;  %14032 = vmatpush3.msra.mxu0 %v15536_v22 }
  0x40   :  { %v196_v43 = vadd.f32 %v194_v30, %v187_v36  ;;  %v15559_v29 = vand.u32 4294901760, %v15547_v25 }
  0x41   :  { %v204_v48 = vadd.f32 %v202_v35, %v195_v41  ;;  %v451_v28 = vsub.f32 %v15534_v21, %v15544_v24  ;;  %v15562_v30 = vsub.f32 %v318_v23, %v15549_v26  ;;  %14033 = vmatprep.subr.mxu0 %v15549_v26  ;;  %v15574_v35 = vsub.f32 %v317_v27, %v15564_v31 }
  0x42   :  { %v205_v50 = vadd.f32 %v203_v37, %v196_v43  ;;  %14034 = vmatpush3.msra.mxu0 %v15549_v26  ;;  %v458_v33 = vsub.f32 %v15547_v25, %v15559_v29 }
  0x43   :  { %v213_v52 = vadd.f32 %v211_v42, %v204_v48  ;;  %v452_v32 = vand.u32 4294901760, %v451_v28  ;;  %v15571_v34 = vand.u32 4294901760, %v15562_v30  ;;  %14035 = vmatprep.subr.mxu0 %v15564_v31  ;;  %v15581_v38 = vand.u32 4294901760, %v15574_v35 }
  0x44   :  { %v214_v54 = vadd.f32 %v212_v44, %v205_v50  ;;  %14036 = vmatpush3.msra.mxu0 %v15564_v31  ;;  %v459_v36 = vand.u32 4294901760, %v458_v33 }
  0x45   :  { %v222_v56 = vadd.f32 %v220_v49, %v213_v52  ;;  %14040 = vmatprep.subr.mxu1 %v452_v32  ;;  %v465_v37 = vsub.f32 %v15562_v30, %v15571_v34  ;;  %14051 = vmatprep.subr.mxu0 %v15534_v21  ;;  %v472_v40 = vsub.f32 %v15574_v35, %v15581_v38  ;;  %v13421_v49 = vld [vmem:[%s17174_s22] ss:$0 sm:$0xff] }
  0x46   :  { %v223_v57 = vadd.f32 %v221_v51, %v214_v54  ;;  %14041 = vmatpush3.msra.mxu1 %v452_v32  ;;  %v13422_v51 = vld [vmem:[%s17149_s4] ss:$0 sm:$0xff] }
  0x47   :  { %v231_v58 = vadd.f32 %v229_v53, %v222_v56  ;;  %14042 = vmatprep.subr.mxu1 %v459_v36  ;;  %v466_v39 = vand.u32 4294901760, %v465_v37  ;;  %v473_v41 = vand.u32 4294901760, %v472_v40 }
  0x48   :  { %v232_v59 = vadd.f32 %v230_v55, %v223_v57  ;;  %14043 = vmatpush3.msra.mxu1 %v459_v36 }
  0x49   :  { %v235_v60 = vmul.f32 0.70710677, %v231_v58  ;;  %v233_v62 = vmul.f32 0.5, %v231_v58  ;;  %14044 = vmatprep.subr.mxu1 %v466_v39 }
  0x4a   :  { %v236_v61 = vmul.f32 0.70710677, %v232_v59  ;;  %v234_v0 = vmul.f32 0.5, %v232_v59  ;;  %14045 = vmatpush3.msra.mxu1 %v466_v39 }
  0x4b   :  { %15178 = verf.f32 %v235_v60  ;;  %14046 = vmatprep.subr.mxu1 %v473_v41 }
  0x4c   :  { %15180 = verf.f32 %v236_v61  ;;  %14047 = vmatpush3.msra.mxu1 %v473_v41 }
  0x4d   :  { %14062 = vmatprep.subr.mxu1 %v15528_v19 }
  0x58   :  { %v15179_v63 = vpop.eup %15178 }
  0x59   :  { %v15181_v1 = vpop.eup %15180  ;;  %v239_v2 = vadd.f32 1.0, %v15179_v63 }
  0x5a   :  { %v240_v3 = vadd.f32 1.0, %v15181_v1 }
  0x5b   :  { %v241_v4 = vmul.f32 %v239_v2, %v233_v62 }
  0x5c   :  { %v242_v5 = vmul.f32 %v240_v3, %v234_v0 }
  0x5d   :  { %v246_v6 = vsel %vm245_vm0, %v241_v4, 0.0 }
  0x5e   :  { %247 = vadd.xlane.f32.xlu0 %v246_v6  ;;  %v249_v7 = vsel %vm245_vm0, %v242_v5, 0.0 }
  0x62   :  { %250 = vadd.xlane.f32.xlu0 %v249_v7  ;;  %v13423_v7 = vld [vmem:[%s17151_s6] ss:$0 sm:$0xff] }
  0xe7   :  { %v248_v8 = vpop.xlane.xlu0 %247 }
  0xe8   :  { %v253_v9 = vmul.f32 0.03125, %v248_v8 }
  0xea   :  { %v255_v10 = vsub.f32 %v241_v4, %v253_v9 }
  0xeb   :  { %v251_v11 = vpop.xlane.xlu0 %250 }
  0xec   :  { %v254_v12 = vmul.f32 0.03125, %v251_v11  ;;  %v257_v13 = vmul.f32 %v255_v10, %v255_v10 }
  0xee   :  { %v256_v14 = vsub.f32 %v242_v5, %v254_v12  ;;  %v259_v15 = vsel %vm245_vm0, %v257_v13, 0.0 }
  0xef   :  { %260 = vadd.xlane.f32.xlu1 %v259_v15 }
  0xf0   :  { %v258_v16 = vmul.f32 %v256_v14, %v256_v14 }
  0xf2   :  { %v262_v17 = vsel %vm245_vm0, %v258_v16, 0.0 }
  0xf3   :  { %263 = vadd.xlane.f32.xlu1 %v262_v17 }
 0x178   :  { %v261_v42 = vpop.xlane.xlu1 %260 }
 0x179   :  { %v265_v43 = vmul.f32 0.03125, %v261_v42 }
 0x17b   :  { %v267_v44 = vadd.f32 1e-12, %v265_v43 }
 0x17c   :  { %v264_v45 = vpop.xlane.xlu1 %263 }
 0x17d   :  { %15182 = vrsqrt.f32 %v267_v44  ;;  %v266_v46 = vmul.f32 0.03125, %v264_v45 }
 0x17f   :  { %v268_v47 = vadd.f32 1e-12, %v266_v46 }
 0x181   :  { %15184 = vrsqrt.f32 %v268_v47 }
 0x18a   :  { %v15183_v48 = vpop.eup %15182 }
 0x18b   :  { %v271_v50 = vmul.f32 %v15183_v48, %v255_v10 }
 0x18d   :  { %v279_v52 = vmul.f32 %v13421_v49, %v271_v50 }
 0x18e   :  { %v15185_v53 = vpop.eup %15184 }
 0x18f   :  { %v272_v54 = vmul.f32 %v15185_v53, %v256_v14  ;;  %v15593_v55 = vadd.f32 %v13422_v51, %v279_v52 }
 0x191   :  { %289 = vst.msk [vmem:[%s17163_s18] sm:$0xff] %vm245_vm0, %v15593_v55  ;;  %v329_v56 = vsel %vm245_vm0, %v15593_v55, 0  ;;  %v280_v57 = vmul.f32 %v13421_v49, %v272_v54 }
 0x192   :  { %v403_v58 = vand.u32 4294901760, %v329_v56 }
 0x193   :  { %v15602_v59 = vadd.f32 %v13422_v51, %v280_v57 }
 0x194   :  { %14048 = vmatprep.mubr.f32.mxu1 %v403_v58  ;;  %v404_v60 = vsub.f32 %v329_v56, %v403_v58 }
 0x195   :  { %290 = vst.msk [vmem:[%s17163_s18 + $0x8] sm:$0xff] %vm245_vm0, %v15602_v59  ;;  %v332_v61 = vsel %vm245_vm0, %v15602_v59, 0 }
 0x196   :  { %v413_v62 = vand.u32 4294901760, %v332_v61  ;;  %v405_v63 = vand.u32 4294901760, %v404_v60 }
 0x198   :  { %v414_v0 = vsub.f32 %v332_v61, %v413_v62  ;;  %14049 = vmatmul.mubr.f32.vlgmr.msra.gmra.mxu1 %v413_v62  ;;  %v406_v1 = vsub.f32 %v404_v60, %v405_v63 }
 0x199   :  { %14063 = vmatpush3.msra.mxu1 %v15528_v19  ;;  %14070 = vmatprep.mubr.f32.mxu1 %v405_v63  ;;  %v291_v63 = vld [vmem:[%s17175_s24] sm:$0x3] }
 0x19a   :  { %14064 = vmatprep.subr.mxu1 %v15536_v22  ;;  %v407_v2 = vand.u32 4294901760, %v406_v1  ;;  %v415_v3 = vand.u32 4294901760, %v414_v0  ;;  %v292_v1 = vsub.f32 1.0, %v291_v63 }
 0x19b   :  { %14065 = vmatpush3.msra.mxu1 %v15536_v22 }
 0x19c   :  { %14066 = vmatprep.subr.mxu1 %v15549_v26  ;;  %14037 = vmatprep.mubr.f32.mxu0 %v407_v2  ;;  %v416_v4 = vsub.f32 %v414_v0, %v415_v3 }
 0x19d   :  { %14067 = vmatpush3.msra.mxu1 %v15549_v26 }
 0x19e   :  { %14068 = vmatprep.subr.mxu1 %v15564_v31  ;;  %v417_v5 = vand.u32 4294901760, %v416_v4 }
 0x19f   :  { %14069 = vmatpush3.msra.mxu1 %v15564_v31 }
 0x1a0   :  { %14071 = vmatmul.mubr.f32.vlgmr.msra.gmra.mxu1 %v415_v3  ;;  %14084 = vmatprep.subr.mxu1 %v15528_v19 }
 0x1a1   :  { %14038 = vmatmul.mubr.f32.vlgmr.msra.gmra.mxu0 %v417_v5  ;;  %14085 = vmatpush3.msra.mxu1 %v15528_v19  ;;  %v15257_v19 = vmov 0.0  }
 0x1a2   :  { %14052 = vmatpush3.msra.mxu0 %v15534_v21  ;;  %14092 = vmatprep.mubr.f32.mxu1 %v403_v58 }
 0x1a3   :  { %14053 = vmatprep.subr.mxu0 %v15547_v25  ;;  %14059 = vmatprep.mubr.f32.mxu0 %v404_v60  ;;  %v15260_v60 = vmov 1966171168  }
 0x1a4   :  { %14086 = vmatprep.subr.mxu1 %v15536_v22  ;;  %14054 = vmatpush3.msra.mxu0 %v15547_v25  ;;  %v296_v61 = vunpack.c.l.s4 %v15260_v60 }
 0x1a5   :  { %14087 = vmatpush3.msra.mxu1 %v15536_v22  ;;  %14055 = vmatprep.subr.mxu0 %v15562_v30 }
 0x1a6   :  { %14088 = vmatprep.subr.mxu1 %v15549_v26  ;;  %14056 = vmatpush3.msra.mxu0 %v15562_v30  ;;  %v297_v2 = vunpack.c.0.s8 %v296_v61 }
 0x1a7   :  { %14089 = vmatpush3.msra.mxu1 %v15549_v26  ;;  %14057 = vmatprep.subr.mxu0 %v15574_v35 }
 0x1a8   :  { %14090 = vmatprep.subr.mxu1 %v15564_v31  ;;  %14058 = vmatpush3.msra.mxu0 %v15574_v35 }
 0x1a9   :  { %14091 = vmatpush3.msra.mxu1 %v15564_v31  ;;  %14060 = vmatmul.mubr.f32.vlgmr.msra.gmra.mxu0 %v414_v0 }
 0x1aa   :  { %14073 = vmatprep.subr.mxu0 %v15544_v24  ;;  %14093 = vmatmul.mubr.f32.vlgmr.msra.gmra.mxu1 %v413_v62 }
 0x1ab   :  { %14074 = vmatpush3.msra.mxu0 %v15544_v24  ;;  %14081 = vmatprep.mubr.f32.mxu0 %v403_v58 }
 0x1ac   :  { %14075 = vmatprep.subr.mxu0 %v15559_v29  ;;  %14100 = vmatprep.subr.mxu1 %v15257_v19 }
 0x1ad   :  { %14076 = vmatpush3.msra.mxu0 %v15559_v29  ;;  %14102 = vmatprep.mubr.msk.f32.mxu1 %vm15258_vm1, %v15257_v19 }
 0x1ae   :  { %14077 = vmatprep.subr.mxu0 %v15571_v34 }
 0x1af   :  { %14078 = vmatpush3.msra.mxu0 %v15571_v34 }
 0x1b0   :  { %14079 = vmatprep.subr.mxu0 %v15581_v38 }
 0x1b1   :  { %14080 = vmatpush3.msra.mxu0 %v15581_v38 }
 0x1b2   :  { %14082 = vmatmul.mubr.f32.vlgmr.msra.gmra.mxu0 %v413_v62  ;;  %14095 = vmatprep.subr.mxu0 %v15257_v19  ;;  %v298_v62 = vlaneseq }
 0x1b3   :  { %14097 = vmatprep.mubr.msk.f32.mxu0 %vm15258_vm1, %v15257_v19 }
 0x1b4   :  { %v299_v3 = vshrl.u32 %v298_v62, 7 }
 0x258   :  { %v14050_v8 = vpop.f32.mrf.mxu1 }
 0x25a   :  { %v510_v13 = vpop.f32.mrf.mxu1 }
 0x260   :  { %v14072_v15 = vpop.f32.mrf.mxu1 }
 0x261   :  { %v14039_v6 = vpop.f32.mrf.mxu0 }
 0x262   :  { %v420_v10 = vadd.f32 %v14039_v6, %v13423_v7  ;;  %v680_v21 = vpop.f32.mrf.mxu1  ;;  %v293_v6 = vmul.f32 -10000.0, %v292_v1 }
 0x263   :  { %v409_v9 = vpop.f32.mrf.mxu0 }
 0x264   :  { %v410_v11 = vadd.f32 %v13423_v7, %v409_v9  ;;  %v517_v14 = vadd.f32 %v14050_v8, %v420_v10  ;;  %v300_v7 = vsub.s32 %v297_v2, %v299_v3 }
 0x266   :  { %v511_v18 = vadd.f32 %v510_v13, %v410_v11 }
 0x269   :  { %v14061_v12 = vpop.f32.mrf.mxu0 }
 0x26a   :  { %v604_v17 = vadd.f32 %v14061_v12, %v517_v14  ;;  %v14094_v23 = vpop.f32.mrf.mxu1  ;;  %v301_v12 = vrot.slane %v293_v6, %v300_v7 }
 0x26b   :  { %v596_v16 = vpop.f32.mrf.mxu0 }
 0x26c   :  { %v597_v20 = vadd.f32 %v596_v16, %v511_v18  ;;  %v689_v22 = vadd.f32 %v14072_v15, %v604_v17  ;;  %v852_v30 = vpop.f32.mrf.mxu1 }
 0x26e   :  { %v681_v26 = vadd.f32 %v680_v21, %v597_v20  ;;  %v309_v20 = vrot.slane %v301_v12, %v300_v7  ;;  %v1774_v21 = vsub.s32 0, %v299_v3 }
 0x272   :  { %v14083_v24 = vpop.f32.mrf.mxu0 }
 0x273   :  { %v778_v25 = vadd.f32 %v14083_v24, %v689_v22 }
 0x274   :  { %v771_v27 = vpop.f32.mrf.mxu0 }
 0x275   :  { %v15650_v28 = vadd.f32 %v14094_v23, %v778_v25  ;;  %v772_v29 = vadd.f32 %v771_v27, %v681_v26 }
 0x277   :  { %v15652_v31 = vadd.f32 %v852_v30, %v772_v29  ;;  %1318 = vrot.lane.b32.xlu1 %v15650_v28, %s15259_s2  ;;  %v1320_v36 = vsel %vm866_vm2, %v15650_v28, 0  ;;  %v15703_v29 = vrot.slane %v309_v20, %v1774_v21 }
 0x278   :  { %v1390_v41 = vand.u32 4294901760, %v1320_v36 }
 0x279   :  { %864 = vrot.lane.b32.xlu0 %v15652_v31, %s15259_s2  ;;  %v867_v32 = vsel %vm866_vm2, %v15652_v31, 0 }
 0x27a   :  { %v937_v33 = vand.u32 4294901760, %v867_v32  ;;  %v1391_v46 = vsub.f32 %v1320_v36, %v1390_v41 }
 0x27c   :  { %v938_v34 = vsub.f32 %v867_v32, %v937_v33  ;;  %v1392_v50 = vand.u32 4294901760, %v1391_v46 }
 0x27e   :  { %v939_v35 = vand.u32 4294901760, %v938_v34  ;;  %v1393_v53 = vsub.f32 %v1391_v46, %v1392_v50 }
 0x280   :  { %v940_v40 = vsub.f32 %v938_v34, %v939_v35  ;;  %v1394_v56 = vand.u32 4294901760, %v1393_v53 }
 0x282   :  { %v941_v45 = vand.u32 4294901760, %v940_v40 }
 0x2e9   :  { %v1319_v37 = vpop.permute.xlu1 %1318 }
 0x2ea   :  { %v1322_v43 = vsel %vm866_vm2, %v1319_v37, 0 }
 0x2eb   :  { %v865_v38 = vpop.permute.xlu0 %864  ;;  %v1355_v47 = vand.u32 4294901760, %v1322_v43 }
 0x2ec   :  { %v869_v39 = vsel %vm866_vm2, %v865_v38, 0  ;;  %v302_v38 = vcombine.high %v301_v12, %v301_v12 }
 0x2ed   :  { %v902_v42 = vand.u32 4294901760, %v869_v39  ;;  %v1432_v51 = vsub.f32 %v1322_v43, %v1355_v47 }
 0x2ef   :  { %v979_v44 = vsub.f32 %v869_v39, %v902_v42  ;;  %14096 = vmatpush3.xpose.msra.mxu0 %v902_v42  ;;  %v1433_v54 = vand.u32 4294901760, %v1432_v51 }
 0x2f0   :  { %14105 = vmatprep.subr.mxu0 %v15257_v19 }
 0x2f1   :  { %v980_v48 = vand.u32 4294901760, %v979_v44  ;;  %v1434_v57 = vsub.f32 %v1432_v51, %v1433_v54 }
 0x2f2   :  { %14098 = vmatmul.mubr.f32.vlgmr.msra.gmra.mxu0 %v941_v45  ;;  %v316_v45 = vrot.slane %v302_v38, %v300_v7 }
 0x2f3   :  { %v981_v49 = vsub.f32 %v979_v44, %v980_v48  ;;  %14106 = vmatpush3.xpose.msra.mxu0 %v979_v44  ;;  %14107 = vmatprep.mubr.msk.f32.mxu0 %vm15258_vm1, %v15257_v19  ;;  %v1435_v58 = vand.u32 4294901760, %v1434_v57 }
 0x2f4   :  { %14115 = vmatprep.subr.mxu0 %v15257_v19 }
 0x2f5   :  { %v982_v52 = vand.u32 4294901760, %v981_v49 }
 0x2f6   :  { %14108 = vmatmul.mubr.f32.vlgmr.msra.gmra.mxu0 %v938_v34 }
 0x2f7   :  { %14101 = vmatpush3.xpose.msra.mxu1 %v982_v52  ;;  %14116 = vmatpush3.xpose.msra.mxu0 %v980_v48 }
 0x2f8   :  { %14117 = vmatprep.mubr.msk.f32.mxu0 %vm15258_vm1, %v15257_v19  ;;  %14110 = vmatprep.subr.mxu1 %v15257_v19 }
 0x2f9   :  { %14125 = vmatprep.subr.mxu0 %v15257_v19 }
 0x2fa   :  { %14103 = vmatmul.mubr.f32.vlgmr.msra.gmra.mxu1 %v937_v33  ;;  %14118 = vmatmul.mubr.f32.vlgmr.msra.gmra.mxu0 %v937_v33 }
 0x2fb   :  { %14111 = vmatpush3.xpose.msra.mxu1 %v902_v42  ;;  %14126 = vmatpush3.xpose.msra.mxu0 %v1355_v47 }
 0x2fc   :  { %14112 = vmatprep.mubr.msk.f32.mxu1 %vm15258_vm1, %v15257_v19  ;;  %14127 = vmatprep.mubr.msk.f32.mxu0 %vm15258_vm1, %v15257_v19 }
 0x2fd   :  { %14120 = vmatprep.subr.mxu1 %v15257_v19  ;;  %14135 = vmatprep.subr.mxu0 %v15257_v19 }
 0x2fe   :  { %14113 = vmatmul.mubr.f32.vlgmr.msra.gmra.mxu1 %v939_v35  ;;  %14128 = vmatmul.mubr.f32.vlgmr.msra.gmra.mxu0 %v1394_v56 }
 0x2ff   :  { %14121 = vmatpush3.xpose.msra.mxu1 %v902_v42  ;;  %14136 = vmatpush3.xpose.msra.mxu0 %v1432_v51 }
 0x300   :  { %14122 = vmatprep.mubr.msk.f32.mxu1 %vm15258_vm1, %v15257_v19  ;;  %14137 = vmatprep.mubr.msk.f32.mxu0 %vm15258_vm1, %v15257_v19 }
 0x301   :  { %14130 = vmatprep.subr.mxu1 %v15257_v19  ;;  %14145 = vmatprep.subr.mxu0 %v15257_v19 }
 0x302   :  { %14123 = vmatmul.mubr.f32.vlgmr.msra.gmra.mxu1 %v937_v33  ;;  %14138 = vmatmul.mubr.f32.vlgmr.msra.gmra.mxu0 %v1391_v46 }
 0x303   :  { %14131 = vmatpush3.xpose.msra.mxu1 %v1435_v58  ;;  %14146 = vmatpush3.xpose.msra.mxu0 %v1433_v54 }
 0x304   :  { %14132 = vmatprep.mubr.msk.f32.mxu1 %vm15258_vm1, %v15257_v19  ;;  %14147 = vmatprep.mubr.msk.f32.mxu0 %vm15258_vm1, %v15257_v19 }
 0x305   :  { %14140 = vmatprep.subr.mxu1 %v15257_v19  ;;  %14155 = vmatprep.subr.mxu0 %v15257_v19 }
 0x306   :  { %14133 = vmatmul.mubr.f32.vlgmr.msra.gmra.mxu1 %v1390_v41  ;;  %14148 = vmatmul.mubr.f32.vlgmr.msra.gmra.mxu0 %v1390_v41 }
 0x307   :  { %14141 = vmatpush3.xpose.msra.mxu1 %v1355_v47  ;;  %14142 = vmatprep.mubr.msk.f32.mxu1 %vm15258_vm1, %v15257_v19 }
 0x308   :  { %14150 = vmatprep.subr.mxu1 %v15257_v19  ;;  %14157 = vmatprep.mubr.msk.f32.mxu0 %vm15258_vm1, %v15257_v19 }
 0x30a   :  { %14143 = vmatmul.mubr.f32.vlgmr.msra.gmra.mxu1 %v1392_v50  ;;  %v15707_v50 = vrot.slane %v316_v45, %v1774_v21 }
 0x30b   :  { %14151 = vmatpush3.xpose.msra.mxu1 %v1355_v47  ;;  %14152 = vmatprep.mubr.msk.f32.mxu1 %vm15258_vm1, %v15257_v19 }
 0x30c   :  { %14160 = vmatprep.subr.mxu1 %v15257_v19 }
 0x30e   :  { %14153 = vmatmul.mubr.f32.vlgmr.msra.gmra.mxu1 %v1390_v41 }
 0x30f   :  { %14162 = vmatprep.mubr.msk.f32.mxu1 %vm15258_vm1, %v15257_v19 }
 0x3b2   :  { %v943_v0 = vpop.f32.mrf.mxu0 }
 0x3b4   :  { %v14099_v4 = vpop.f32.mrf.mxu0 }
 0x3b6   :  { %v1093_v5 = vpop.f32.mrf.mxu0 }
 0x3b8   :  { %v14109_v8 = vpop.f32.mrf.mxu0 }
 0x3ba   :  { %v1019_v9 = vpop.f32.mrf.mxu1  ;;  %v1241_v10 = vpop.f32.mrf.mxu0 }
 0x3bb   :  { %v1020_v11 = vadd.f32 %v1019_v9, %v943_v0 }
 0x3bc   :  { %v14104_v13 = vpop.f32.mrf.mxu1  ;;  %v14119_v14 = vpop.f32.mrf.mxu0 }
 0x3bd   :  { %v1094_v15 = vadd.f32 %v1093_v5, %v1020_v11 }
 0x3be   :  { %v1167_v16 = vpop.f32.mrf.mxu1  ;;  %v1396_v17 = vpop.f32.mrf.mxu0 }
 0x3bf   :  { %v1168_v18 = vadd.f32 %v1167_v16, %v1094_v15 }
 0x3c0   :  { %v14114_v22 = vpop.f32.mrf.mxu1  ;;  %v14129_v23 = vpop.f32.mrf.mxu0 }
 0x3c1   :  { %v1242_v24 = vadd.f32 %v1241_v10, %v1168_v18 }
 0x3c2   :  { %v1313_v25 = vpop.f32.mrf.mxu1  ;;  %v1546_v26 = vpop.f32.mrf.mxu0 }
 0x3c3   :  { %v1314_v27 = vadd.f32 %v1313_v25, %v1242_v24 }
 0x3c4   :  { %v14124_v30 = vpop.f32.mrf.mxu1  ;;  %v14139_v32 = vpop.f32.mrf.mxu0 }
 0x3c5   :  { %v1770_v33 = vmul.f32 0.25, %v1314_v27 }
 0x3c6   :  { %v1472_v34 = vpop.f32.mrf.mxu1  ;;  %v1694_v35 = vpop.f32.mrf.mxu0 }
 0x3c7   :  { %v1473_v36 = vadd.f32 %v1472_v34, %v1396_v17  ;;  %v1782_v37 = vadd.f32 %v15703_v29, %v1770_v33 }
 0x3c8   :  { %v14134_v39 = vpop.f32.mrf.mxu1  ;;  %v14149_v40 = vpop.f32.mrf.mxu0 }
 0x3c9   :  { %v1547_v41 = vadd.f32 %v1546_v26, %v1473_v36  ;;  %v1785_v42 = vsel %vm1784_vm3, %v1782_v37, -inf  ;;  %v2713_v39 = vld [vmem:[%s17152_s7] sm:$0xff] }
 0x3ca   :  { %v1620_v43 = vpop.f32.mrf.mxu1  ;;  %1786 = vmax.xlane.f32.xlu1 %v1785_v42 }
 0x3cb   :  { %v1621_v44 = vadd.f32 %v1620_v43, %v1547_v41  ;;  %v15776_v41 = vand.u32 4294901760, %v2713_v39 }
 0x3cc   :  { %v14144_v46 = vpop.f32.mrf.mxu1 }
 0x3cd   :  { %v1695_v47 = vadd.f32 %v1694_v35, %v1621_v44  ;;  %v15784_v43 = vsub.f32 %v2713_v39, %v15776_v41 }
 0x3ce   :  { %v1766_v48 = vpop.f32.mrf.mxu1 }
 0x3cf   :  { %v1767_v49 = vadd.f32 %v1766_v48, %v1695_v47  ;;  %v15791_v45 = vand.u32 4294901760, %v15784_v43 }
 0x3d0   :  { %v14154_v51 = vpop.f32.mrf.mxu1 }
 0x3d1   :  { %v1771_v52 = vmul.f32 0.25, %v1767_v49  ;;  %v2847_v47 = vsub.f32 %v15784_v43, %v15791_v45 }
 0x3d3   :  { %v1783_v53 = vadd.f32 %v15707_v50, %v1771_v52  ;;  %v2848_v48 = vand.u32 4294901760, %v2847_v47 }
 0x3d5   :  { %v1788_v54 = vsel %vm1784_vm3, %v1783_v53, -inf }
 0x3d6   :  { %1789 = vmax.xlane.f32.xlu0 %v1788_v54 }
 0x453   :  { %v1787_v56 = vpop.xlane.xlu1 %1786 }
 0x454   :  { %v1791_v57 = vsub.f32 %v1782_v37, %v1787_v56  ;;  %v2714_v37 = vld [vmem:[%s17152_s7 + $0x8] sm:$0xff] }
 0x455   :  { %v15768_v38 = vand.u32 4294901760, %v2714_v37 }
 0x456   :  { %v1793_v58 = vmul.f32 1.442695, %v1791_v57 }
 0x457   :  { %v15774_v40 = vsub.f32 %v2714_v37, %v15768_v38 }
 0x458   :  { %15186 = vpow2.f32 %v1793_v58 }
 0x459   :  { %v15781_v42 = vand.u32 4294901760, %v15774_v40 }
 0x45b   :  { %v2840_v44 = vsub.f32 %v15774_v40, %v15781_v42 }
 0x45d   :  { %v2841_v46 = vand.u32 4294901760, %v2840_v44 }
 0x45f   :  { %v1790_v60 = vpop.xlane.xlu0 %1789 }
 0x460   :  { %v1792_v61 = vsub.f32 %v1783_v53, %v1790_v60 }
 0x462   :  { %v1795_v62 = vmul.f32 1.442695, %v1792_v61 }
 0x464   :  { %15188 = vpow2.f32 %v1795_v62 }
 0x465   :  { %v15187_v63 = vpop.eup %15186 }
 0x466   :  { %v1797_v0 = vsel %vm1784_vm3, %v15187_v63, 0.0 }
 0x467   :  { %1798 = vadd.xlane.f32.xlu0 %v1797_v0 }
 0x471   :  { %v15189_v1 = vpop.eup %15188 }
 0x472   :  { %v1800_v2 = vsel %vm1784_vm3, %v15189_v1, 0.0 }
 0x473   :  { %1801 = vadd.xlane.f32.xlu1 %v1800_v2 }
 0x47d   :  { %1809 = vrot.lane.b32.xlu0 %v15652_v31, %s15261_s30 }
 0x481   :  { %3687 = vrot.lane.b32.xlu0 %v15650_v28, %s15262_s25 }
 0x484   :  { %2261 = vrot.lane.b32.xlu1 %v15650_v28, %s15261_s30 }
 0x488   :  { %3233 = vrot.lane.b32.xlu1 %v15652_v31, %s15262_s25 }
 0x48c   :  { %3231 = vrot.lane.b32.xlu1 %v15652_v31, %s15263_s20 }
 0x490   :  { %3685 = vrot.lane.b32.xlu1 %v15650_v28, %s15263_s20 }
 0x4f0   :  { %v1799_v3 = vpop.xlane.xlu0 %1798 }
 0x4f1   :  { %15190 = vrcp.f32 %v1799_v3 }
 0x4f4   :  { %v1810_v4 = vpop.permute.xlu0 %1809 }
 0x4f5   :  { %v1846_v5 = vand.u32 4294901760, %v1810_v4 }
 0x4f7   :  { %v1923_v6 = vsub.f32 %v1810_v4, %v1846_v5  ;;  %14156 = vmatpush3.msra.mxu0 %v1846_v5 }
 0x4f8   :  { %14165 = vmatprep.subr.mxu0 %v15257_v19  ;;  %v3688_v44 = vpop.permute.xlu0 %3687 }
 0x4f9   :  { %v1924_v7 = vand.u32 4294901760, %v1923_v6 }
 0x4fb   :  { %v1925_v8 = vsub.f32 %v1923_v6, %v1924_v7 }
 0x4fc   :  { %v1802_v9 = vpop.xlane.xlu1 %1801 }
 0x4fd   :  { %v1926_v10 = vand.u32 4294901760, %v1925_v8  ;;  %15192 = vrcp.f32 %v1802_v9 }
 0x4fe   :  { %v15191_v11 = vpop.eup %15190 }
 0x4ff   :  { %14161 = vmatpush3.msra.mxu1 %v1926_v10  ;;  %v1805_v12 = vmul.f32 %v15191_v11, %v15187_v63 }
 0x500   :  { %v2262_v13 = vpop.permute.xlu1 %2261  ;;  %14170 = vmatprep.subr.mxu1 %v15257_v19 }
 0x501   :  { %v2298_v14 = vand.u32 4294901760, %v2262_v13  ;;  %1807 = vst.msk [vmem:[%s17164_s19] sm:$0xff] %vm1784_vm3, %v1805_v12  ;;  %v1813_v15 = vsel %vm1784_vm3, %v1805_v12, 0 }
 0x502   :  { %v1881_v16 = vand.u32 4294901760, %v1813_v15 }
 0x503   :  { %v2375_v17 = vsub.f32 %v2262_v13, %v2298_v14 }
 0x504   :  { %v1882_v18 = vsub.f32 %v1813_v15, %v1881_v16  ;;  %14163 = vmatmul.mubr.f32.vlgmr.msra.gmra.mxu1 %v1881_v16  ;;  %v3234_v11 = vpop.permute.xlu1 %3233 }
 0x505   :  { %v2376_v20 = vand.u32 4294901760, %v2375_v17  ;;  %14171 = vmatpush3.msra.mxu1 %v1846_v5  ;;  %14172 = vmatprep.mubr.msk.f32.mxu1 %vm15258_vm1, %v15257_v19 }
 0x506   :  { %14180 = vmatprep.subr.mxu1 %v15257_v19  ;;  %v1883_v21 = vand.u32 4294901760, %v1882_v18 }
 0x507   :  { %v2377_v22 = vsub.f32 %v2375_v17, %v2376_v20 }
 0x508   :  { %14173 = vmatmul.mubr.f32.vlgmr.msra.gmra.mxu1 %v1883_v21  ;;  %v1884_v23 = vsub.f32 %v1882_v18, %v1883_v21  ;;  %v3232_v37 = vpop.permute.xlu1 %3231 }
 0x509   :  { %v2378_v24 = vand.u32 4294901760, %v2377_v22  ;;  %14181 = vmatpush3.msra.mxu1 %v1846_v5  ;;  %14182 = vmatprep.mubr.msk.f32.mxu1 %vm15258_vm1, %v15257_v19 }
 0x50a   :  { %v15193_v25 = vpop.eup %15192  ;;  %14190 = vmatprep.subr.mxu1 %v15257_v19  ;;  %v1885_v26 = vand.u32 4294901760, %v1884_v23 }
 0x50b   :  { %v1806_v27 = vmul.f32 %v15193_v25, %v15189_v1 }
 0x50c   :  { %14158 = vmatmul.mubr.f32.vlgmr.msra.gmra.mxu0 %v1885_v26  ;;  %14183 = vmatmul.mubr.f32.vlgmr.msra.gmra.mxu1 %v1881_v16 }
 0x50d   :  { %14166 = vmatpush3.msra.mxu0 %v1923_v6  ;;  %14191 = vmatpush3.msra.mxu1 %v2378_v24  ;;  %1808 = vst.msk [vmem:[%s17164_s19 + $0x10] sm:$0xff] %vm1784_vm3, %v1806_v27  ;;  %v2265_v30 = vsel %vm1784_vm3, %v1806_v27, 0 }
 0x50e   :  { %14167 = vmatprep.mubr.msk.f32.mxu0 %vm15258_vm1, %v15257_v19  ;;  %14175 = vmatprep.subr.mxu0 %v15257_v19  ;;  %v2333_v32 = vand.u32 4294901760, %v2265_v30 }
 0x50f   :  { %14192 = vmatprep.mubr.msk.f32.mxu1 %vm15258_vm1, %v15257_v19  ;;  %14200 = vmatprep.subr.mxu1 %v15257_v19 }
 0x510   :  { %14168 = vmatmul.mubr.f32.vlgmr.msra.gmra.mxu0 %v1882_v18  ;;  %v2334_v33 = vsub.f32 %v2265_v30, %v2333_v32  ;;  %14193 = vmatmul.mubr.f32.vlgmr.msra.gmra.mxu1 %v2333_v32 }
 0x511   :  { %14176 = vmatpush3.msra.mxu0 %v1924_v7  ;;  %14201 = vmatpush3.msra.mxu1 %v2298_v14 }
 0x512   :  { %14177 = vmatprep.mubr.msk.f32.mxu0 %vm15258_vm1, %v15257_v19  ;;  %14185 = vmatprep.subr.mxu0 %v15257_v19  ;;  %v2335_v34 = vand.u32 4294901760, %v2334_v33 }
 0x513   :  { %14202 = vmatprep.mubr.msk.f32.mxu1 %vm15258_vm1, %v15257_v19  ;;  %14210 = vmatprep.subr.mxu1 %v15257_v19 }
 0x514   :  { %14178 = vmatmul.mubr.f32.vlgmr.msra.gmra.mxu0 %v1881_v16  ;;  %14203 = vmatmul.mubr.f32.vlgmr.msra.gmra.mxu1 %v2335_v34  ;;  %v2336_v35 = vsub.f32 %v2334_v33, %v2335_v34 }
 0x515   :  { %14186 = vmatpush3.msra.mxu0 %v2298_v14  ;;  %14211 = vmatpush3.msra.mxu1 %v2298_v14 }
 0x516   :  { %14187 = vmatprep.mubr.msk.f32.mxu0 %vm15258_vm1, %v15257_v19  ;;  %14195 = vmatprep.subr.mxu0 %v15257_v19  ;;  %v2337_v36 = vand.u32 4294901760, %v2336_v35 }
 0x517   :  { %14212 = vmatprep.mubr.msk.f32.mxu1 %vm15258_vm1, %v15257_v19  ;;  %14222 = vmatprep.subr.mxu1 %v2841_v46 }
 0x518   :  { %14188 = vmatmul.mubr.f32.vlgmr.msra.gmra.mxu0 %v2337_v36  ;;  %14213 = vmatmul.mubr.f32.vlgmr.msra.gmra.mxu1 %v2333_v32 }
 0x519   :  { %14196 = vmatpush3.msra.mxu0 %v2375_v17  ;;  %14197 = vmatprep.mubr.msk.f32.mxu0 %vm15258_vm1, %v15257_v19 }
 0x51a   :  { %14205 = vmatprep.subr.mxu0 %v15257_v19  ;;  %14223 = vmatpush3.msra.mxu1 %v2841_v46 }
 0x51b   :  { %14224 = vmatprep.subr.mxu1 %v2848_v48 }
 0x51c   :  { %14198 = vmatmul.mubr.f32.vlgmr.msra.gmra.mxu0 %v2334_v33  ;;  %14225 = vmatpush3.msra.mxu1 %v2848_v48  ;;  %v3235_v48 = vsel %vm866_vm2, %v3232_v37, 0 }
 0x51d   :  { %14206 = vmatpush3.msra.mxu0 %v2376_v20  ;;  %14207 = vmatprep.mubr.msk.f32.mxu0 %vm15258_vm1, %v15257_v19  ;;  %v3237_v20 = vsel %vm866_vm2, %v3234_v11, 0 }
 0x51e   :  { %14215 = vmatprep.subr.mxu0 %v15768_v38  ;;  %14236 = vmatprep.subr.mxu1 %v15768_v38  ;;  %v15803_v25 = vand.u32 4294901760, %v3237_v20 }
 0x520   :  { %14208 = vmatmul.mubr.f32.vlgmr.msra.gmra.mxu0 %v2333_v32  ;;  %v15806_v35 = vsub.f32 %v3237_v20, %v15803_v25 }
 0x521   :  { %14216 = vmatpush3.msra.mxu0 %v15768_v38 }
 0x522   :  { %14217 = vmatprep.subr.mxu0 %v15776_v41  ;;  %v3348_v46 = vand.u32 4294901760, %v15806_v35 }
 0x523   :  { %14218 = vmatpush3.msra.mxu0 %v15776_v41 }
 0x524   :  { %14229 = vmatprep.subr.mxu0 %v15774_v40 }
 0x5c4   :  { %v1963_v49 = vpop.f32.mrf.mxu1 }
 0x5c6   :  { %v14164_v51 = vpop.f32.mrf.mxu1 }
 0x5c7   :  { %v3691_v51 = vsel %vm866_vm2, %v3688_v44, 0 }
 0x5c8   :  { %v2111_v52 = vpop.f32.mrf.mxu1 }
 0x5ca   :  { %v14174_v53 = vpop.f32.mrf.mxu1 }
 0x5cb   :  { %v15818_v53 = vand.u32 4294901760, %v3235_v48 }
 0x5cc   :  { %v1887_v54 = vpop.f32.mrf.mxu0  ;;  %v2257_v56 = vpop.f32.mrf.mxu1 }
 0x5cd   :  { %v1964_v60 = vadd.f32 %v1963_v49, %v1887_v54 }
 0x5ce   :  { %v14159_v57 = vpop.f32.mrf.mxu0  ;;  %v14184_v58 = vpop.f32.mrf.mxu1 }
 0x5d0   :  { %v2037_v61 = vpop.f32.mrf.mxu0  ;;  %v2415_v62 = vpop.f32.mrf.mxu1 }
 0x5d1   :  { %v2038_v63 = vadd.f32 %v2037_v61, %v1964_v60  ;;  %v3306_v60 = vsub.f32 %v3235_v48, %v15818_v53  ;;  %v3686_v61 = vpop.permute.xlu1 %3685 }
 0x5d2   :  { %v14169_v0 = vpop.f32.mrf.mxu0  ;;  %v14194_v1 = vpop.f32.mrf.mxu1 }
 0x5d3   :  { %v2112_v2 = vadd.f32 %v2111_v52, %v2038_v63  ;;  %v3349_v52 = vsub.f32 %v15806_v35, %v3348_v46 }
 0x5d4   :  { %v2185_v3 = vpop.f32.mrf.mxu0  ;;  %v2563_v4 = vpop.f32.mrf.mxu1 }
 0x5d5   :  { %v2186_v5 = vadd.f32 %v2185_v3, %v2112_v2  ;;  %v3350_v58 = vand.u32 4294901760, %v3349_v52 }
 0x5d6   :  { %v14179_v6 = vpop.f32.mrf.mxu0  ;;  %v14204_v7 = vpop.f32.mrf.mxu1 }
 0x5d7   :  { %v2258_v8 = vadd.f32 %v2257_v56, %v2186_v5  ;;  %v15823_v56 = vand.u32 4294901760, %v3691_v51 }
 0x5d8   :  { %v2339_v9 = vpop.f32.mrf.mxu0  ;;  %v2709_v10 = vpop.f32.mrf.mxu1 }
 0x5d9   :  { %v2716_v12 = vsel %vm866_vm2, %v2258_v8, 0  ;;  %v2416_v16 = vadd.f32 %v2415_v62, %v2339_v9  ;;  %v3689_v62 = vsel %vm866_vm2, %v3686_v61, 0 }
 0x5da   :  { %v15798_v13 = vand.u32 4294901760, %v2716_v12  ;;  %v14189_v14 = vpop.f32.mrf.mxu0  ;;  %v14214_v15 = vpop.f32.mrf.mxu1  ;;  %v3759_v63 = vand.u32 4294901760, %v3689_v62 }
 0x5dc   :  { %v2789_v17 = vsub.f32 %v2716_v12, %v15798_v13  ;;  %v2489_v18 = vpop.f32.mrf.mxu0  ;;  %14226 = vmatprep.mubr.f32.mxu1 %v15798_v13  ;;  %v3760_v1 = vsub.f32 %v3689_v62, %v3759_v63 }
 0x5dd   :  { %v2490_v21 = vadd.f32 %v2489_v18, %v2416_v16 }
 0x5de   :  { %v14199_v22 = vpop.f32.mrf.mxu0  ;;  %v2790_v23 = vand.u32 4294901760, %v2789_v17  ;;  %v3761_v2 = vand.u32 4294901760, %v3760_v1 }
 0x5df   :  { %v2564_v24 = vadd.f32 %v2563_v4, %v2490_v21 }
 0x5e0   :  { %v2637_v26 = vpop.f32.mrf.mxu0  ;;  %v2791_v27 = vsub.f32 %v2789_v17, %v2790_v23  ;;  %v3762_v3 = vsub.f32 %v3760_v1, %v3761_v2 }
 0x5e1   :  { %v2638_v30 = vadd.f32 %v2637_v26, %v2564_v24 }
 0x5e2   :  { %v14209_v32 = vpop.f32.mrf.mxu0  ;;  %v2792_v33 = vand.u32 4294901760, %v2791_v27  ;;  %v3763_v4 = vand.u32 4294901760, %v3762_v3 }
 0x5e3   :  { %v2710_v34 = vadd.f32 %v2709_v10, %v2638_v30 }
 0x5e4   :  { %14219 = vmatprep.mubr.f32.mxu0 %v2792_v33 }
 0x5e5   :  { %v2719_v36 = vsel %vm866_vm2, %v2710_v34, 0 }
 0x5e6   :  { %v2798_v39 = vand.u32 4294901760, %v2719_v36 }
 0x5e8   :  { %v2799_v47 = vsub.f32 %v2719_v36, %v2798_v39  ;;  %14227 = vmatmul.mubr.f32.vlgmr.msra.gmra.mxu1 %v2798_v39 }
 0x5e9   :  { %14237 = vmatpush3.msra.mxu1 %v15768_v38  ;;  %14240 = vmatprep.mubr.f32.mxu1 %v2790_v23 }
 0x5ea   :  { %14238 = vmatprep.subr.mxu1 %v15776_v41  ;;  %v2800_v49 = vand.u32 4294901760, %v2799_v47 }
 0x5eb   :  { %14239 = vmatpush3.msra.mxu1 %v15776_v41 }
 0x5ec   :  { %14250 = vmatprep.subr.mxu1 %v15768_v38  ;;  %14241 = vmatmul.mubr.f32.vlgmr.msra.gmra.mxu1 %v2800_v49  ;;  %v2801_v54 = vsub.f32 %v2799_v47, %v2800_v49 }
 0x5ed   :  { %14251 = vmatpush3.msra.mxu1 %v15768_v38  ;;  %14254 = vmatprep.mubr.f32.mxu1 %v15798_v13  ;;  %v15831_v38 = vsub.f32 %v3691_v51, %v15823_v56 }
 0x5ee   :  { %14252 = vmatprep.subr.mxu1 %v15776_v41  ;;  %v2802_v57 = vand.u32 4294901760, %v2801_v54 }
 0x5ef   :  { %14253 = vmatpush3.msra.mxu1 %v15776_v41  ;;  %v3307_v41 = vand.u32 4294901760, %v3306_v60 }
 0x5f0   :  { %14262 = vmatprep.subr.mxu1 %v15257_v19  ;;  %14220 = vmatmul.mubr.f32.vlgmr.msra.gmra.mxu0 %v2802_v57 }
 0x5f1   :  { %14230 = vmatpush3.msra.mxu0 %v15774_v40  ;;  %14255 = vmatmul.mubr.f32.vlgmr.msra.gmra.mxu1 %v2798_v39  ;;  %v3802_v40 = vand.u32 4294901760, %v15831_v38 }
 0x5f2   :  { %14263 = vmatpush3.xpose.msra.mxu1 %v3350_v58  ;;  %14231 = vmatprep.subr.mxu0 %v15784_v43 }
 0x5f3   :  { %14233 = vmatprep.mubr.f32.mxu0 %v2789_v17  ;;  %14232 = vmatpush3.msra.mxu0 %v15784_v43  ;;  %v3308_v43 = vsub.f32 %v3306_v60, %v3307_v41  ;;  %v3803_v0 = vsub.f32 %v15831_v38, %v3802_v40 }
 0x5f4   :  { %14243 = vmatprep.subr.mxu0 %v15781_v42  ;;  %14264 = vmatprep.mubr.msk.f32.mxu1 %vm15258_vm1, %v15257_v19 }
 0x5f5   :  { %14272 = vmatprep.subr.mxu1 %v15257_v19  ;;  %14234 = vmatmul.mubr.f32.vlgmr.msra.gmra.mxu0 %v2799_v47 }
 0x5f6   :  { %14244 = vmatpush3.msra.mxu0 %v15781_v42  ;;  %14265 = vmatmul.mubr.f32.vlgmr.msra.gmra.mxu1 %v15818_v53  ;;  %v3309_v42 = vand.u32 4294901760, %v3308_v43 }
 0x5f7   :  { %14273 = vmatpush3.xpose.msra.mxu1 %v15803_v25  ;;  %14245 = vmatprep.subr.mxu0 %v15791_v45 }
 0x5f8   :  { %14247 = vmatprep.mubr.f32.mxu0 %v15798_v13  ;;  %14246 = vmatpush3.msra.mxu0 %v15791_v45  ;;  %v3804_v45 = vand.u32 4294901760, %v3803_v0 }
 0x5f9   :  { %14257 = vmatprep.subr.mxu0 %v15257_v19  ;;  %14274 = vmatprep.mubr.msk.f32.mxu1 %vm15258_vm1, %v15257_v19 }
 0x5fa   :  { %14282 = vmatprep.subr.mxu1 %v15257_v19  ;;  %14248 = vmatmul.mubr.f32.vlgmr.msra.gmra.mxu0 %v2798_v39 }
 0x5fb   :  { %14258 = vmatpush3.xpose.msra.mxu0 %v15803_v25  ;;  %14275 = vmatmul.mubr.f32.vlgmr.msra.gmra.mxu1 %v3307_v41 }
 0x5fc   :  { %14283 = vmatpush3.xpose.msra.mxu1 %v15803_v25  ;;  %14259 = vmatprep.mubr.msk.f32.mxu0 %vm15258_vm1, %v15257_v19 }
 0x5fd   :  { %14267 = vmatprep.subr.mxu0 %v15257_v19  ;;  %14284 = vmatprep.mubr.msk.f32.mxu1 %vm15258_vm1, %v15257_v19 }
 0x5fe   :  { %14292 = vmatprep.subr.mxu1 %v15257_v19  ;;  %14260 = vmatmul.mubr.f32.vlgmr.msra.gmra.mxu0 %v3309_v42 }
 0x5ff   :  { %14268 = vmatpush3.xpose.msra.mxu0 %v15806_v35  ;;  %14285 = vmatmul.mubr.f32.vlgmr.msra.gmra.mxu1 %v15818_v53 }
 0x600   :  { %14293 = vmatpush3.xpose.msra.mxu1 %v3804_v45  ;;  %14269 = vmatprep.mubr.msk.f32.mxu0 %vm15258_vm1, %v15257_v19 }
 0x601   :  { %14277 = vmatprep.subr.mxu0 %v15257_v19  ;;  %14294 = vmatprep.mubr.msk.f32.mxu1 %vm15258_vm1, %v15257_v19 }
 0x602   :  { %14302 = vmatprep.subr.mxu1 %v15257_v19  ;;  %14270 = vmatmul.mubr.f32.vlgmr.msra.gmra.mxu0 %v3306_v60 }
 0x603   :  { %14278 = vmatpush3.xpose.msra.mxu0 %v3348_v46  ;;  %14295 = vmatmul.mubr.f32.vlgmr.msra.gmra.mxu1 %v3759_v63 }
 0x604   :  { %14303 = vmatpush3.xpose.msra.mxu1 %v15823_v56  ;;  %14279 = vmatprep.mubr.msk.f32.mxu0 %vm15258_vm1, %v15257_v19 }
 0x605   :  { %14287 = vmatprep.subr.mxu0 %v15257_v19  ;;  %14304 = vmatprep.mubr.msk.f32.mxu1 %vm15258_vm1, %v15257_v19 }
 0x606   :  { %14312 = vmatprep.subr.mxu1 %v15257_v19  ;;  %14280 = vmatmul.mubr.f32.vlgmr.msra.gmra.mxu0 %v15818_v53 }
 0x607   :  { %14288 = vmatpush3.xpose.msra.mxu0 %v15823_v56  ;;  %14305 = vmatmul.mubr.f32.vlgmr.msra.gmra.mxu1 %v3761_v2 }
 0x608   :  { %14313 = vmatpush3.xpose.msra.mxu1 %v15823_v56  ;;  %14289 = vmatprep.mubr.msk.f32.mxu0 %vm15258_vm1, %v15257_v19 }
 0x609   :  { %14297 = vmatprep.subr.mxu0 %v15257_v19  ;;  %14314 = vmatprep.mubr.msk.f32.mxu1 %vm15258_vm1, %v15257_v19 }
 0x60a   :  { %14290 = vmatmul.mubr.f32.vlgmr.msra.gmra.mxu0 %v3763_v4  ;;  %14322 = vmatprep.subr.mxu1 %v15257_v19 }
 0x60b   :  { %14298 = vmatpush3.xpose.msra.mxu0 %v15831_v38  ;;  %14315 = vmatmul.mubr.f32.vlgmr.msra.gmra.mxu1 %v3759_v63 }
 0x60c   :  { %14299 = vmatprep.mubr.msk.f32.mxu0 %vm15258_vm1, %v15257_v19  ;;  %14307 = vmatprep.subr.mxu0 %v15257_v19 }
 0x60d   :  { %14324 = vmatprep.mubr.msk.f32.mxu1 %vm15258_vm1, %v15257_v19 }
 0x60e   :  { %14300 = vmatmul.mubr.f32.vlgmr.msra.gmra.mxu0 %v3760_v1 }
 0x60f   :  { %14308 = vmatpush3.xpose.msra.mxu0 %v3802_v40  ;;  %14309 = vmatprep.mubr.msk.f32.mxu0 %vm15258_vm1, %v15257_v19 }
 0x610   :  { %14317 = vmatprep.subr.mxu0 %v15257_v19 }
 0x612   :  { %14310 = vmatmul.mubr.f32.vlgmr.msra.gmra.mxu0 %v3759_v63 }
 0x613   :  { %14319 = vmatprep.mubr.msk.f32.mxu0 %vm15258_vm1, %v15257_v19 }
 0x6a8   :  { %v14228_v5 = vpop.f32.mrf.mxu1 }
 0x6aa   :  { %v15897_v6 = vpop.f32.mrf.mxu1 }
 0x6ac   :  { %v14242_v7 = vpop.f32.mrf.mxu1 }
 0x6ae   :  { %v15899_v8 = vpop.f32.mrf.mxu1 }
 0x6b0   :  { %v14221_v9 = vpop.f32.mrf.mxu0 }
 0x6b1   :  { %v2892_v10 = vadd.f32 %v14228_v5, %v14221_v9  ;;  %v14256_v11 = vpop.f32.mrf.mxu1 }
 0x6b2   :  { %v15901_v12 = vpop.f32.mrf.mxu0 }
 0x6b3   :  { %v15903_v13 = vpop.f32.mrf.mxu1 }
 0x6b5   :  { %v14235_v14 = vpop.f32.mrf.mxu0 }
 0x6b6   :  { %v2975_v15 = vadd.f32 %v14235_v14, %v2892_v10  ;;  %v3387_v16 = vpop.f32.mrf.mxu1 }
 0x6b7   :  { %v15905_v17 = vpop.f32.mrf.mxu0 }
 0x6b8   :  { %v14266_v18 = vpop.f32.mrf.mxu1  ;;  %v3058_v20 = vadd.f32 %v14242_v7, %v2975_v15 }
 0x6ba   :  { %v14249_v21 = vpop.f32.mrf.mxu0 }
 0x6bb   :  { %v3141_v22 = vadd.f32 %v14249_v21, %v3058_v20  ;;  %v3535_v23 = vpop.f32.mrf.mxu1 }
 0x6bc   :  { %v15907_v24 = vpop.f32.mrf.mxu0 }
 0x6bd   :  { %v15909_v25 = vadd.f32 %v14256_v11, %v3141_v22  ;;  %v14276_v26 = vpop.f32.mrf.mxu1 }
 0x6be   :  { %v3311_v27 = vpop.f32.mrf.mxu0 }
 0x6bf   :  { %v3681_v30 = vpop.f32.mrf.mxu1  ;;  %v3388_v33 = vadd.f32 %v3387_v16, %v3311_v27 }
 0x6c0   :  { %v14261_v32 = vpop.f32.mrf.mxu0 }
 0x6c1   :  { %v14286_v34 = vpop.f32.mrf.mxu1 }
 0x6c2   :  { %v3461_v35 = vpop.f32.mrf.mxu0 }
 0x6c3   :  { %v3462_v36 = vadd.f32 %v3461_v35, %v3388_v33  ;;  %v3841_v37 = vpop.f32.mrf.mxu1 }
 0x6c4   :  { %v14271_v39 = vpop.f32.mrf.mxu0 }
 0x6c5   :  { %v14296_v44 = vpop.f32.mrf.mxu1  ;;  %v3536_v46 = vadd.f32 %v3535_v23, %v3462_v36 }
 0x6c6   :  { %v3609_v47 = vpop.f32.mrf.mxu0 }
 0x6c7   :  { %v3610_v48 = vadd.f32 %v3609_v47, %v3536_v46  ;;  %v3989_v49 = vpop.f32.mrf.mxu1 }
 0x6c8   :  { %v14281_v51 = vpop.f32.mrf.mxu0 }
 0x6c9   :  { %v3682_v52 = vadd.f32 %v3681_v30, %v3610_v48  ;;  %v14306_v53 = vpop.f32.mrf.mxu1 }
 0x6ca   :  { %v3765_v54 = vpop.f32.mrf.mxu0 }
 0x6cb   :  { %v4139_v56 = vmul.f32 0.25, %v3682_v52  ;;  %v4135_v57 = vpop.f32.mrf.mxu1  ;;  %v3842_v60 = vadd.f32 %v3841_v37, %v3765_v54 }
 0x6cc   :  { %v14291_v58 = vpop.f32.mrf.mxu0 }
 0x6cd   :  { %v14316_v38 = vpop.f32.mrf.mxu1  ;;  %v4141_v61 = vadd.f32 %v4139_v56, %v15703_v29 }
 0x6ce   :  { %v3915_v41 = vpop.f32.mrf.mxu0 }
 0x6cf   :  { %v3916_v62 = vadd.f32 %v3915_v41, %v3842_v60  ;;  %v4143_v40 = vsel %vm1784_vm3, %v4141_v61, -inf  ;;  %v5073_v41 = vld [vmem:[%s17152_s7 + $0x18] sm:$0xff] }
 0x6d0   :  { %4144 = vmax.xlane.f32.xlu0 %v4143_v40  ;;  %v14301_v43 = vpop.f32.mrf.mxu0  ;;  %v5072_v40 = vld [vmem:[%s17152_s7 + $0x10] sm:$0xff] }
 0x6d1   :  { %v3990_v63 = vadd.f32 %v3989_v49, %v3916_v62  ;;  %v15964_v62 = vand.u32 4294901760, %v5073_v41 }
 0x6d2   :  { %v4063_v0 = vpop.f32.mrf.mxu0 }
 0x6d3   :  { %v4064_v42 = vadd.f32 %v4063_v0, %v3990_v63  ;;  %v15970_v43 = vsub.f32 %v5073_v41, %v15964_v62  ;;  %v15972_v63 = vand.u32 4294901760, %v5072_v40 }
 0x6d4   :  { %v14311_v1 = vpop.f32.mrf.mxu0 }
 0x6d5   :  { %v4136_v45 = vadd.f32 %v4135_v57, %v4064_v42  ;;  %v15977_v0 = vand.u32 4294901760, %v15970_v43  ;;  %v15980_v42 = vsub.f32 %v5072_v40, %v15972_v63 }
 0x6d7   :  { %v4140_v2 = vmul.f32 0.25, %v4136_v45  ;;  %v5199_v1 = vsub.f32 %v15970_v43, %v15977_v0  ;;  %v15987_v45 = vand.u32 4294901760, %v15980_v42 }
 0x6d9   :  { %v4142_v3 = vadd.f32 %v4140_v2, %v15707_v50  ;;  %v5200_v2 = vand.u32 4294901760, %v5199_v1 }
 0x6db   :  { %v4146_v4 = vsel %vm1784_vm3, %v4142_v3, -inf }
 0x6dc   :  { %4147 = vmax.xlane.f32.xlu1 %v4146_v4 }
 0x6ed   :  { %4620 = vrot.lane.b32.xlu1 %v15650_v28, %s15264_s27 }
 0x759   :  { %v4145_v5 = vpop.xlane.xlu0 %4144 }
 0x75a   :  { %v4149_v7 = vsub.f32 %v4141_v61, %v4145_v5 }
 0x75c   :  { %v4151_v9 = vmul.f32 1.442695, %v4149_v7 }
 0x75e   :  { %15194 = vpow2.f32 %v4151_v9 }
 0x765   :  { %v4148_v10 = vpop.xlane.xlu1 %4147 }
 0x766   :  { %v4150_v11 = vsub.f32 %v4142_v3, %v4148_v10  ;;  %v5206_v3 = vsub.f32 %v15980_v42, %v15987_v45 }
 0x768   :  { %v4153_v14 = vmul.f32 1.442695, %v4150_v11  ;;  %v5207_v4 = vand.u32 4294901760, %v5206_v3 }
 0x769   :  { %v4621_v27 = vpop.permute.xlu1 %4620 }
 0x76a   :  { %15196 = vpow2.f32 %v4153_v14 }
 0x76b   :  { %v15195_v15 = vpop.eup %15194 }
 0x76c   :  { %v4155_v16 = vsel %vm1784_vm3, %v15195_v15, 0.0 }
 0x76d   :  { %4156 = vadd.xlane.f32.xlu0 %v4155_v16 }
 0x777   :  { %v15197_v18 = vpop.eup %15196 }
 0x778   :  { %v4158_v20 = vsel %vm1784_vm3, %v15197_v18, 0.0 }
 0x779   :  { %4159 = vadd.xlane.f32.xlu0 %v4158_v20 }
 0x78f   :  { %4168 = vrot.lane.b32.xlu0 %v15652_v31, %s15264_s27  ;;  %v4657_v31 = vand.u32 4294901760, %v4621_v27 }
 0x791   :  { %v4734_v44 = vsub.f32 %v4621_v27, %v4657_v31 }
 0x793   :  { %v4735_v52 = vand.u32 4294901760, %v4734_v44 }
 0x795   :  { %v4736_v56 = vsub.f32 %v4734_v44, %v4735_v52 }
 0x797   :  { %v4737_v60 = vand.u32 4294901760, %v4736_v56 }
 0x7f6   :  { %v4157_v28 = vpop.xlane.xlu0 %4156 }
 0x7f7   :  { %15198 = vrcp.f32 %v4157_v28 }
 0x802   :  { %v4160_v21 = vpop.xlane.xlu0 %4159 }
 0x803   :  { %15200 = vrcp.f32 %v4160_v21 }
 0x804   :  { %v15199_v22 = vpop.eup %15198 }
 0x805   :  { %v4163_v23 = vmul.f32 %v15199_v22, %v15195_v15 }
 0x806   :  { %v4169_v26 = vpop.permute.xlu0 %4168 }
 0x807   :  { %13425 = vst.msk [vmem:[%s17164_s19 + $0x8] sm:$0xff] %vm1784_vm3, %v4163_v23  ;;  %v4205_v30 = vand.u32 4294901760, %v4169_v26  ;;  %v4172_v32 = vsel %vm1784_vm3, %v4163_v23, 0 }
 0x808   :  { %v4240_v33 = vand.u32 4294901760, %v4172_v32 }
 0x809   :  { %v4282_v34 = vsub.f32 %v4169_v26, %v4205_v30  ;;  %14318 = vmatpush3.msra.mxu0 %v4205_v30 }
 0x80a   :  { %14327 = vmatprep.subr.mxu0 %v15257_v19  ;;  %v4241_v35 = vsub.f32 %v4172_v32, %v4240_v33 }
 0x80b   :  { %v4283_v36 = vand.u32 4294901760, %v4282_v34 }
 0x80c   :  { %v4242_v37 = vand.u32 4294901760, %v4241_v35 }
 0x80d   :  { %v4284_v39 = vsub.f32 %v4282_v34, %v4283_v36 }
 0x80e   :  { %v4243_v46 = vsub.f32 %v4241_v35, %v4242_v37 }
 0x80f   :  { %v4285_v47 = vand.u32 4294901760, %v4284_v39 }
 0x810   :  { %v15201_v48 = vpop.eup %15200  ;;  %v4244_v49 = vand.u32 4294901760, %v4243_v46 }
 0x811   :  { %v4164_v51 = vmul.f32 %v15201_v48, %v15197_v18  ;;  %14323 = vmatpush3.msra.mxu1 %v4285_v47 }
 0x812   :  { %14320 = vmatmul.mubr.f32.vlgmr.msra.gmra.mxu0 %v4244_v49  ;;  %14325 = vmatmul.mubr.f32.vlgmr.msra.gmra.mxu1 %v4240_v33 }
 0x813   :  { %13426 = vst.msk [vmem:[%s17164_s19 + $0x18] sm:$0xff] %vm1784_vm3, %v4164_v51  ;;  %14328 = vmatpush3.msra.mxu0 %v4282_v34  ;;  %14332 = vmatprep.subr.mxu1 %v15257_v19  ;;  %v4624_v53 = vsel %vm1784_vm3, %v4164_v51, 0 }
 0x814   :  { %14333 = vmatpush3.msra.mxu1 %v4205_v30  ;;  %14329 = vmatprep.mubr.msk.f32.mxu0 %vm15258_vm1, %v15257_v19  ;;  %v4692_v54 = vand.u32 4294901760, %v4624_v53 }
 0x815   :  { %14334 = vmatprep.mubr.msk.f32.mxu1 %vm15258_vm1, %v15257_v19  ;;  %14337 = vmatprep.subr.mxu0 %v15257_v19 }
 0x816   :  { %14342 = vmatprep.subr.mxu1 %v15257_v19  ;;  %14330 = vmatmul.mubr.f32.vlgmr.msra.gmra.mxu0 %v4241_v35  ;;  %v4693_v57 = vsub.f32 %v4624_v53, %v4692_v54 }
 0x817   :  { %14335 = vmatmul.mubr.f32.vlgmr.msra.gmra.mxu1 %v4242_v37  ;;  %14338 = vmatpush3.msra.mxu0 %v4283_v36 }
 0x818   :  { %14343 = vmatpush3.msra.mxu1 %v4205_v30  ;;  %14339 = vmatprep.mubr.msk.f32.mxu0 %vm15258_vm1, %v15257_v19  ;;  %v4694_v58 = vand.u32 4294901760, %v4693_v57 }
 0x819   :  { %14344 = vmatprep.mubr.msk.f32.mxu1 %vm15258_vm1, %v15257_v19  ;;  %14347 = vmatprep.subr.mxu0 %v15257_v19 }
 0x81a   :  { %14352 = vmatprep.subr.mxu1 %v15257_v19  ;;  %14340 = vmatmul.mubr.f32.vlgmr.msra.gmra.mxu0 %v4240_v33  ;;  %v4695_v38 = vsub.f32 %v4693_v57, %v4694_v58 }
 0x81b   :  { %14345 = vmatmul.mubr.f32.vlgmr.msra.gmra.mxu1 %v4240_v33  ;;  %14348 = vmatpush3.msra.mxu0 %v4657_v31 }
 0x81c   :  { %14353 = vmatpush3.msra.mxu1 %v4737_v60  ;;  %14349 = vmatprep.mubr.msk.f32.mxu0 %vm15258_vm1, %v15257_v19  ;;  %v4696_v61 = vand.u32 4294901760, %v4695_v38 }
 0x81d   :  { %14354 = vmatprep.mubr.msk.f32.mxu1 %vm15258_vm1, %v15257_v19  ;;  %14357 = vmatprep.subr.mxu0 %v15257_v19 }
 0x81e   :  { %14362 = vmatprep.subr.mxu1 %v15257_v19  ;;  %14350 = vmatmul.mubr.f32.vlgmr.msra.gmra.mxu0 %v4696_v61 }
 0x81f   :  { %14355 = vmatmul.mubr.f32.vlgmr.msra.gmra.mxu1 %v4692_v54  ;;  %14358 = vmatpush3.msra.mxu0 %v4734_v44 }
 0x820   :  { %14363 = vmatpush3.msra.mxu1 %v4657_v31  ;;  %14359 = vmatprep.mubr.msk.f32.mxu0 %vm15258_vm1, %v15257_v19 }
 0x821   :  { %14364 = vmatprep.mubr.msk.f32.mxu1 %vm15258_vm1, %v15257_v19  ;;  %14367 = vmatprep.subr.mxu0 %v15257_v19 }
 0x822   :  { %14372 = vmatprep.subr.mxu1 %v15257_v19  ;;  %14360 = vmatmul.mubr.f32.vlgmr.msra.gmra.mxu0 %v4693_v57 }
 0x823   :  { %14365 = vmatmul.mubr.f32.vlgmr.msra.gmra.mxu1 %v4694_v58  ;;  %14368 = vmatpush3.msra.mxu0 %v4735_v52 }
 0x824   :  { %14373 = vmatpush3.msra.mxu1 %v4657_v31  ;;  %14369 = vmatprep.mubr.msk.f32.mxu0 %vm15258_vm1, %v15257_v19 }
 0x825   :  { %14374 = vmatprep.mubr.msk.f32.mxu1 %vm15258_vm1, %v15257_v19  ;;  %14377 = vmatprep.subr.mxu0 %v15964_v62 }
 0x826   :  { %14370 = vmatmul.mubr.f32.vlgmr.msra.gmra.mxu0 %v4692_v54  ;;  %14384 = vmatprep.subr.mxu1 %v5200_v2 }
 0x827   :  { %14375 = vmatmul.mubr.f32.vlgmr.msra.gmra.mxu1 %v4692_v54  ;;  %14378 = vmatpush3.msra.mxu0 %v15964_v62 }
 0x828   :  { %14379 = vmatprep.subr.mxu0 %v15972_v63  ;;  %14385 = vmatpush3.msra.mxu1 %v5200_v2 }
 0x829   :  { %14380 = vmatpush3.msra.mxu0 %v15972_v63  ;;  %14386 = vmatprep.subr.mxu1 %v5207_v4 }
 0x82a   :  { %14391 = vmatprep.subr.mxu0 %v15970_v43  ;;  %14387 = vmatpush3.msra.mxu1 %v5207_v4 }
 0x82b   :  { %14398 = vmatprep.subr.mxu1 %v15964_v62 }
 0x8d2   :  { %v4246_v5 = vpop.f32.mrf.mxu0  ;;  %v4322_v7 = vpop.f32.mrf.mxu1 }
 0x8d3   :  { %v4323_v11 = vadd.f32 %v4322_v7, %v4246_v5 }
 0x8d4   :  { %v14321_v9 = vpop.f32.mrf.mxu0  ;;  %v14326_v10 = vpop.f32.mrf.mxu1 }
 0x8d6   :  { %v4396_v14 = vpop.f32.mrf.mxu0 }
 0x8d7   :  { %v4397_v15 = vadd.f32 %v4396_v14, %v4323_v11  ;;  %v4470_v16 = vpop.f32.mrf.mxu1 }
 0x8d8   :  { %v14331_v18 = vpop.f32.mrf.mxu0 }
 0x8d9   :  { %v4471_v20 = vadd.f32 %v4470_v16, %v4397_v15  ;;  %v14336_v28 = vpop.f32.mrf.mxu1 }
 0x8da   :  { %v4544_v21 = vpop.f32.mrf.mxu0 }
 0x8db   :  { %v4545_v22 = vadd.f32 %v4544_v21, %v4471_v20  ;;  %v4616_v23 = vpop.f32.mrf.mxu1 }
 0x8dc   :  { %v14341_v26 = vpop.f32.mrf.mxu0 }
 0x8dd   :  { %v4617_v27 = vadd.f32 %v4616_v23, %v4545_v22  ;;  %v14346_v30 = vpop.f32.mrf.mxu1 }
 0x8de   :  { %v4698_v32 = vpop.f32.mrf.mxu0 }
 0x8df   :  { %v5075_v33 = vsel %vm866_vm2, %v4617_v27, 0  ;;  %v4774_v34 = vpop.f32.mrf.mxu1 }
 0x8e0   :  { %v5147_v31 = vand.u32 4294901760, %v5075_v33  ;;  %v14351_v35 = vpop.f32.mrf.mxu0  ;;  %v4775_v36 = vadd.f32 %v4774_v34, %v4698_v32 }
 0x8e1   :  { %v14356_v37 = vpop.f32.mrf.mxu1 }
 0x8e2   :  { %v5148_v39 = vsub.f32 %v5075_v33, %v5147_v31  ;;  %v4848_v44 = vpop.f32.mrf.mxu0  ;;  %14388 = vmatprep.mubr.f32.mxu1 %v5147_v31 }
 0x8e3   :  { %v4849_v46 = vadd.f32 %v4848_v44, %v4775_v36  ;;  %v4922_v47 = vpop.f32.mrf.mxu1 }
 0x8e4   :  { %v14361_v48 = vpop.f32.mrf.mxu0  ;;  %v5149_v49 = vand.u32 4294901760, %v5148_v39 }
 0x8e5   :  { %v4923_v51 = vadd.f32 %v4922_v47, %v4849_v46  ;;  %v14366_v52 = vpop.f32.mrf.mxu1 }
 0x8e6   :  { %v4996_v53 = vpop.f32.mrf.mxu0  ;;  %v5150_v54 = vsub.f32 %v5148_v39, %v5149_v49 }
 0x8e7   :  { %v4997_v56 = vadd.f32 %v4996_v53, %v4923_v51  ;;  %v5068_v57 = vpop.f32.mrf.mxu1  ;;  %v5632_v53 = vld [vmem:[%s17156_s11 + $0x10] sm:$0xff] }
 0x8e8   :  { %v14371_v58 = vpop.f32.mrf.mxu0  ;;  %v5151_v60 = vand.u32 4294901760, %v5150_v54  ;;  %v5631_v54 = vld [vmem:[%s17156_s11 + $0x8] sm:$0xff] }
 0x8e9   :  { %v5069_v38 = vadd.f32 %v5068_v57, %v4997_v56  ;;  %v14376_v61 = vpop.f32.mrf.mxu1  ;;  %v16036_v57 = vand.u32 4294901760, %v5632_v53  ;;  %v16038_v58 = vand.u32 4294901760, %v5631_v54 }
 0x8ea   :  { %14381 = vmatprep.mubr.f32.mxu0 %v5151_v60  ;;  %v5630_v60 = vld [vmem:[%s17156_s11] sm:$0xff] }
 0x8eb   :  { %v5078_v41 = vsel %vm866_vm2, %v5069_v38, 0  ;;  %v16043_v38 = vand.u32 4294901760, %v5630_v60 }
 0x8ec   :  { %v5157_v40 = vand.u32 4294901760, %v5078_v41 }
 0x8ee   :  { %v5158_v1 = vsub.f32 %v5078_v41, %v5157_v40  ;;  %14389 = vmatmul.mubr.f32.vlgmr.msra.gmra.mxu1 %v5157_v40  ;;  %v16049_v41 = vsub.f32 %v5632_v53, %v16036_v57 }
 0x8ef   :  { %14399 = vmatpush3.msra.mxu1 %v15964_v62  ;;  %14402 = vmatprep.mubr.f32.mxu1 %v5149_v49 }
 0x8f0   :  { %14400 = vmatprep.subr.mxu1 %v15972_v63  ;;  %v5159_v2 = vand.u32 4294901760, %v5158_v1 }
 0x8f1   :  { %14401 = vmatpush3.msra.mxu1 %v15972_v63 }
 0x8f2   :  { %14403 = vmatmul.mubr.f32.vlgmr.msra.gmra.mxu1 %v5159_v2  ;;  %14412 = vmatprep.subr.mxu1 %v15964_v62  ;;  %v5160_v3 = vsub.f32 %v5158_v1, %v5159_v2 }
 0x8f3   :  { %14413 = vmatpush3.msra.mxu1 %v15964_v62  ;;  %14416 = vmatprep.mubr.f32.mxu1 %v5147_v31 }
 0x8f4   :  { %14414 = vmatprep.subr.mxu1 %v15972_v63  ;;  %v5161_v4 = vand.u32 4294901760, %v5160_v3  ;;  %v16063_v3 = vand.u32 4294901760, %v16049_v41 }
 0x8f5   :  { %14415 = vmatpush3.msra.mxu1 %v15972_v63 }
 0x8f6   :  { %14382 = vmatmul.mubr.f32.vlgmr.msra.gmra.mxu0 %v5161_v4  ;;  %14417 = vmatmul.mubr.f32.vlgmr.msra.gmra.mxu1 %v5157_v40 }
 0x8f7   :  { %14392 = vmatpush3.msra.mxu0 %v15970_v43  ;;  %14395 = vmatprep.mubr.f32.mxu0 %v5148_v39  ;;  %v2886_v43 = vadd.f32 %v15897_v6, %v15901_v12  ;;  %v13424_v6 = vld [vmem:[%s17153_s8] ss:$0 sm:$0xff] }
 0x8f8   :  { %14393 = vmatprep.subr.mxu0 %v15980_v42  ;;  %v3230_v26 = vadd.f32 %v13424_v6, %v15909_v25 }
 0x8f9   :  { %14394 = vmatpush3.msra.mxu0 %v15980_v42  ;;  %v2968_v5 = vadd.f32 %v15905_v17, %v2886_v43 }
 0x8fa   :  { %14396 = vmatmul.mubr.f32.vlgmr.msra.gmra.mxu0 %v5158_v1  ;;  %14405 = vmatprep.subr.mxu0 %v15977_v0  ;;  %v16056_v1 = vsub.f32 %v5630_v60, %v16043_v38 }
 0x8fb   :  { %14406 = vmatpush3.msra.mxu0 %v15977_v0  ;;  %14409 = vmatprep.mubr.f32.mxu0 %v5147_v31  ;;  %v3050_v9 = vadd.f32 %v15899_v8, %v2968_v5 }
 0x8fc   :  { %14407 = vmatprep.subr.mxu0 %v15987_v45 }
 0x8fd   :  { %14408 = vmatpush3.msra.mxu0 %v15987_v45  ;;  %v3135_v15 = vadd.f32 %v15907_v24, %v3050_v9 }
 0x8fe   :  { %14410 = vmatmul.mubr.f32.vlgmr.msra.gmra.mxu0 %v5157_v40  ;;  %v16052_v40 = vsub.f32 %v5631_v54, %v16038_v58 }
 0x8ff   :  { %v3214_v21 = vadd.f32 %v15903_v13, %v3135_v15 }
 0x900   :  { %v16066_v4 = vand.u32 4294901760, %v16052_v40 }
 0x901   :  { %v3229_v32 = vadd.f32 %v13424_v6, %v3214_v21 }
 0x902   :  { %v5778_v5 = vsub.f32 %v16052_v40, %v16066_v4 }
 0x9ae   :  { %v14390_v62 = vpop.f32.mrf.mxu1 }
 0x9b0   :  { %v5244_v63 = vpop.f32.mrf.mxu1 }
 0x9b2   :  { %v14404_v7 = vpop.f32.mrf.mxu1 }
 0x9b4   :  { %v5408_v0 = vpop.f32.mrf.mxu1 }
 0x9b6   :  { %v14383_v42 = vpop.f32.mrf.mxu0  ;;  %v14418_v12 = vpop.f32.mrf.mxu1 }
 0x9b7   :  { %v5251_v11 = vadd.f32 %v14390_v62, %v14383_v42  ;;  %v16070_v62 = vand.u32 4294901760, %v16056_v1 }
 0x9b8   :  { %v5153_v10 = vpop.f32.mrf.mxu0  ;;  %v5572_v30 = vpop.f32.mrf.mxu1 }
 0x9b9   :  { %v5245_v16 = vadd.f32 %v5244_v63, %v5153_v10  ;;  %v5771_v63 = vsub.f32 %v16049_v41, %v16063_v3  ;;  %v5785_v9 = vsub.f32 %v16056_v1, %v16070_v62  ;;  %v5779_v10 = vand.u32 4294901760, %v5778_v5 }
 0x9ba   :  { %v14397_v14 = vpop.f32.mrf.mxu0 }
 0x9bb   :  { %v5334_v45 = vadd.f32 %v14397_v14, %v5251_v11  ;;  %v5772_v42 = vand.u32 4294901760, %v5771_v63  ;;  %v5786_v11 = vand.u32 4294901760, %v5785_v9  ;;  %v6186_v63 = vld [vmem:[%s17158_s13 + $0x8] sm:$0xff] }
 0x9bc   :  { %v5326_v18 = vpop.f32.mrf.mxu0  ;;  %v16211_v9 = vand.u32 4294901760, %v6186_v63 }
 0x9bd   :  { %v5327_v20 = vadd.f32 %v5326_v18, %v5245_v16  ;;  %v5417_v28 = vadd.f32 %v14404_v7, %v5334_v45 }
 0x9be   :  { %v14411_v17 = vpop.f32.mrf.mxu0 }
 0x9bf   :  { %v5500_v8 = vadd.f32 %v14411_v17, %v5417_v28  ;;  %v5409_v22 = vadd.f32 %v5408_v0, %v5327_v20  ;;  %v13427_v28 = vld [vmem:[%s17154_s9] ss:$0 sm:$0xff] }
 0x9c0   :  { %v5493_v23 = vpop.f32.mrf.mxu0  ;;  %v13428_v17 = vld [vmem:[%s17155_s10] ss:$0 sm:$0xff] }
 0x9c1   :  { %v5579_v27 = vadd.f32 %v14418_v12, %v5500_v8  ;;  %v5494_v24 = vadd.f32 %v5493_v23, %v5409_v22 }
 0x9c3   :  { %v5573_v33 = vadd.f32 %v5572_v30, %v5494_v24  ;;  %v5583_v34 = vadd.f32 %v5579_v27, %v3230_v26 }
 0x9c5   :  { %v5585_v31 = vadd.f32 %v5583_v34, %v15602_v59  ;;  %v5582_v35 = vadd.f32 %v5573_v33, %v3229_v32 }
 0x9c7   :  { %v5591_v36 = vsel %vm245_vm0, %v5585_v31, 0.0  ;;  %v5584_v37 = vadd.f32 %v5582_v35, %v15593_v55  ;;  %v5633_v55 = vld [vmem:[%s17156_s11 + $0x18] sm:$0xff] }
 0x9c8   :  { %5592 = vadd.xlane.f32.xlu0 %v5591_v36  ;;  %v16034_v56 = vand.u32 4294901760, %v5633_v55 }
 0x9c9   :  { %v5588_v13 = vsel %vm245_vm0, %v5584_v37, 0.0 }
 0x9ca   :  { %5589 = vadd.xlane.f32.xlu1 %v5588_v13  ;;  %v16046_v61 = vsub.f32 %v5633_v55, %v16034_v56  ;;  %14419 = vmatprep.subr.mxu0 %v16034_v56  ;;  %v6189_v55 = vld [vmem:[%s17158_s13 + $0x20] sm:$0xff] }
 0x9cb   :  { %14420 = vmatpush3.msra.mxu0 %v16034_v56 }
 0x9cc   :  { %v16060_v2 = vand.u32 4294901760, %v16046_v61  ;;  %14421 = vmatprep.subr.mxu0 %v16036_v57 }
 0x9cd   :  { %14422 = vmatpush3.msra.mxu0 %v16036_v57 }
 0x9ce   :  { %v5764_v43 = vsub.f32 %v16046_v61, %v16060_v2  ;;  %14423 = vmatprep.subr.mxu0 %v16038_v58 }
 0x9cf   :  { %14424 = vmatpush3.msra.mxu0 %v16038_v58 }
 0x9d0   :  { %v5765_v7 = vand.u32 4294901760, %v5764_v43  ;;  %14425 = vmatprep.subr.mxu0 %v16043_v38 }
 0x9d1   :  { %14426 = vmatpush3.msra.mxu0 %v16043_v38 }
 0x9d2   :  { %14430 = vmatprep.subr.mxu1 %v5765_v7  ;;  %14441 = vmatprep.subr.mxu0 %v16046_v61 }
 0x9d3   :  { %14431 = vmatpush3.msra.mxu1 %v5765_v7 }
 0x9d4   :  { %14432 = vmatprep.subr.mxu1 %v5772_v42 }
 0x9d5   :  { %14433 = vmatpush3.msra.mxu1 %v5772_v42 }
 0x9d6   :  { %14434 = vmatprep.subr.mxu1 %v5779_v10 }
 0x9d7   :  { %14435 = vmatpush3.msra.mxu1 %v5779_v10 }
 0x9d8   :  { %14436 = vmatprep.subr.mxu1 %v5786_v11 }
 0x9d9   :  { %14437 = vmatpush3.msra.mxu1 %v5786_v11  ;;  %v6185_v11 = vld [vmem:[%s17158_s13] sm:$0xff] }
 0x9da   :  { %14452 = vmatprep.subr.mxu1 %v16034_v56 }
 0xa51   :  { %v5593_v39 = vpop.xlane.xlu0 %5592 }
 0xa52   :  { %v5595_v44 = vmul.f32 0.03125, %v5593_v39 }
 0xa53   :  { %v5590_v25 = vpop.xlane.xlu1 %5589 }
 0xa54   :  { %v5597_v46 = vsub.f32 %v5585_v31, %v5595_v44  ;;  %v5594_v47 = vmul.f32 0.03125, %v5590_v25  ;;  %v6192_v44 = vld [vmem:[%s17158_s13 + $0x38] sm:$0xff] }
 0xa55   :  { %v16134_v25 = vand.u32 4294901760, %v6192_v44 }
 0xa56   :  { %v5596_v48 = vsub.f32 %v5584_v37, %v5594_v47  ;;  %v5599_v49 = vmul.f32 %v5597_v46, %v5597_v46 }
 0xa57   :  { %v16140_v47 = vsub.f32 %v6192_v44, %v16134_v25 }
 0xa58   :  { %v5603_v51 = vsel %vm245_vm0, %v5599_v49, 0.0  ;;  %v5598_v52 = vmul.f32 %v5596_v48, %v5596_v48  ;;  %v6190_v49 = vld [vmem:[%s17158_s13 + $0x28] sm:$0xff] }
 0xa59   :  { %5604 = vadd.xlane.f32.xlu1 %v5603_v51  ;;  %v16150_v51 = vand.u32 4294901760, %v16140_v47 }
 0xa5a   :  { %v5600_v59 = vsel %vm245_vm0, %v5598_v52, 0.0 }
 0xa5b   :  { %5601 = vadd.xlane.f32.xlu0 %v5600_v59  ;;  %v16155_v59 = vand.u32 4294901760, %v6190_v49  ;;  %v6320_v53 = vsub.f32 %v16140_v47, %v16150_v51 }
 0xa5d   :  { %v6321_v60 = vand.u32 4294901760, %v6320_v53 }
 0xae2   :  { %v5605_v0 = vpop.xlane.xlu1 %5604 }
 0xae3   :  { %v5607_v14 = vmul.f32 0.03125, %v5605_v0 }
 0xae4   :  { %v5602_v15 = vpop.xlane.xlu0 %5601 }
 0xae5   :  { %v5609_v16 = vadd.f32 1e-12, %v5607_v14  ;;  %v5606_v45 = vmul.f32 0.03125, %v5602_v15  ;;  %v16225_v15 = vsub.f32 %v6186_v63, %v16211_v9 }
 0xae7   :  { %15202 = vrsqrt.f32 %v5609_v16  ;;  %v5608_v18 = vadd.f32 1e-12, %v5606_v45  ;;  %v16227_v16 = vand.u32 4294901760, %v6185_v11 }
 0xae9   :  { %15204 = vrsqrt.f32 %v5608_v18 }
 0xaf4   :  { %v15203_v20 = vpop.eup %15202 }
 0xaf5   :  { %v5613_v6 = vmul.f32 %v15203_v20, %v5597_v46  ;;  %v6191_v46 = vld [vmem:[%s17158_s13 + $0x30] sm:$0xff]  ;;  %v16236_v20 = vand.u32 4294901760, %v16225_v15 }
 0xaf6   :  { %v15205_v12 = vpop.eup %15204 }
 0xaf7   :  { %v5612_v21 = vmul.f32 %v15205_v12, %v5596_v48  ;;  %v5621_v8 = vmul.f32 %v13427_v28, %v5613_v6  ;;  %v16142_v48 = vand.u32 4294901760, %v6191_v46 }
 0xaf9   :  { %v5620_v22 = vmul.f32 %v13427_v28, %v5612_v21  ;;  %v16093_v23 = vadd.f32 %v13428_v17, %v5621_v8  ;;  %v16153_v52 = vsub.f32 %v6191_v46, %v16142_v48  ;;  %v16239_v28 = vsub.f32 %v6185_v11, %v16227_v16 }
 0xafb   :  { %v16095_v26 = vadd.f32 %v13428_v17, %v5620_v22  ;;  %v5645_v27 = vsel %vm245_vm0, %v16093_v23, 0  ;;  %v16165_v54 = vand.u32 4294901760, %v16153_v52  ;;  %v6362_v17 = vsub.f32 %v16225_v15, %v16236_v20 }
 0xafc   :  { %v5726_v24 = vand.u32 4294901760, %v5645_v27  ;;  %v16246_v21 = vand.u32 4294901760, %v16239_v28 }
 0xafd   :  { %v5642_v30 = vsel %vm245_vm0, %v16095_v26, 0  ;;  %v6363_v8 = vand.u32 4294901760, %v6362_v17 }
 0xafe   :  { %v5716_v32 = vand.u32 4294901760, %v5642_v30  ;;  %v5727_v33 = vsub.f32 %v5645_v27, %v5726_v24  ;;  %v6369_v22 = vsub.f32 %v16239_v28, %v16246_v21 }
 0xb00   :  { %14438 = vmatprep.mubr.f32.mxu1 %v5716_v32  ;;  %v5717_v34 = vsub.f32 %v5642_v30, %v5716_v32  ;;  %v5728_v31 = vand.u32 4294901760, %v5727_v33  ;;  %v6370_v27 = vand.u32 4294901760, %v6369_v22  ;;  %v13429_v30 = vld [vmem:[%s17157_s12] ss:$0 sm:$0xff] }
 0xb01   :  { %14439 = vmatmul.mubr.f32.vlgmr.msra.gmra.mxu1 %v5726_v24 }
 0xb02   :  { %14453 = vmatpush3.msra.mxu1 %v16034_v56  ;;  %v5718_v35 = vand.u32 4294901760, %v5717_v34  ;;  %v5729_v37 = vsub.f32 %v5727_v33, %v5728_v31 }
 0xb03   :  { %14454 = vmatprep.subr.mxu1 %v16036_v57 }
 0xb04   :  { %14455 = vmatpush3.msra.mxu1 %v16036_v57  ;;  %14460 = vmatprep.mubr.f32.mxu1 %v5718_v35  ;;  %v5719_v36 = vsub.f32 %v5717_v34, %v5718_v35  ;;  %v5730_v39 = vand.u32 4294901760, %v5729_v37 }
 0xb05   :  { %14456 = vmatprep.subr.mxu1 %v16038_v58 }
 0xb06   :  { %14457 = vmatpush3.msra.mxu1 %v16038_v58  ;;  %v5720_v13 = vand.u32 4294901760, %v5719_v36 }
 0xb07   :  { %14458 = vmatprep.subr.mxu1 %v16043_v38 }
 0xb08   :  { %14459 = vmatpush3.msra.mxu1 %v16043_v38  ;;  %14427 = vmatprep.mubr.f32.mxu0 %v5720_v13 }
 0xb09   :  { %14461 = vmatmul.mubr.f32.vlgmr.msra.gmra.mxu1 %v5728_v31  ;;  %14474 = vmatprep.subr.mxu1 %v16034_v56 }
 0xb0a   :  { %14428 = vmatmul.mubr.f32.vlgmr.msra.gmra.mxu0 %v5730_v39  ;;  %14475 = vmatpush3.msra.mxu1 %v16034_v56  ;;  %v16168_v56 = vsub.f32 %v6190_v49, %v16155_v59 }
 0xb0b   :  { %14442 = vmatpush3.msra.mxu0 %v16046_v61  ;;  %14482 = vmatprep.mubr.f32.mxu1 %v5716_v32 }
 0xb0c   :  { %14443 = vmatprep.subr.mxu0 %v16049_v41  ;;  %14449 = vmatprep.mubr.f32.mxu0 %v5717_v34  ;;  %v16180_v61 = vand.u32 4294901760, %v16168_v56 }
 0xb0d   :  { %14476 = vmatprep.subr.mxu1 %v16036_v57  ;;  %14444 = vmatpush3.msra.mxu0 %v16049_v41 }
 0xb0e   :  { %14477 = vmatpush3.msra.mxu1 %v16036_v57  ;;  %14445 = vmatprep.subr.mxu0 %v16052_v40  ;;  %v16170_v57 = vand.u32 4294901760, %v6189_v55 }
 0xb0f   :  { %14478 = vmatprep.subr.mxu1 %v16038_v58  ;;  %14446 = vmatpush3.msra.mxu0 %v16052_v40 }
 0xb10   :  { %14479 = vmatpush3.msra.mxu1 %v16038_v58  ;;  %14447 = vmatprep.subr.mxu0 %v16056_v1  ;;  %v6188_v58 = vld [vmem:[%s17158_s13 + $0x18] sm:$0xff]  ;;  %v16183_v41 = vsub.f32 %v6189_v55, %v16170_v57 }
 0xb11   :  { %14480 = vmatprep.subr.mxu1 %v16043_v38  ;;  %14448 = vmatpush3.msra.mxu0 %v16056_v1  ;;  %v16186_v40 = vand.u32 4294901760, %v6188_v58  ;;  %v6187_v1 = vld [vmem:[%s17158_s13 + $0x10] sm:$0xff] }
 0xb12   :  { %14481 = vmatpush3.msra.mxu1 %v16043_v38  ;;  %14450 = vmatmul.mubr.f32.vlgmr.msra.gmra.mxu0 %v5727_v33  ;;  %v6327_v38 = vsub.f32 %v16153_v52, %v16165_v54 }
 0xb13   :  { %14463 = vmatprep.subr.mxu0 %v16060_v2  ;;  %14483 = vmatmul.mubr.f32.vlgmr.msra.gmra.mxu1 %v5726_v24  ;;  %v16200_v43 = vsub.f32 %v6188_v58, %v16186_v40 }
 0xb14   :  { %14464 = vmatpush3.msra.mxu0 %v16060_v2  ;;  %14471 = vmatprep.mubr.f32.mxu0 %v5716_v32  ;;  %v6328_v2 = vand.u32 4294901760, %v6327_v38 }
 0xb15   :  { %14465 = vmatprep.subr.mxu0 %v16063_v3  ;;  %14504 = vmatprep.subr.mxu1 %v6321_v60  ;;  %v16215_v10 = vand.u32 4294901760, %v16200_v43 }
 0xb16   :  { %14466 = vmatpush3.msra.mxu0 %v16063_v3  ;;  %v6334_v3 = vsub.f32 %v16168_v56, %v16180_v61  ;;  %14505 = vmatpush3.msra.mxu1 %v6321_v60 }
 0xb17   :  { %14467 = vmatprep.subr.mxu0 %v16066_v4  ;;  %14506 = vmatprep.subr.mxu1 %v6328_v2  ;;  %v6348_v45 = vsub.f32 %v16200_v43, %v16215_v10 }
 0xb18   :  { %14468 = vmatpush3.msra.mxu0 %v16066_v4  ;;  %v16195_v4 = vand.u32 4294901760, %v16183_v41  ;;  %v6335_v5 = vand.u32 4294901760, %v6334_v3  ;;  %14507 = vmatpush3.msra.mxu1 %v6328_v2 }
 0xb19   :  { %14469 = vmatprep.subr.mxu0 %v16070_v62  ;;  %v6349_v6 = vand.u32 4294901760, %v6348_v45 }
 0xb1a   :  { %14470 = vmatpush3.msra.mxu0 %v16070_v62  ;;  %v16197_v62 = vand.u32 4294901760, %v6187_v1  ;;  %v6341_v7 = vsub.f32 %v16183_v41, %v16195_v4  ;;  %14508 = vmatprep.subr.mxu1 %v6335_v5 }
 0xb1b   :  { %14472 = vmatmul.mubr.f32.vlgmr.msra.gmra.mxu0 %v5726_v24  ;;  %14485 = vmatprep.subr.mxu0 %v16134_v25 }
 0xb1c   :  { %14486 = vmatpush3.msra.mxu0 %v16134_v25  ;;  %v16209_v42 = vsub.f32 %v6187_v1, %v16197_v62  ;;  %v6342_v0 = vand.u32 4294901760, %v6341_v7  ;;  %14509 = vmatpush3.msra.mxu1 %v6335_v5 }
 0xb1d   :  { %14487 = vmatprep.subr.mxu0 %v16142_v48 }
 0xb1e   :  { %14488 = vmatpush3.msra.mxu0 %v16142_v48  ;;  %v16222_v14 = vand.u32 4294901760, %v16209_v42  ;;  %14510 = vmatprep.subr.mxu1 %v6342_v0 }
 0xb1f   :  { %14489 = vmatprep.subr.mxu0 %v16155_v59  ;;  %14511 = vmatpush3.msra.mxu1 %v6342_v0 }
 0xb20   :  { %14490 = vmatpush3.msra.mxu0 %v16155_v59  ;;  %v6355_v18 = vsub.f32 %v16209_v42, %v16222_v14  ;;  %14512 = vmatprep.subr.mxu1 %v6349_v6 }
 0xb21   :  { %14491 = vmatprep.subr.mxu0 %v16170_v57  ;;  %14513 = vmatpush3.msra.mxu1 %v6349_v6 }
 0xb22   :  { %14492 = vmatpush3.msra.mxu0 %v16170_v57  ;;  %v6356_v12 = vand.u32 4294901760, %v6355_v18 }
 0xb23   :  { %14493 = vmatprep.subr.mxu0 %v16186_v40 }
 0xb24   :  { %14494 = vmatpush3.msra.mxu0 %v16186_v40  ;;  %14514 = vmatprep.subr.mxu1 %v6356_v12 }
 0xb25   :  { %14495 = vmatprep.subr.mxu0 %v16197_v62  ;;  %14515 = vmatpush3.msra.mxu1 %v6356_v12 }
 0xb26   :  { %14496 = vmatpush3.msra.mxu0 %v16197_v62  ;;  %14516 = vmatprep.subr.mxu1 %v6363_v8 }
 0xb27   :  { %14497 = vmatprep.subr.mxu0 %v16211_v9  ;;  %14517 = vmatpush3.msra.mxu1 %v6363_v8 }
 0xb28   :  { %14498 = vmatpush3.msra.mxu0 %v16211_v9  ;;  %14518 = vmatprep.subr.mxu1 %v6370_v27 }
 0xb29   :  { %14499 = vmatprep.subr.mxu0 %v16227_v16  ;;  %14519 = vmatpush3.msra.mxu1 %v6370_v27 }
 0xb2a   :  { %14500 = vmatpush3.msra.mxu0 %v16227_v16  ;;  %14542 = vmatprep.subr.mxu1 %v16134_v25 }
 0xb2b   :  { %14523 = vmatprep.subr.mxu0 %v16140_v47 }
 0xbc1   :  { %v14440_v32 = vpop.f32.mrf.mxu1 }
 0xbc3   :  { %v5823_v36 = vpop.f32.mrf.mxu1 }
 0xbc9   :  { %v14462_v13 = vpop.f32.mrf.mxu1 }
 0xbca   :  { %v14429_v24 = vpop.f32.mrf.mxu0 }
 0xbcb   :  { %v5733_v34 = vadd.f32 %v14429_v24, %v13429_v30  ;;  %v5993_v55 = vpop.f32.mrf.mxu1 }
 0xbcc   :  { %v5722_v33 = vpop.f32.mrf.mxu0 }
 0xbcd   :  { %v5723_v31 = vadd.f32 %v13429_v30, %v5722_v33  ;;  %v5830_v37 = vadd.f32 %v14440_v32, %v5733_v34 }
 0xbcf   :  { %v5824_v46 = vadd.f32 %v5823_v36, %v5723_v31 }
 0xbd2   :  { %v14451_v35 = vpop.f32.mrf.mxu0 }
 0xbd3   :  { %v5917_v44 = vadd.f32 %v14451_v35, %v5830_v37  ;;  %v14484_v58 = vpop.f32.mrf.mxu1 }
 0xbd4   :  { %v5909_v39 = vpop.f32.mrf.mxu0 }
 0xbd5   :  { %v5910_v49 = vadd.f32 %v5909_v39, %v5824_v46  ;;  %v6002_v53 = vadd.f32 %v14462_v13, %v5917_v44  ;;  %v6165_v5 = vpop.f32.mrf.mxu1 }
 0xbd7   :  { %v5994_v1 = vadd.f32 %v5993_v55, %v5910_v49 }
 0xbdb   :  { %v14473_v60 = vpop.f32.mrf.mxu0 }
 0xbdc   :  { %v6091_v38 = vadd.f32 %v14473_v60, %v6002_v53 }
 0xbdd   :  { %v6084_v2 = vpop.f32.mrf.mxu0 }
 0xbde   :  { %v6172_v3 = vadd.f32 %v14484_v58, %v6091_v38  ;;  %v6085_v63 = vadd.f32 %v6084_v2, %v5994_v1 }
 0xbe0   :  { %v6178_v7 = vmul.f32 0.70710677, %v6172_v3  ;;  %v6166_v11 = vadd.f32 %v6165_v5, %v6085_v63  ;;  %v6176_v18 = vmul.f32 0.5, %v6172_v3 }
 0xbe2   :  { %15206 = verf.f32 %v6178_v7  ;;  %v6177_v0 = vmul.f32 0.70710677, %v6166_v11  ;;  %v6175_v8 = vmul.f32 0.5, %v6166_v11 }
 0xbe4   :  { %15208 = verf.f32 %v6177_v0 }
 0xbef   :  { %v15207_v45 = vpop.eup %15206 }
 0xbf0   :  { %v6182_v6 = vadd.f32 1.0, %v15207_v45  ;;  %v13437_v45 = vld [vmem:[%s17150_s5 + $0x30] sm:$0xff] }
 0xbf1   :  { %v15209_v12 = vpop.eup %15208 }
 0xbf2   :  { %v6184_v17 = vmul.f32 %v6182_v6, %v6176_v18  ;;  %v6181_v22 = vadd.f32 1.0, %v15209_v12  ;;  %v16346_v6 = vand.u32 4294901760, %v13437_v45  ;;  %v13436_v12 = vld [vmem:[%s17150_s5 + $0x28] sm:$0xff] }
 0xbf4   :  { %v6183_v27 = vmul.f32 %v6181_v22, %v6175_v8  ;;  %v6205_v24 = vsel %vm6200_vm4, %v6184_v17, 0  ;;  %v16357_v8 = vsub.f32 %v13437_v45, %v16346_v6  ;;  %v16359_v22 = vand.u32 4294901760, %v13436_v12 }
 0xbf5   :  { %v16257_v30 = vand.u32 4294901760, %v6205_v24 }
 0xbf6   :  { %v6202_v32 = vsel %vm6200_vm4, %v6183_v27, 0  ;;  %v13435_v27 = vld [vmem:[%s17150_s5 + $0x20] sm:$0xff] }
 0xbf7   :  { %v6280_v33 = vand.u32 4294901760, %v6202_v32  ;;  %v6291_v34 = vsub.f32 %v6205_v24, %v16257_v30 }
 0xbf9   :  { %14520 = vmatprep.mubr.f32.mxu1 %v6280_v33  ;;  %v6281_v31 = vsub.f32 %v6202_v32, %v6280_v33  ;;  %v6292_v35 = vand.u32 4294901760, %v6291_v34  ;;  %v16372_v32 = vsub.f32 %v13436_v12, %v16359_v22 }
 0xbfa   :  { %14521 = vmatmul.mubr.f32.vlgmr.msra.gmra.mxu1 %v16257_v30 }
 0xbfb   :  { %14543 = vmatpush3.msra.mxu1 %v16134_v25  ;;  %v6282_v36 = vand.u32 4294901760, %v6281_v31  ;;  %v6293_v37 = vsub.f32 %v6291_v34, %v6292_v35 }
 0xbfc   :  { %14544 = vmatprep.subr.mxu1 %v16142_v48 }
 0xbfd   :  { %14545 = vmatpush3.msra.mxu1 %v16142_v48  ;;  %14558 = vmatprep.mubr.f32.mxu1 %v6282_v36  ;;  %v6283_v13 = vsub.f32 %v6281_v31, %v6282_v36  ;;  %v6294_v44 = vand.u32 4294901760, %v6293_v37 }
 0xbfe   :  { %14546 = vmatprep.subr.mxu1 %v16155_v59 }
 0xbff   :  { %14547 = vmatpush3.msra.mxu1 %v16155_v59  ;;  %v6284_v39 = vand.u32 4294901760, %v6283_v13 }
 0xc00   :  { %14548 = vmatprep.subr.mxu1 %v16170_v57 }
 0xc01   :  { %14549 = vmatpush3.msra.mxu1 %v16170_v57  ;;  %14501 = vmatprep.mubr.f32.mxu0 %v6284_v39 }
 0xc02   :  { %14550 = vmatprep.subr.mxu1 %v16186_v40  ;;  %14502 = vmatmul.mubr.f32.vlgmr.msra.gmra.mxu0 %v6294_v44 }
 0xc03   :  { %14524 = vmatpush3.msra.mxu0 %v16140_v47  ;;  %14551 = vmatpush3.msra.mxu1 %v16186_v40  ;;  %v13430_v47 = vld [vmem:[%s17159_s14] ss:$0 sm:$0xff] }
 0xc04   :  { %14525 = vmatprep.subr.mxu0 %v16153_v52  ;;  %14539 = vmatprep.mubr.f32.mxu0 %v6281_v31 }
 0xc05   :  { %14552 = vmatprep.subr.mxu1 %v16197_v62  ;;  %14526 = vmatpush3.msra.mxu0 %v16153_v52 }
 0xc06   :  { %14553 = vmatpush3.msra.mxu1 %v16197_v62  ;;  %14527 = vmatprep.subr.mxu0 %v16168_v56 }
 0xc07   :  { %14554 = vmatprep.subr.mxu1 %v16211_v9  ;;  %14528 = vmatpush3.msra.mxu0 %v16168_v56 }
 0xc08   :  { %14555 = vmatpush3.msra.mxu1 %v16211_v9  ;;  %14529 = vmatprep.subr.mxu0 %v16183_v41 }
 0xc09   :  { %14556 = vmatprep.subr.mxu1 %v16227_v16  ;;  %14530 = vmatpush3.msra.mxu0 %v16183_v41 }
 0xc0a   :  { %14557 = vmatpush3.msra.mxu1 %v16227_v16  ;;  %14531 = vmatprep.subr.mxu0 %v16200_v43 }
 0xc0b   :  { %14559 = vmatmul.mubr.f32.vlgmr.msra.gmra.mxu1 %v6292_v35  ;;  %14580 = vmatprep.subr.mxu1 %v16134_v25  ;;  %v16381_v35 = vand.u32 4294901760, %v16372_v32 }
 0xc0c   :  { %14532 = vmatpush3.msra.mxu0 %v16200_v43  ;;  %14581 = vmatpush3.msra.mxu1 %v16134_v25 }
 0xc0d   :  { %14596 = vmatprep.mubr.f32.mxu1 %v6280_v33  ;;  %14533 = vmatprep.subr.mxu0 %v16209_v42  ;;  %v6986_v13 = vsub.f32 %v16372_v32, %v16381_v35 }
 0xc0e   :  { %14582 = vmatprep.subr.mxu1 %v16142_v48  ;;  %14534 = vmatpush3.msra.mxu0 %v16209_v42 }
 0xc0f   :  { %14583 = vmatpush3.msra.mxu1 %v16142_v48  ;;  %14535 = vmatprep.subr.mxu0 %v16225_v15  ;;  %v6987_v44 = vand.u32 4294901760, %v6986_v13 }
 0xc10   :  { %14584 = vmatprep.subr.mxu1 %v16155_v59  ;;  %14536 = vmatpush3.msra.mxu0 %v16225_v15 }
 0xc11   :  { %14585 = vmatpush3.msra.mxu1 %v16155_v59  ;;  %14537 = vmatprep.subr.mxu0 %v16239_v28 }
 0xc12   :  { %14586 = vmatprep.subr.mxu1 %v16170_v57  ;;  %14538 = vmatpush3.msra.mxu0 %v16239_v28 }
 0xc13   :  { %14587 = vmatpush3.msra.mxu1 %v16170_v57  ;;  %14540 = vmatmul.mubr.f32.vlgmr.msra.gmra.mxu0 %v6291_v34 }
 0xc14   :  { %14561 = vmatprep.subr.mxu0 %v16150_v51  ;;  %14588 = vmatprep.subr.mxu1 %v16186_v40 }
 0xc15   :  { %14562 = vmatpush3.msra.mxu0 %v16150_v51  ;;  %14577 = vmatprep.mubr.f32.mxu0 %v6280_v33  ;;  %v16374_v33 = vand.u32 4294901760, %v13435_v27 }
 0xc16   :  { %14589 = vmatpush3.msra.mxu1 %v16186_v40  ;;  %14563 = vmatprep.subr.mxu0 %v16165_v54 }
 0xc17   :  { %14590 = vmatprep.subr.mxu1 %v16197_v62  ;;  %14564 = vmatpush3.msra.mxu0 %v16165_v54  ;;  %v16384_v36 = vsub.f32 %v13435_v27, %v16374_v33 }
 0xc18   :  { %14591 = vmatpush3.msra.mxu1 %v16197_v62  ;;  %14565 = vmatprep.subr.mxu0 %v16180_v61 }
 0xc19   :  { %14592 = vmatprep.subr.mxu1 %v16211_v9  ;;  %14566 = vmatpush3.msra.mxu0 %v16180_v61  ;;  %v16391_v39 = vand.u32 4294901760, %v16384_v36 }
 0xc1a   :  { %14593 = vmatpush3.msra.mxu1 %v16211_v9  ;;  %14567 = vmatprep.subr.mxu0 %v16195_v4 }
 0xc1b   :  { %14594 = vmatprep.subr.mxu1 %v16227_v16  ;;  %14568 = vmatpush3.msra.mxu0 %v16195_v4 }
 0xc1c   :  { %14595 = vmatpush3.msra.mxu1 %v16227_v16  ;;  %14569 = vmatprep.subr.mxu0 %v16215_v10 }
 0xc1d   :  { %14597 = vmatmul.mubr.f32.vlgmr.msra.gmra.mxu1 %v16257_v30  ;;  %14570 = vmatpush3.msra.mxu0 %v16215_v10 }
 0xc1e   :  { %14571 = vmatprep.subr.mxu0 %v16222_v14 }
 0xc1f   :  { %14572 = vmatpush3.msra.mxu0 %v16222_v14 }
 0xc20   :  { %14573 = vmatprep.subr.mxu0 %v16236_v20 }
 0xc21   :  { %14574 = vmatpush3.msra.mxu0 %v16236_v20 }
 0xc22   :  { %14575 = vmatprep.subr.mxu0 %v16246_v21 }
 0xc23   :  { %14576 = vmatpush3.msra.mxu0 %v16246_v21 }
 0xc24   :  { %14578 = vmatmul.mubr.f32.vlgmr.msra.gmra.mxu0 %v16257_v30  ;;  %v16369_v30 = vand.u32 4294901760, %v16357_v8 }
 0xc26   :  { %v6979_v31 = vsub.f32 %v16357_v8, %v16369_v30 }
 0xc28   :  { %v6980_v37 = vand.u32 4294901760, %v6979_v31 }
 0xcba   :  { %v14522_v48 = vpop.f32.mrf.mxu1 }
 0xcbc   :  { %v6407_v56 = vpop.f32.mrf.mxu1 }
 0xcc2   :  { %v14503_v25 = vpop.f32.mrf.mxu0 }
 0xcc3   :  { %v6297_v52 = vadd.f32 %v14503_v25, %v13430_v47  ;;  %v6993_v25 = vsub.f32 %v16384_v36, %v16391_v39 }
 0xcc4   :  { %v6286_v51 = vpop.f32.mrf.mxu0 }
 0xcc5   :  { %v6287_v54 = vadd.f32 %v13430_v47, %v6286_v51  ;;  %v6414_v57 = vadd.f32 %v14522_v48, %v6297_v52  ;;  %v6994_v47 = vand.u32 4294901760, %v6993_v25 }
 0xcc7   :  { %v6408_v4 = vadd.f32 %v6407_v56, %v6287_v54 }
 0xccb   :  { %v14560_v61 = vpop.f32.mrf.mxu1 }
 0xccd   :  { %v6589_v43 = vpop.f32.mrf.mxu1 }
 0xcd3   :  { %v14541_v59 = vpop.f32.mrf.mxu0 }
 0xcd4   :  { %v6509_v40 = vadd.f32 %v14541_v59, %v6414_v57 }
 0xcd5   :  { %v6501_v41 = vpop.f32.mrf.mxu0 }
 0xcd6   :  { %v6502_v62 = vadd.f32 %v6501_v41, %v6408_v4  ;;  %v6598_v42 = vadd.f32 %v14560_v61, %v6509_v40  ;;  %v13431_v61 = vld [vmem:[%s17160_s15] ss:$0 sm:$0xff] }
 0xcd7   :  { %v13432_v4 = vld [vmem:[%s17161_s16] ss:$0 sm:$0xff] }
 0xcd8   :  { %v6590_v15 = vadd.f32 %v6589_v43, %v6502_v62 }
 0xcdd   :  { %v14598_v9 = vpop.f32.mrf.mxu1 }
 0xcdf   :  { %v6777_v21 = vpop.f32.mrf.mxu1 }
 0xce4   :  { %v14579_v10 = vpop.f32.mrf.mxu0 }
 0xce5   :  { %v6699_v14 = vadd.f32 %v14579_v10, %v6598_v42 }
 0xce6   :  { %v6692_v16 = vpop.f32.mrf.mxu0 }
 0xce7   :  { %v6784_v20 = vadd.f32 %v14598_v9, %v6699_v14  ;;  %v6693_v28 = vadd.f32 %v6692_v16, %v6590_v15 }
 0xce9   :  { %v6778_v46 = vadd.f32 %v6777_v21, %v6693_v28  ;;  %v6788_v49 = vadd.f32 %v6784_v20, %v16093_v23 }
 0xceb   :  { %v6794_v55 = vsel %vm245_vm0, %v6788_v49, 0.0  ;;  %v6787_v53 = vadd.f32 %v6778_v46, %v16095_v26  ;;  %v13438_v26 = vld [vmem:[%s17150_s5 + $0x38] sm:$0xff] }
 0xcec   :  { %6795 = vadd.xlane.f32.xlu1 %v6794_v55  ;;  %v16338_v0 = vand.u32 4294901760, %v13438_v26 }
 0xced   :  { %v6791_v58 = vsel %vm245_vm0, %v6787_v53, 0.0 }
 0xcee   :  { %6792 = vadd.xlane.f32.xlu0 %v6791_v58  ;;  %v16344_v18 = vsub.f32 %v13438_v26, %v16338_v0  ;;  %14599 = vmatprep.subr.mxu0 %v16338_v0 }
 0xcef   :  { %14600 = vmatpush3.msra.mxu0 %v16338_v0 }
 0xcf0   :  { %v16354_v17 = vand.u32 4294901760, %v16344_v18  ;;  %14601 = vmatprep.subr.mxu0 %v16346_v6 }
 0xcf1   :  { %14602 = vmatpush3.msra.mxu0 %v16346_v6 }
 0xcf2   :  { %v6972_v24 = vsub.f32 %v16344_v18, %v16354_v17  ;;  %14603 = vmatprep.subr.mxu0 %v16359_v22 }
 0xcf3   :  { %14604 = vmatpush3.msra.mxu0 %v16359_v22 }
 0xcf4   :  { %v6973_v34 = vand.u32 4294901760, %v6972_v24  ;;  %14605 = vmatprep.subr.mxu0 %v16374_v33 }
 0xcf5   :  { %14606 = vmatpush3.msra.mxu0 %v16374_v33 }
 0xcf6   :  { %14610 = vmatprep.subr.mxu1 %v6973_v34  ;;  %14621 = vmatprep.subr.mxu0 %v16344_v18 }
 0xcf7   :  { %14611 = vmatpush3.msra.mxu1 %v6973_v34 }
 0xcf8   :  { %14612 = vmatprep.subr.mxu1 %v6980_v37 }
 0xcf9   :  { %14613 = vmatpush3.msra.mxu1 %v6980_v37 }
 0xcfa   :  { %14614 = vmatprep.subr.mxu1 %v6987_v44 }
 0xcfb   :  { %14615 = vmatpush3.msra.mxu1 %v6987_v44 }
 0xcfc   :  { %14616 = vmatprep.subr.mxu1 %v6994_v47 }
 0xcfd   :  { %14617 = vmatpush3.msra.mxu1 %v6994_v47 }
 0xcfe   :  { %14632 = vmatprep.subr.mxu1 %v16338_v0 }
 0xd75   :  { %v6796_v60 = vpop.xlane.xlu1 %6795 }
 0xd76   :  { %v6798_v38 = vmul.f32 0.03125, %v6796_v60 }
 0xd77   :  { %v6793_v1 = vpop.xlane.xlu0 %6792 }
 0xd78   :  { %v6800_v2 = vsub.f32 %v6788_v49, %v6798_v38  ;;  %v6797_v3 = vmul.f32 0.03125, %v6793_v1  ;;  %v13440_v1 = vld [vmem:[%s17151_s6 + $0x1] ss:$0 sm:$0xff] }
 0xd7a   :  { %v6799_v63 = vsub.f32 %v6787_v53, %v6797_v3  ;;  %v6802_v5 = vmul.f32 %v6800_v2, %v6800_v2 }
 0xd7c   :  { %v6806_v7 = vsel %vm245_vm0, %v6802_v5, 0.0  ;;  %v6801_v11 = vmul.f32 %v6799_v63, %v6799_v63 }
 0xd7d   :  { %6807 = vadd.xlane.f32.xlu1 %v6806_v7 }
 0xd7e   :  { %v6803_v23 = vsel %vm245_vm0, %v6801_v11, 0.0 }
 0xd7f   :  { %6804 = vadd.xlane.f32.xlu0 %v6803_v23 }
 0xe06   :  { %v6808_v48 = vpop.xlane.xlu1 %6807 }
 0xe07   :  { %v6810_v51 = vmul.f32 0.03125, %v6808_v48 }
 0xe08   :  { %v6805_v52 = vpop.xlane.xlu0 %6804 }
 0xe09   :  { %v6812_v59 = vadd.f32 1e-12, %v6810_v51  ;;  %v6809_v54 = vmul.f32 0.03125, %v6805_v52 }
 0xe0b   :  { %15210 = vrsqrt.f32 %v6812_v59  ;;  %v6811_v56 = vadd.f32 1e-12, %v6809_v54 }
 0xe0d   :  { %15212 = vrsqrt.f32 %v6811_v56 }
 0xe18   :  { %v15211_v57 = vpop.eup %15210 }
 0xe19   :  { %v6816_v41 = vmul.f32 %v15211_v57, %v6800_v2 }
 0xe1a   :  { %v15213_v40 = vpop.eup %15212 }
 0xe1b   :  { %v6815_v62 = vmul.f32 %v15213_v40, %v6799_v63  ;;  %v6824_v43 = vmul.f32 %v13431_v61, %v6816_v41 }
 0xe1d   :  { %v6823_v42 = vmul.f32 %v13431_v61, %v6815_v62  ;;  %v16403_v9 = vadd.f32 %v13432_v4, %v6824_v43 }
 0xe1f   :  { %v16405_v10 = vadd.f32 %v13432_v4, %v6823_v42  ;;  %13434 = vst.msk [vmem:[%s17163_s18 + $0x18] sm:$0xff] %vm245_vm0, %v16403_v9  ;;  %v6853_v14 = vsel %vm245_vm0, %v16403_v9, 0 }
 0xe20   :  { %v6934_v15 = vand.u32 4294901760, %v6853_v14 }
 0xe21   :  { %13433 = vst.msk [vmem:[%s17163_s18 + $0x10] sm:$0xff] %vm245_vm0, %v16405_v10  ;;  %v6850_v16 = vsel %vm245_vm0, %v16405_v10, 0 }
 0xe22   :  { %v6924_v20 = vand.u32 4294901760, %v6850_v16  ;;  %v6935_v28 = vsub.f32 %v6853_v14, %v6934_v15 }
 0xe24   :  { %14618 = vmatprep.mubr.f32.mxu1 %v6924_v20  ;;  %v6925_v21 = vsub.f32 %v6850_v16, %v6924_v20  ;;  %v6936_v46 = vand.u32 4294901760, %v6935_v28 }
 0xe25   :  { %14619 = vmatmul.mubr.f32.vlgmr.msra.gmra.mxu1 %v6934_v15 }
 0xe26   :  { %14633 = vmatpush3.msra.mxu1 %v16338_v0  ;;  %v6926_v49 = vand.u32 4294901760, %v6925_v21  ;;  %v6937_v53 = vsub.f32 %v6935_v28, %v6936_v46 }
 0xe27   :  { %14634 = vmatprep.subr.mxu1 %v16346_v6 }
 0xe28   :  { %14635 = vmatpush3.msra.mxu1 %v16346_v6  ;;  %14640 = vmatprep.mubr.f32.mxu1 %v6926_v49  ;;  %v6927_v55 = vsub.f32 %v6925_v21, %v6926_v49  ;;  %v6938_v60 = vand.u32 4294901760, %v6937_v53 }
 0xe29   :  { %14636 = vmatprep.subr.mxu1 %v16359_v22 }
 0xe2a   :  { %14637 = vmatpush3.msra.mxu1 %v16359_v22  ;;  %v6928_v58 = vand.u32 4294901760, %v6927_v55 }
 0xe2b   :  { %14638 = vmatprep.subr.mxu1 %v16374_v33 }
 0xe2c   :  { %14639 = vmatpush3.msra.mxu1 %v16374_v33  ;;  %14607 = vmatprep.mubr.f32.mxu0 %v6928_v58 }
 0xe2d   :  { %14641 = vmatmul.mubr.f32.vlgmr.msra.gmra.mxu1 %v6936_v46  ;;  %14654 = vmatprep.subr.mxu1 %v16338_v0 }
 0xe2e   :  { %14608 = vmatmul.mubr.f32.vlgmr.msra.gmra.mxu0 %v6938_v60  ;;  %14655 = vmatpush3.msra.mxu1 %v16338_v0 }
 0xe2f   :  { %14622 = vmatpush3.msra.mxu0 %v16344_v18  ;;  %14662 = vmatprep.mubr.f32.mxu1 %v6924_v20 }
 0xe30   :  { %14623 = vmatprep.subr.mxu0 %v16357_v8  ;;  %14629 = vmatprep.mubr.f32.mxu0 %v6925_v21 }
 0xe31   :  { %14656 = vmatprep.subr.mxu1 %v16346_v6  ;;  %14624 = vmatpush3.msra.mxu0 %v16357_v8 }
 0xe32   :  { %14657 = vmatpush3.msra.mxu1 %v16346_v6  ;;  %14625 = vmatprep.subr.mxu0 %v16372_v32 }
 0xe33   :  { %14658 = vmatprep.subr.mxu1 %v16359_v22  ;;  %14626 = vmatpush3.msra.mxu0 %v16372_v32 }
 0xe34   :  { %14659 = vmatpush3.msra.mxu1 %v16359_v22  ;;  %14627 = vmatprep.subr.mxu0 %v16384_v36 }
 0xe35   :  { %14660 = vmatprep.subr.mxu1 %v16374_v33  ;;  %14628 = vmatpush3.msra.mxu0 %v16384_v36 }
 0xe36   :  { %14661 = vmatpush3.msra.mxu1 %v16374_v33  ;;  %14630 = vmatmul.mubr.f32.vlgmr.msra.gmra.mxu0 %v6935_v28 }
 0xe37   :  { %14643 = vmatprep.subr.mxu0 %v16354_v17  ;;  %14663 = vmatmul.mubr.f32.vlgmr.msra.gmra.mxu1 %v6934_v15 }
 0xe38   :  { %14644 = vmatpush3.msra.mxu0 %v16354_v17  ;;  %14651 = vmatprep.mubr.f32.mxu0 %v6924_v20 }
 0xe39   :  { %14645 = vmatprep.subr.mxu0 %v16369_v30  ;;  %14670 = vmatprep.subr.mxu1 %v15257_v19 }
 0xe3a   :  { %14646 = vmatpush3.msra.mxu0 %v16369_v30  ;;  %14672 = vmatprep.mubr.msk.f32.mxu1 %vm15258_vm1, %v15257_v19 }
 0xe3b   :  { %14647 = vmatprep.subr.mxu0 %v16381_v35 }
 0xe3c   :  { %14648 = vmatpush3.msra.mxu0 %v16381_v35 }
 0xe3d   :  { %14649 = vmatprep.subr.mxu0 %v16391_v39 }
 0xe3e   :  { %14650 = vmatpush3.msra.mxu0 %v16391_v39 }
 0xe3f   :  { %14652 = vmatmul.mubr.f32.vlgmr.msra.gmra.mxu0 %v6934_v15  ;;  %14665 = vmatprep.subr.mxu0 %v15257_v19 }
 0xe40   :  { %14667 = vmatprep.mubr.msk.f32.mxu0 %vm15258_vm1, %v15257_v19 }
 0xee5   :  { %v14620_v2 = vpop.f32.mrf.mxu1 }
 0xee7   :  { %v7031_v11 = vpop.f32.mrf.mxu1 }
 0xeed   :  { %v14642_v26 = vpop.f32.mrf.mxu1 }
 0xeee   :  { %v14609_v38 = vpop.f32.mrf.mxu0 }
 0xeef   :  { %v6941_v63 = vadd.f32 %v14609_v38, %v13440_v1  ;;  %v7201_v12 = vpop.f32.mrf.mxu1 }
 0xef0   :  { %v6930_v3 = vpop.f32.mrf.mxu0 }
 0xef1   :  { %v6931_v5 = vadd.f32 %v13440_v1, %v6930_v3  ;;  %v7038_v23 = vadd.f32 %v14620_v2, %v6941_v63 }
 0xef3   :  { %v7032_v18 = vadd.f32 %v7031_v11, %v6931_v5 }
 0xef6   :  { %v14631_v7 = vpop.f32.mrf.mxu0 }
 0xef7   :  { %v7125_v45 = vadd.f32 %v14631_v7, %v7038_v23  ;;  %v14664_v8 = vpop.f32.mrf.mxu1 }
 0xef8   :  { %v7117_v0 = vpop.f32.mrf.mxu0 }
 0xef9   :  { %v7118_v6 = vadd.f32 %v7117_v0, %v7032_v18  ;;  %v7210_v17 = vadd.f32 %v14642_v26, %v7125_v45  ;;  %v7373_v34 = vpop.f32.mrf.mxu1 }
 0xefb   :  { %v7202_v24 = vadd.f32 %v7201_v12, %v7118_v6 }
 0xeff   :  { %v14653_v22 = vpop.f32.mrf.mxu0 }
 0xf00   :  { %v7299_v27 = vadd.f32 %v14653_v22, %v7210_v17 }
 0xf01   :  { %v7292_v30 = vpop.f32.mrf.mxu0 }
 0xf02   :  { %v16460_v32 = vadd.f32 %v14664_v8, %v7299_v27  ;;  %v7293_v33 = vadd.f32 %v7292_v30, %v7202_v24 }
 0xf04   :  { %v16462_v31 = vadd.f32 %v7373_v34, %v7293_v33  ;;  %7839 = vrot.lane.b32.xlu1 %v16460_v32, %s15259_s2  ;;  %v7841_v39 = vsel %vm866_vm2, %v16460_v32, 0 }
 0xf05   :  { %v7911_v51 = vand.u32 4294901760, %v7841_v39 }
 0xf06   :  { %7386 = vrot.lane.b32.xlu0 %v16462_v31, %s15259_s2  ;;  %v7388_v35 = vsel %vm866_vm2, %v16462_v31, 0 }
 0xf07   :  { %v7458_v36 = vand.u32 4294901760, %v7388_v35  ;;  %v7912_v57 = vsub.f32 %v7841_v39, %v7911_v51 }
 0xf09   :  { %v7459_v37 = vsub.f32 %v7388_v35, %v7458_v36  ;;  %v7913_v4 = vand.u32 4294901760, %v7912_v57 }
 0xf0b   :  { %v7460_v13 = vand.u32 4294901760, %v7459_v37  ;;  %v7914_v42 = vsub.f32 %v7912_v57, %v7913_v4 }
 0xf0d   :  { %v7461_v48 = vsub.f32 %v7459_v37, %v7460_v13  ;;  %v7915_v15 = vand.u32 4294901760, %v7914_v42 }
 0xf0f   :  { %v7462_v56 = vand.u32 4294901760, %v7461_v48 }
 0xf76   :  { %v7840_v44 = vpop.permute.xlu1 %7839 }
 0xf77   :  { %v7843_v59 = vsel %vm866_vm2, %v7840_v44, 0 }
 0xf78   :  { %v7387_v25 = vpop.permute.xlu0 %7386  ;;  %v7876_v61 = vand.u32 4294901760, %v7843_v59 }
 0xf79   :  { %v7390_v47 = vsel %vm866_vm2, %v7387_v25, 0 }
 0xf7a   :  { %v7423_v52 = vand.u32 4294901760, %v7390_v47  ;;  %v7953_v62 = vsub.f32 %v7843_v59, %v7876_v61 }
 0xf7c   :  { %v7500_v54 = vsub.f32 %v7390_v47, %v7423_v52  ;;  %14666 = vmatpush3.xpose.msra.mxu0 %v7423_v52  ;;  %v7954_v14 = vand.u32 4294901760, %v7953_v62 }
 0xf7d   :  { %14675 = vmatprep.subr.mxu0 %v15257_v19 }
 0xf7e   :  { %v7501_v41 = vand.u32 4294901760, %v7500_v54  ;;  %v7955_v16 = vsub.f32 %v7953_v62, %v7954_v14 }
 0xf7f   :  { %14668 = vmatmul.mubr.f32.vlgmr.msra.gmra.mxu0 %v7462_v56 }
 0xf80   :  { %v7502_v40 = vsub.f32 %v7500_v54, %v7501_v41  ;;  %14676 = vmatpush3.xpose.msra.mxu0 %v7500_v54  ;;  %14677 = vmatprep.mubr.msk.f32.mxu0 %vm15258_vm1, %v15257_v19  ;;  %v7956_v20 = vand.u32 4294901760, %v7955_v16 }
 0xf81   :  { %14685 = vmatprep.subr.mxu0 %v15257_v19 }
 0xf82   :  { %v7503_v43 = vand.u32 4294901760, %v7502_v40 }
 0xf83   :  { %14678 = vmatmul.mubr.f32.vlgmr.msra.gmra.mxu0 %v7459_v37 }
 0xf84   :  { %14671 = vmatpush3.xpose.msra.mxu1 %v7503_v43  ;;  %14686 = vmatpush3.xpose.msra.mxu0 %v7501_v41 }
 0xf85   :  { %14687 = vmatprep.mubr.msk.f32.mxu0 %vm15258_vm1, %v15257_v19  ;;  %14680 = vmatprep.subr.mxu1 %v15257_v19 }
 0xf86   :  { %14695 = vmatprep.subr.mxu0 %v15257_v19 }
 0xf87   :  { %14673 = vmatmul.mubr.f32.vlgmr.msra.gmra.mxu1 %v7458_v36  ;;  %14688 = vmatmul.mubr.f32.vlgmr.msra.gmra.mxu0 %v7458_v36 }
 0xf88   :  { %14681 = vmatpush3.xpose.msra.mxu1 %v7423_v52  ;;  %14696 = vmatpush3.xpose.msra.mxu0 %v7876_v61 }
 0xf89   :  { %14682 = vmatprep.mubr.msk.f32.mxu1 %vm15258_vm1, %v15257_v19  ;;  %14697 = vmatprep.mubr.msk.f32.mxu0 %vm15258_vm1, %v15257_v19 }
 0xf8a   :  { %14690 = vmatprep.subr.mxu1 %v15257_v19  ;;  %14705 = vmatprep.subr.mxu0 %v15257_v19 }
 0xf8b   :  { %14683 = vmatmul.mubr.f32.vlgmr.msra.gmra.mxu1 %v7460_v13  ;;  %14698 = vmatmul.mubr.f32.vlgmr.msra.gmra.mxu0 %v7915_v15 }
 0xf8c   :  { %14691 = vmatpush3.xpose.msra.mxu1 %v7423_v52  ;;  %14706 = vmatpush3.xpose.msra.mxu0 %v7953_v62 }
 0xf8d   :  { %14692 = vmatprep.mubr.msk.f32.mxu1 %vm15258_vm1, %v15257_v19  ;;  %14707 = vmatprep.mubr.msk.f32.mxu0 %vm15258_vm1, %v15257_v19 }
 0xf8e   :  { %14700 = vmatprep.subr.mxu1 %v15257_v19  ;;  %14715 = vmatprep.subr.mxu0 %v15257_v19 }
 0xf8f   :  { %14693 = vmatmul.mubr.f32.vlgmr.msra.gmra.mxu1 %v7458_v36  ;;  %14708 = vmatmul.mubr.f32.vlgmr.msra.gmra.mxu0 %v7912_v57 }
 0xf90   :  { %14701 = vmatpush3.xpose.msra.mxu1 %v7956_v20  ;;  %14716 = vmatpush3.xpose.msra.mxu0 %v7954_v14 }
 0xf91   :  { %14702 = vmatprep.mubr.msk.f32.mxu1 %vm15258_vm1, %v15257_v19  ;;  %14717 = vmatprep.mubr.msk.f32.mxu0 %vm15258_vm1, %v15257_v19 }
 0xf92   :  { %14710 = vmatprep.subr.mxu1 %v15257_v19  ;;  %14725 = vmatprep.subr.mxu0 %v15257_v19 }
 0xf93   :  { %14703 = vmatmul.mubr.f32.vlgmr.msra.gmra.mxu1 %v7911_v51  ;;  %14718 = vmatmul.mubr.f32.vlgmr.msra.gmra.mxu0 %v7911_v51 }
 0xf94   :  { %14711 = vmatpush3.xpose.msra.mxu1 %v7876_v61  ;;  %14712 = vmatprep.mubr.msk.f32.mxu1 %vm15258_vm1, %v15257_v19 }
 0xf95   :  { %14720 = vmatprep.subr.mxu1 %v15257_v19  ;;  %14727 = vmatprep.mubr.msk.f32.mxu0 %vm15258_vm1, %v15257_v19 }
 0xf97   :  { %14713 = vmatmul.mubr.f32.vlgmr.msra.gmra.mxu1 %v7913_v4 }
 0xf98   :  { %14721 = vmatpush3.xpose.msra.mxu1 %v7876_v61  ;;  %14722 = vmatprep.mubr.msk.f32.mxu1 %vm15258_vm1, %v15257_v19 }
 0xf99   :  { %14730 = vmatprep.subr.mxu1 %v15257_v19 }
 0xf9b   :  { %14723 = vmatmul.mubr.f32.vlgmr.msra.gmra.mxu1 %v7911_v51 }
 0xf9c   :  { %14732 = vmatprep.mubr.msk.f32.mxu1 %vm15258_vm1, %v15257_v19 }
0x103f   :  { %v7464_v28 = vpop.f32.mrf.mxu0 }
0x1041   :  { %v14669_v21 = vpop.f32.mrf.mxu0 }
0x1043   :  { %v7614_v46 = vpop.f32.mrf.mxu0 }
0x1045   :  { %v14679_v49 = vpop.f32.mrf.mxu0 }
0x1047   :  { %v7540_v55 = vpop.f32.mrf.mxu1  ;;  %v7762_v53 = vpop.f32.mrf.mxu0 }
0x1048   :  { %v7541_v58 = vadd.f32 %v7540_v55, %v7464_v28 }
0x1049   :  { %v14674_v60 = vpop.f32.mrf.mxu1  ;;  %v14689_v38 = vpop.f32.mrf.mxu0 }
0x104a   :  { %v7615_v1 = vadd.f32 %v7614_v46, %v7541_v58 }
0x104b   :  { %v7688_v2 = vpop.f32.mrf.mxu1  ;;  %v7917_v3 = vpop.f32.mrf.mxu0 }
0x104c   :  { %v7689_v63 = vadd.f32 %v7688_v2, %v7615_v1 }
0x104d   :  { %v14684_v5 = vpop.f32.mrf.mxu1  ;;  %v14699_v7 = vpop.f32.mrf.mxu0 }
0x104e   :  { %v7763_v11 = vadd.f32 %v7762_v53, %v7689_v63 }
0x104f   :  { %v7834_v23 = vpop.f32.mrf.mxu1  ;;  %v8067_v26 = vpop.f32.mrf.mxu0 }
0x1050   :  { %v7835_v0 = vadd.f32 %v7834_v23, %v7763_v11 }
0x1051   :  { %v14694_v45 = vpop.f32.mrf.mxu1  ;;  %v14709_v18 = vpop.f32.mrf.mxu0 }
0x1052   :  { %v8291_v6 = vmul.f32 0.25, %v7835_v0 }
0x1053   :  { %v7993_v12 = vpop.f32.mrf.mxu1  ;;  %v8215_v17 = vpop.f32.mrf.mxu0 }
0x1054   :  { %v7994_v8 = vadd.f32 %v7993_v12, %v7917_v3  ;;  %v8293_v22 = vadd.f32 %v8291_v6, %v15703_v29 }
0x1055   :  { %v14704_v27 = vpop.f32.mrf.mxu1  ;;  %v14719_v24 = vpop.f32.mrf.mxu0 }
0x1056   :  { %v8068_v30 = vadd.f32 %v8067_v26, %v7994_v8  ;;  %v8295_v33 = vsel %vm1784_vm3, %v8293_v22, -inf }
0x1057   :  { %v8141_v34 = vpop.f32.mrf.mxu1  ;;  %8296 = vmax.xlane.f32.xlu1 %v8295_v33 }
0x1058   :  { %v8142_v35 = vadd.f32 %v8141_v34, %v8068_v30 }
0x1059   :  { %v14714_v36 = vpop.f32.mrf.mxu1 }
0x105a   :  { %v8216_v37 = vadd.f32 %v8215_v17, %v8142_v35  ;;  %v13445_v17 = vld [vmem:[%s17152_s7 + $0x28] sm:$0xff] }
0x105b   :  { %v8287_v13 = vpop.f32.mrf.mxu1  ;;  %v16571_v8 = vand.u32 4294901760, %v13445_v17 }
0x105c   :  { %v8288_v39 = vadd.f32 %v8287_v13, %v8216_v37 }
0x105d   :  { %v14724_v44 = vpop.f32.mrf.mxu1  ;;  %v16577_v27 = vsub.f32 %v13445_v17, %v16571_v8 }
0x105e   :  { %v8292_v25 = vmul.f32 0.25, %v8288_v39 }
0x105f   :  { %v16584_v30 = vand.u32 4294901760, %v16577_v27 }
0x1060   :  { %v8294_v47 = vadd.f32 %v8292_v25, %v15707_v50 }
0x1061   :  { %v9352_v34 = vsub.f32 %v16577_v27, %v16584_v30 }
0x1062   :  { %v8298_v48 = vsel %vm1784_vm3, %v8294_v47, -inf }
0x1063   :  { %8299 = vmax.xlane.f32.xlu0 %v8298_v48  ;;  %v9353_v36 = vand.u32 4294901760, %v9352_v34 }
0x10e0   :  { %v8297_v51 = vpop.xlane.xlu1 %8296 }
0x10e1   :  { %v8301_v52 = vsub.f32 %v8293_v22, %v8297_v51  ;;  %v13444_v22 = vld [vmem:[%s17152_s7 + $0x20] sm:$0xff] }
0x10e2   :  { %v16579_v24 = vand.u32 4294901760, %v13444_v22 }
0x10e3   :  { %v8303_v59 = vmul.f32 1.442695, %v8301_v52 }
0x10e4   :  { %v16587_v33 = vsub.f32 %v13444_v22, %v16579_v24 }
0x10e5   :  { %15214 = vpow2.f32 %v8303_v59 }
0x10e6   :  { %v16594_v35 = vand.u32 4294901760, %v16587_v33 }
0x10e8   :  { %v9359_v37 = vsub.f32 %v16587_v33, %v16594_v35 }
0x10ea   :  { %v9360_v13 = vand.u32 4294901760, %v9359_v37 }
0x10ec   :  { %v8300_v54 = vpop.xlane.xlu0 %8299 }
0x10ed   :  { %v8302_v56 = vsub.f32 %v8294_v47, %v8300_v54 }
0x10ef   :  { %v8305_v57 = vmul.f32 1.442695, %v8302_v56 }
0x10f1   :  { %15216 = vpow2.f32 %v8305_v57 }
0x10f2   :  { %v15215_v61 = vpop.eup %15214 }
0x10f3   :  { %v8307_v41 = vsel %vm1784_vm3, %v15215_v61, 0.0 }
0x10f4   :  { %8308 = vadd.xlane.f32.xlu0 %v8307_v41 }
0x10fe   :  { %v15217_v40 = vpop.eup %15216 }
0x10ff   :  { %v8310_v4 = vsel %vm1784_vm3, %v15217_v40, 0.0 }
0x1100   :  { %8311 = vadd.xlane.f32.xlu1 %v8310_v4 }
0x110a   :  { %8320 = vrot.lane.b32.xlu0 %v16462_v31, %s15261_s30 }
0x110e   :  { %10199 = vrot.lane.b32.xlu0 %v16460_v32, %s15262_s25 }
0x1111   :  { %8772 = vrot.lane.b32.xlu1 %v16460_v32, %s15261_s30 }
0x1115   :  { %9745 = vrot.lane.b32.xlu1 %v16462_v31, %s15262_s25 }
0x1119   :  { %9743 = vrot.lane.b32.xlu1 %v16462_v31, %s15263_s20 }
0x111d   :  { %10197 = vrot.lane.b32.xlu1 %v16460_v32, %s15263_s20 }
0x117d   :  { %v8309_v62 = vpop.xlane.xlu0 %8308 }
0x117e   :  { %15218 = vrcp.f32 %v8309_v62 }
0x1181   :  { %v8321_v43 = vpop.permute.xlu0 %8320 }
0x1182   :  { %v8357_v42 = vand.u32 4294901760, %v8321_v43 }
0x1184   :  { %v8434_v14 = vsub.f32 %v8321_v43, %v8357_v42  ;;  %14726 = vmatpush3.msra.mxu0 %v8357_v42 }
0x1185   :  { %14735 = vmatprep.subr.mxu0 %v15257_v19  ;;  %v10200_v34 = vpop.permute.xlu0 %10199 }
0x1186   :  { %v8435_v15 = vand.u32 4294901760, %v8434_v14 }
0x1188   :  { %v8436_v16 = vsub.f32 %v8434_v14, %v8435_v15 }
0x1189   :  { %v8312_v20 = vpop.xlane.xlu1 %8311 }
0x118a   :  { %v8437_v28 = vand.u32 4294901760, %v8436_v16  ;;  %15220 = vrcp.f32 %v8312_v20 }
0x118b   :  { %v15219_v21 = vpop.eup %15218 }
0x118c   :  { %14731 = vmatpush3.msra.mxu1 %v8437_v28  ;;  %v8315_v46 = vmul.f32 %v15219_v21, %v15215_v61 }
0x118d   :  { %v8773_v49 = vpop.permute.xlu1 %8772  ;;  %14740 = vmatprep.subr.mxu1 %v15257_v19 }
0x118e   :  { %v8809_v55 = vand.u32 4294901760, %v8773_v49  ;;  %13442 = vst.msk [vmem:[%s17164_s19 + $0x20] sm:$0xff] %vm1784_vm3, %v8315_v46  ;;  %v8324_v53 = vsel %vm1784_vm3, %v8315_v46, 0 }
0x118f   :  { %v8392_v58 = vand.u32 4294901760, %v8324_v53 }
0x1190   :  { %v8886_v60 = vsub.f32 %v8773_v49, %v8809_v55 }
0x1191   :  { %v8393_v38 = vsub.f32 %v8324_v53, %v8392_v58  ;;  %14733 = vmatmul.mubr.f32.vlgmr.msra.gmra.mxu1 %v8392_v58  ;;  %v9746_v21 = vpop.permute.xlu1 %9745 }
0x1192   :  { %v8887_v1 = vand.u32 4294901760, %v8886_v60  ;;  %14741 = vmatpush3.msra.mxu1 %v8357_v42  ;;  %14742 = vmatprep.mubr.msk.f32.mxu1 %vm15258_vm1, %v15257_v19 }
0x1193   :  { %14750 = vmatprep.subr.mxu1 %v15257_v19  ;;  %v8394_v2 = vand.u32 4294901760, %v8393_v38 }
0x1194   :  { %v8888_v3 = vsub.f32 %v8886_v60, %v8887_v1 }
0x1195   :  { %14743 = vmatmul.mubr.f32.vlgmr.msra.gmra.mxu1 %v8394_v2  ;;  %v8395_v63 = vsub.f32 %v8393_v38, %v8394_v2  ;;  %v9744_v17 = vpop.permute.xlu1 %9743 }
0x1196   :  { %v8889_v5 = vand.u32 4294901760, %v8888_v3  ;;  %14751 = vmatpush3.msra.mxu1 %v8357_v42  ;;  %14752 = vmatprep.mubr.msk.f32.mxu1 %vm15258_vm1, %v15257_v19 }
0x1197   :  { %v15221_v7 = vpop.eup %15220  ;;  %14760 = vmatprep.subr.mxu1 %v15257_v19  ;;  %v8396_v11 = vand.u32 4294901760, %v8395_v63 }
0x1198   :  { %v8316_v23 = vmul.f32 %v15221_v7, %v15217_v40 }
0x1199   :  { %14728 = vmatmul.mubr.f32.vlgmr.msra.gmra.mxu0 %v8396_v11  ;;  %14753 = vmatmul.mubr.f32.vlgmr.msra.gmra.mxu1 %v8392_v58 }
0x119a   :  { %14736 = vmatpush3.msra.mxu0 %v8434_v14  ;;  %14761 = vmatpush3.msra.mxu1 %v8889_v5  ;;  %13443 = vst.msk [vmem:[%s17164_s19 + $0x30] sm:$0xff] %vm1784_vm3, %v8316_v23  ;;  %v8776_v26 = vsel %vm1784_vm3, %v8316_v23, 0 }
0x119b   :  { %14737 = vmatprep.mubr.msk.f32.mxu0 %vm15258_vm1, %v15257_v19  ;;  %14745 = vmatprep.subr.mxu0 %v15257_v19  ;;  %v8844_v0 = vand.u32 4294901760, %v8776_v26 }
0x119c   :  { %14762 = vmatprep.mubr.msk.f32.mxu1 %vm15258_vm1, %v15257_v19  ;;  %14770 = vmatprep.subr.mxu1 %v15257_v19 }
0x119d   :  { %14738 = vmatmul.mubr.f32.vlgmr.msra.gmra.mxu0 %v8393_v38  ;;  %v8845_v45 = vsub.f32 %v8776_v26, %v8844_v0  ;;  %14763 = vmatmul.mubr.f32.vlgmr.msra.gmra.mxu1 %v8844_v0 }
0x119e   :  { %14746 = vmatpush3.msra.mxu0 %v8435_v15  ;;  %14771 = vmatpush3.msra.mxu1 %v8809_v55 }
0x119f   :  { %14747 = vmatprep.mubr.msk.f32.mxu0 %vm15258_vm1, %v15257_v19  ;;  %14755 = vmatprep.subr.mxu0 %v15257_v19  ;;  %v8846_v18 = vand.u32 4294901760, %v8845_v45 }
0x11a0   :  { %14772 = vmatprep.mubr.msk.f32.mxu1 %vm15258_vm1, %v15257_v19  ;;  %14780 = vmatprep.subr.mxu1 %v15257_v19 }
0x11a1   :  { %14748 = vmatmul.mubr.f32.vlgmr.msra.gmra.mxu0 %v8392_v58  ;;  %14773 = vmatmul.mubr.f32.vlgmr.msra.gmra.mxu1 %v8846_v18  ;;  %v8847_v6 = vsub.f32 %v8845_v45, %v8846_v18 }
0x11a2   :  { %14756 = vmatpush3.msra.mxu0 %v8809_v55  ;;  %14781 = vmatpush3.msra.mxu1 %v8809_v55 }
0x11a3   :  { %14757 = vmatprep.mubr.msk.f32.mxu0 %vm15258_vm1, %v15257_v19  ;;  %14765 = vmatprep.subr.mxu0 %v15257_v19  ;;  %v8848_v12 = vand.u32 4294901760, %v8847_v6 }
0x11a4   :  { %14782 = vmatprep.mubr.msk.f32.mxu1 %vm15258_vm1, %v15257_v19  ;;  %14792 = vmatprep.subr.mxu1 %v9353_v36 }
0x11a5   :  { %14758 = vmatmul.mubr.f32.vlgmr.msra.gmra.mxu0 %v8848_v12  ;;  %14783 = vmatmul.mubr.f32.vlgmr.msra.gmra.mxu1 %v8844_v0 }
0x11a6   :  { %14766 = vmatpush3.msra.mxu0 %v8886_v60  ;;  %14767 = vmatprep.mubr.msk.f32.mxu0 %vm15258_vm1, %v15257_v19 }
0x11a7   :  { %14775 = vmatprep.subr.mxu0 %v15257_v19  ;;  %14793 = vmatpush3.msra.mxu1 %v9353_v36 }
0x11a8   :  { %14794 = vmatprep.subr.mxu1 %v9360_v13 }
0x11a9   :  { %14768 = vmatmul.mubr.f32.vlgmr.msra.gmra.mxu0 %v8845_v45  ;;  %14795 = vmatpush3.msra.mxu1 %v9360_v13  ;;  %v9747_v13 = vsel %vm866_vm2, %v9744_v17, 0 }
0x11aa   :  { %14776 = vmatpush3.msra.mxu0 %v8887_v1  ;;  %14777 = vmatprep.mubr.msk.f32.mxu0 %vm15258_vm1, %v15257_v19  ;;  %v9749_v1 = vsel %vm866_vm2, %v9746_v21, 0 }
0x11ab   :  { %14785 = vmatprep.subr.mxu0 %v16571_v8  ;;  %14806 = vmatprep.subr.mxu1 %v16571_v8  ;;  %v16606_v7 = vand.u32 4294901760, %v9749_v1 }
0x11ad   :  { %14778 = vmatmul.mubr.f32.vlgmr.msra.gmra.mxu0 %v8844_v0  ;;  %v16609_v6 = vsub.f32 %v9749_v1, %v16606_v7 }
0x11ae   :  { %14786 = vmatpush3.msra.mxu0 %v16571_v8 }
0x11af   :  { %14787 = vmatprep.subr.mxu0 %v16579_v24  ;;  %v9860_v36 = vand.u32 4294901760, %v16609_v6 }
0x11b0   :  { %14788 = vmatpush3.msra.mxu0 %v16579_v24 }
0x11b1   :  { %14799 = vmatprep.subr.mxu0 %v16577_v27 }
0x1251   :  { %v8474_v39 = vpop.f32.mrf.mxu1 }
0x1253   :  { %v14734_v44 = vpop.f32.mrf.mxu1 }
0x1254   :  { %v10203_v44 = vsel %vm866_vm2, %v10200_v34, 0 }
0x1255   :  { %v8622_v25 = vpop.f32.mrf.mxu1 }
0x1257   :  { %v14744_v47 = vpop.f32.mrf.mxu1 }
0x1258   :  { %v16621_v47 = vand.u32 4294901760, %v9747_v13 }
0x1259   :  { %v8398_v48 = vpop.f32.mrf.mxu0  ;;  %v8768_v51 = vpop.f32.mrf.mxu1 }
0x125a   :  { %v8475_v54 = vadd.f32 %v8474_v39, %v8398_v48 }
0x125b   :  { %v14729_v52 = vpop.f32.mrf.mxu0  ;;  %v14754_v59 = vpop.f32.mrf.mxu1 }
0x125d   :  { %v8548_v56 = vpop.f32.mrf.mxu0  ;;  %v8926_v57 = vpop.f32.mrf.mxu1 }
0x125e   :  { %v8549_v61 = vadd.f32 %v8548_v56, %v8475_v54  ;;  %v9818_v54 = vsub.f32 %v9747_v13, %v16621_v47  ;;  %v10198_v56 = vpop.permute.xlu1 %10197 }
0x125f   :  { %v14739_v41 = vpop.f32.mrf.mxu0  ;;  %v14764_v40 = vpop.f32.mrf.mxu1 }
0x1260   :  { %v8623_v4 = vadd.f32 %v8622_v25, %v8549_v61  ;;  %v9861_v25 = vsub.f32 %v16609_v6, %v9860_v36 }
0x1261   :  { %v8696_v62 = vpop.f32.mrf.mxu0  ;;  %v9074_v43 = vpop.f32.mrf.mxu1 }
0x1262   :  { %v8697_v42 = vadd.f32 %v8696_v62, %v8623_v4  ;;  %v9862_v59 = vand.u32 4294901760, %v9861_v25 }
0x1263   :  { %v14749_v14 = vpop.f32.mrf.mxu0  ;;  %v14774_v15 = vpop.f32.mrf.mxu1 }
0x1264   :  { %v8769_v16 = vadd.f32 %v8768_v51, %v8697_v42  ;;  %v16626_v51 = vand.u32 4294901760, %v10203_v44 }
0x1265   :  { %v8850_v20 = vpop.f32.mrf.mxu0  ;;  %v9220_v28 = vpop.f32.mrf.mxu1 }
0x1266   :  { %v9228_v46 = vsel %vm866_vm2, %v8769_v16, 0  ;;  %v8927_v58 = vadd.f32 %v8926_v57, %v8850_v20  ;;  %v10201_v57 = vsel %vm866_vm2, %v10198_v56, 0 }
0x1267   :  { %v16601_v49 = vand.u32 4294901760, %v9228_v46  ;;  %v14759_v55 = vpop.f32.mrf.mxu0  ;;  %v14784_v53 = vpop.f32.mrf.mxu1  ;;  %v10271_v61 = vand.u32 4294901760, %v10201_v57 }
0x1269   :  { %v9301_v60 = vsub.f32 %v9228_v46, %v16601_v49  ;;  %v9000_v38 = vpop.f32.mrf.mxu0  ;;  %14796 = vmatprep.mubr.f32.mxu1 %v16601_v49  ;;  %v10272_v40 = vsub.f32 %v10201_v57, %v10271_v61 }
0x126a   :  { %v9001_v2 = vadd.f32 %v9000_v38, %v8927_v58 }
0x126b   :  { %v14769_v3 = vpop.f32.mrf.mxu0  ;;  %v9302_v63 = vand.u32 4294901760, %v9301_v60  ;;  %v10273_v4 = vand.u32 4294901760, %v10272_v40 }
0x126c   :  { %v9075_v5 = vadd.f32 %v9074_v43, %v9001_v2 }
0x126d   :  { %v9148_v11 = vpop.f32.mrf.mxu0  ;;  %v9303_v23 = vsub.f32 %v9301_v60, %v9302_v63  ;;  %v10274_v62 = vsub.f32 %v10272_v40, %v10273_v4 }
0x126e   :  { %v9149_v26 = vadd.f32 %v9148_v11, %v9075_v5 }
0x126f   :  { %v14779_v0 = vpop.f32.mrf.mxu0  ;;  %v9304_v45 = vand.u32 4294901760, %v9303_v23  ;;  %v10275_v43 = vand.u32 4294901760, %v10274_v62 }
0x1270   :  { %v9221_v18 = vadd.f32 %v9220_v28, %v9149_v26 }
0x1271   :  { %14789 = vmatprep.mubr.f32.mxu0 %v9304_v45 }
0x1272   :  { %v9231_v12 = vsel %vm866_vm2, %v9221_v18, 0 }
0x1273   :  { %v9310_v22 = vand.u32 4294901760, %v9231_v12 }
0x1275   :  { %v9311_v37 = vsub.f32 %v9231_v12, %v9310_v22  ;;  %14797 = vmatmul.mubr.f32.vlgmr.msra.gmra.mxu1 %v9310_v22 }
0x1276   :  { %14807 = vmatpush3.msra.mxu1 %v16571_v8  ;;  %14810 = vmatprep.mubr.f32.mxu1 %v9302_v63 }
0x1277   :  { %14808 = vmatprep.subr.mxu1 %v16579_v24  ;;  %v9312_v39 = vand.u32 4294901760, %v9311_v37 }
0x1278   :  { %14809 = vmatpush3.msra.mxu1 %v16579_v24 }
0x1279   :  { %14820 = vmatprep.subr.mxu1 %v16571_v8  ;;  %14811 = vmatmul.mubr.f32.vlgmr.msra.gmra.mxu1 %v9312_v39  ;;  %v9313_v48 = vsub.f32 %v9311_v37, %v9312_v39 }
0x127a   :  { %14821 = vmatpush3.msra.mxu1 %v16571_v8  ;;  %14824 = vmatprep.mubr.f32.mxu1 %v16601_v49  ;;  %v16634_v8 = vsub.f32 %v10203_v44, %v16626_v51 }
0x127b   :  { %14822 = vmatprep.subr.mxu1 %v16579_v24  ;;  %v9314_v52 = vand.u32 4294901760, %v9313_v48 }
0x127c   :  { %14823 = vmatpush3.msra.mxu1 %v16579_v24  ;;  %v9819_v24 = vand.u32 4294901760, %v9818_v54 }
0x127d   :  { %14832 = vmatprep.subr.mxu1 %v15257_v19  ;;  %14790 = vmatmul.mubr.f32.vlgmr.msra.gmra.mxu0 %v9314_v52 }
0x127e   :  { %14800 = vmatpush3.msra.mxu0 %v16577_v27  ;;  %14825 = vmatmul.mubr.f32.vlgmr.msra.gmra.mxu1 %v9310_v22  ;;  %v10314_v27 = vand.u32 4294901760, %v16634_v8 }
0x127f   :  { %14833 = vmatpush3.xpose.msra.mxu1 %v9862_v59  ;;  %14801 = vmatprep.subr.mxu0 %v16587_v33 }
0x1280   :  { %14803 = vmatprep.mubr.f32.mxu0 %v9301_v60  ;;  %14802 = vmatpush3.msra.mxu0 %v16587_v33  ;;  %v9820_v33 = vsub.f32 %v9818_v54, %v9819_v24  ;;  %v10315_v41 = vsub.f32 %v16634_v8, %v10314_v27 }
0x1281   :  { %14813 = vmatprep.subr.mxu0 %v16584_v30  ;;  %14834 = vmatprep.mubr.msk.f32.mxu1 %vm15258_vm1, %v15257_v19 }
0x1282   :  { %14842 = vmatprep.subr.mxu1 %v15257_v19  ;;  %14804 = vmatmul.mubr.f32.vlgmr.msra.gmra.mxu0 %v9311_v37 }
0x1283   :  { %14814 = vmatpush3.msra.mxu0 %v16584_v30  ;;  %14835 = vmatmul.mubr.f32.vlgmr.msra.gmra.mxu1 %v16621_v47  ;;  %v9821_v30 = vand.u32 4294901760, %v9820_v33 }
0x1284   :  { %14843 = vmatpush3.xpose.msra.mxu1 %v16606_v7  ;;  %14815 = vmatprep.subr.mxu0 %v16594_v35 }
0x1285   :  { %14817 = vmatprep.mubr.f32.mxu0 %v16601_v49  ;;  %14816 = vmatpush3.msra.mxu0 %v16594_v35  ;;  %v10316_v35 = vand.u32 4294901760, %v10315_v41 }
0x1286   :  { %14827 = vmatprep.subr.mxu0 %v15257_v19  ;;  %14844 = vmatprep.mubr.msk.f32.mxu1 %vm15258_vm1, %v15257_v19 }
0x1287   :  { %14852 = vmatprep.subr.mxu1 %v15257_v19  ;;  %14818 = vmatmul.mubr.f32.vlgmr.msra.gmra.mxu0 %v9310_v22 }
0x1288   :  { %14828 = vmatpush3.xpose.msra.mxu0 %v16606_v7  ;;  %14845 = vmatmul.mubr.f32.vlgmr.msra.gmra.mxu1 %v9819_v24 }
0x1289   :  { %14853 = vmatpush3.xpose.msra.mxu1 %v16606_v7  ;;  %14829 = vmatprep.mubr.msk.f32.mxu0 %vm15258_vm1, %v15257_v19 }
0x128a   :  { %14837 = vmatprep.subr.mxu0 %v15257_v19  ;;  %14854 = vmatprep.mubr.msk.f32.mxu1 %vm15258_vm1, %v15257_v19 }
0x128b   :  { %14862 = vmatprep.subr.mxu1 %v15257_v19  ;;  %14830 = vmatmul.mubr.f32.vlgmr.msra.gmra.mxu0 %v9821_v30 }
0x128c   :  { %14838 = vmatpush3.xpose.msra.mxu0 %v16609_v6  ;;  %14855 = vmatmul.mubr.f32.vlgmr.msra.gmra.mxu1 %v16621_v47 }
0x128d   :  { %14863 = vmatpush3.xpose.msra.mxu1 %v10316_v35  ;;  %14839 = vmatprep.mubr.msk.f32.mxu0 %vm15258_vm1, %v15257_v19 }
0x128e   :  { %14847 = vmatprep.subr.mxu0 %v15257_v19  ;;  %14864 = vmatprep.mubr.msk.f32.mxu1 %vm15258_vm1, %v15257_v19 }
0x128f   :  { %14872 = vmatprep.subr.mxu1 %v15257_v19  ;;  %14840 = vmatmul.mubr.f32.vlgmr.msra.gmra.mxu0 %v9818_v54 }
0x1290   :  { %14848 = vmatpush3.xpose.msra.mxu0 %v9860_v36  ;;  %14865 = vmatmul.mubr.f32.vlgmr.msra.gmra.mxu1 %v10271_v61 }
0x1291   :  { %14873 = vmatpush3.xpose.msra.mxu1 %v16626_v51  ;;  %14849 = vmatprep.mubr.msk.f32.mxu0 %vm15258_vm1, %v15257_v19 }
0x1292   :  { %14857 = vmatprep.subr.mxu0 %v15257_v19  ;;  %14874 = vmatprep.mubr.msk.f32.mxu1 %vm15258_vm1, %v15257_v19 }
0x1293   :  { %14882 = vmatprep.subr.mxu1 %v15257_v19  ;;  %14850 = vmatmul.mubr.f32.vlgmr.msra.gmra.mxu0 %v16621_v47 }
0x1294   :  { %14858 = vmatpush3.xpose.msra.mxu0 %v16626_v51  ;;  %14875 = vmatmul.mubr.f32.vlgmr.msra.gmra.mxu1 %v10273_v4 }
0x1295   :  { %14883 = vmatpush3.xpose.msra.mxu1 %v16626_v51  ;;  %14859 = vmatprep.mubr.msk.f32.mxu0 %vm15258_vm1, %v15257_v19 }
0x1296   :  { %14867 = vmatprep.subr.mxu0 %v15257_v19  ;;  %14884 = vmatprep.mubr.msk.f32.mxu1 %vm15258_vm1, %v15257_v19 }
0x1297   :  { %14860 = vmatmul.mubr.f32.vlgmr.msra.gmra.mxu0 %v10275_v43  ;;  %14892 = vmatprep.subr.mxu1 %v15257_v19 }
0x1298   :  { %14868 = vmatpush3.xpose.msra.mxu0 %v16634_v8  ;;  %14885 = vmatmul.mubr.f32.vlgmr.msra.gmra.mxu1 %v10271_v61 }
0x1299   :  { %14869 = vmatprep.mubr.msk.f32.mxu0 %vm15258_vm1, %v15257_v19  ;;  %14877 = vmatprep.subr.mxu0 %v15257_v19 }
0x129a   :  { %14894 = vmatprep.mubr.msk.f32.mxu1 %vm15258_vm1, %v15257_v19 }
0x129b   :  { %14870 = vmatmul.mubr.f32.vlgmr.msra.gmra.mxu0 %v10272_v40 }
0x129c   :  { %14878 = vmatpush3.xpose.msra.mxu0 %v10314_v27  ;;  %14879 = vmatprep.mubr.msk.f32.mxu0 %vm15258_vm1, %v15257_v19 }
0x129d   :  { %14887 = vmatprep.subr.mxu0 %v15257_v19 }
0x129f   :  { %14880 = vmatmul.mubr.f32.vlgmr.msra.gmra.mxu0 %v10271_v61 }
0x12a0   :  { %14889 = vmatprep.mubr.msk.f32.mxu0 %vm15258_vm1, %v15257_v19 }
0x1335   :  { %v14798_v42 = vpop.f32.mrf.mxu1 }
0x1337   :  { %v9397_v14 = vpop.f32.mrf.mxu1 }
0x1339   :  { %v14812_v15 = vpop.f32.mrf.mxu1 }
0x133b   :  { %v9561_v16 = vpop.f32.mrf.mxu1 }
0x133d   :  { %v14791_v20 = vpop.f32.mrf.mxu0 }
0x133e   :  { %v9404_v28 = vadd.f32 %v14798_v42, %v14791_v20  ;;  %v14826_v21 = vpop.f32.mrf.mxu1 }
0x133f   :  { %v9306_v46 = vpop.f32.mrf.mxu0 }
0x1340   :  { %v9398_v49 = vadd.f32 %v9397_v14, %v9306_v46  ;;  %v9725_v55 = vpop.f32.mrf.mxu1 }
0x1342   :  { %v14805_v53 = vpop.f32.mrf.mxu0 }
0x1343   :  { %v9487_v58 = vadd.f32 %v14805_v53, %v9404_v28  ;;  %v9899_v60 = vpop.f32.mrf.mxu1 }
0x1344   :  { %v9479_v38 = vpop.f32.mrf.mxu0 }
0x1345   :  { %v9480_v1 = vadd.f32 %v9479_v38, %v9398_v49  ;;  %v14836_v2 = vpop.f32.mrf.mxu1  ;;  %v9570_v3 = vadd.f32 %v14812_v15, %v9487_v58 }
0x1347   :  { %v14819_v63 = vpop.f32.mrf.mxu0  ;;  %v9562_v5 = vadd.f32 %v9561_v16, %v9480_v1 }
0x1348   :  { %v9653_v7 = vadd.f32 %v14819_v63, %v9570_v3  ;;  %v10047_v11 = vpop.f32.mrf.mxu1 }
0x1349   :  { %v9646_v23 = vpop.f32.mrf.mxu0 }
0x134a   :  { %v16700_v26 = vadd.f32 %v14826_v21, %v9653_v7  ;;  %v9647_v0 = vadd.f32 %v9646_v23, %v9562_v5  ;;  %v14846_v45 = vpop.f32.mrf.mxu1 }
0x134b   :  { %v9823_v18 = vpop.f32.mrf.mxu0 }
0x134c   :  { %v16702_v6 = vadd.f32 %v9725_v55, %v9647_v0  ;;  %v10193_v12 = vpop.f32.mrf.mxu1  ;;  %v9900_v22 = vadd.f32 %v9899_v60, %v9823_v18 }
0x134d   :  { %v14831_v17 = vpop.f32.mrf.mxu0 }
0x134e   :  { %v14856_v34 = vpop.f32.mrf.mxu1 }
0x134f   :  { %v9973_v36 = vpop.f32.mrf.mxu0 }
0x1350   :  { %v9974_v37 = vadd.f32 %v9973_v36, %v9900_v22  ;;  %v10353_v13 = vpop.f32.mrf.mxu1 }
0x1351   :  { %v14841_v39 = vpop.f32.mrf.mxu0 }
0x1352   :  { %v14866_v44 = vpop.f32.mrf.mxu1  ;;  %v10048_v25 = vadd.f32 %v10047_v11, %v9974_v37 }
0x1353   :  { %v10121_v47 = vpop.f32.mrf.mxu0 }
0x1354   :  { %v10122_v48 = vadd.f32 %v10121_v47, %v10048_v25  ;;  %v10501_v51 = vpop.f32.mrf.mxu1 }
0x1355   :  { %v14851_v52 = vpop.f32.mrf.mxu0 }
0x1356   :  { %v10194_v59 = vadd.f32 %v10193_v12, %v10122_v48  ;;  %v14876_v54 = vpop.f32.mrf.mxu1 }
0x1357   :  { %v10277_v8 = vpop.f32.mrf.mxu0 }
0x1358   :  { %v10651_v56 = vmul.f32 0.25, %v10194_v59  ;;  %v10647_v24 = vpop.f32.mrf.mxu1  ;;  %v10354_v27 = vadd.f32 %v10353_v13, %v10277_v8  ;;  %v13450_v8 = vld [vmem:[%s17152_s7 + $0x38] sm:$0xff] }
0x1359   :  { %v14861_v57 = vpop.f32.mrf.mxu0 }
0x135a   :  { %v14886_v33 = vpop.f32.mrf.mxu1  ;;  %v10653_v61 = vadd.f32 %v10651_v56, %v15703_v29  ;;  %v16757_v56 = vand.u32 4294901760, %v13450_v8 }
0x135b   :  { %v10427_v41 = vpop.f32.mrf.mxu0 }
0x135c   :  { %v10428_v30 = vadd.f32 %v10427_v41, %v10354_v27  ;;  %v10655_v40 = vsel %vm1784_vm3, %v10653_v61, -inf  ;;  %v16763_v57 = vsub.f32 %v13450_v8, %v16757_v56 }
0x135d   :  { %10656 = vmax.xlane.f32.xlu0 %v10655_v40  ;;  %v14871_v35 = vpop.f32.mrf.mxu0 }
0x135e   :  { %v10502_v4 = vadd.f32 %v10501_v51, %v10428_v30 }
0x135f   :  { %v10575_v62 = vpop.f32.mrf.mxu0 }
0x1360   :  { %v10576_v43 = vadd.f32 %v10575_v62, %v10502_v4 }
0x1361   :  { %v14881_v42 = vpop.f32.mrf.mxu0 }
0x1362   :  { %v10648_v14 = vadd.f32 %v10647_v24, %v10576_v43  ;;  %v13449_v24 = vld [vmem:[%s17152_s7 + $0x30] sm:$0xff] }
0x1363   :  { %v16765_v27 = vand.u32 4294901760, %v13449_v24 }
0x1364   :  { %v10652_v15 = vmul.f32 0.25, %v10648_v14 }
0x1365   :  { %v16773_v33 = vsub.f32 %v13449_v24, %v16765_v27 }
0x1366   :  { %v10654_v16 = vadd.f32 %v10652_v15, %v15707_v50 }
0x1367   :  { %v16780_v41 = vand.u32 4294901760, %v16773_v33 }
0x1368   :  { %v10658_v20 = vsel %vm1784_vm3, %v10654_v16, -inf }
0x1369   :  { %10659 = vmax.xlane.f32.xlu1 %v10658_v20  ;;  %v11718_v40 = vsub.f32 %v16773_v33, %v16780_v41 }
0x136b   :  { %v11719_v35 = vand.u32 4294901760, %v11718_v40 }
0x137a   :  { %11132 = vrot.lane.b32.xlu1 %v16460_v32, %s15264_s27 }
0x13e6   :  { %v10657_v29 = vpop.xlane.xlu0 %10656 }
0x13e7   :  { %v10661_v28 = vsub.f32 %v10653_v61, %v10657_v29 }
0x13e9   :  { %v10663_v21 = vmul.f32 1.442695, %v10661_v28 }
0x13eb   :  { %15222 = vpow2.f32 %v10663_v21 }
0x13f2   :  { %v10660_v46 = vpop.xlane.xlu1 %10659 }
0x13f3   :  { %v10662_v49 = vsub.f32 %v10654_v16, %v10660_v46 }
0x13f5   :  { %v10665_v55 = vmul.f32 1.442695, %v10662_v49 }
0x13f6   :  { %v11133_v63 = vpop.permute.xlu1 %11132 }
0x13f7   :  { %15224 = vpow2.f32 %v10665_v55 }
0x13f8   :  { %v15223_v53 = vpop.eup %15222 }
0x13f9   :  { %v10667_v58 = vsel %vm1784_vm3, %v15223_v53, 0.0 }
0x13fa   :  { %10668 = vadd.xlane.f32.xlu0 %v10667_v58 }
0x1404   :  { %v15225_v60 = vpop.eup %15224 }
0x1405   :  { %v10670_v50 = vsel %vm1784_vm3, %v15225_v60, 0.0 }
0x1406   :  { %10671 = vadd.xlane.f32.xlu0 %v10670_v50 }
0x141c   :  { %10680 = vrot.lane.b32.xlu0 %v16462_v31, %s15264_s27  ;;  %v11169_v31 = vand.u32 4294901760, %v11133_v63 }
0x141e   :  { %v11246_v17 = vsub.f32 %v11133_v63, %v11169_v31 }
0x1420   :  { %v11247_v39 = vand.u32 4294901760, %v11246_v17 }
0x1422   :  { %v11248_v47 = vsub.f32 %v11246_v17, %v11247_v39 }
0x1424   :  { %v11249_v52 = vand.u32 4294901760, %v11248_v47 }
0x1483   :  { %v10669_v32 = vpop.xlane.xlu0 %10668 }
0x1484   :  { %15226 = vrcp.f32 %v10669_v32 }
0x148f   :  { %v10672_v38 = vpop.xlane.xlu0 %10671 }
0x1490   :  { %15228 = vrcp.f32 %v10672_v38 }
0x1491   :  { %v15227_v1 = vpop.eup %15226 }
0x1492   :  { %v10675_v2 = vmul.f32 %v15227_v1, %v15223_v53 }
0x1493   :  { %v10681_v3 = vpop.permute.xlu0 %10680 }
0x1494   :  { %13447 = vst.msk [vmem:[%s17164_s19 + $0x28] sm:$0xff] %vm1784_vm3, %v10675_v2  ;;  %v10684_v5 = vsel %vm1784_vm3, %v10675_v2, 0  ;;  %v10717_v7 = vand.u32 4294901760, %v10681_v3 }
0x1495   :  { %v10752_v11 = vand.u32 4294901760, %v10684_v5 }
0x1496   :  { %v10794_v23 = vsub.f32 %v10681_v3, %v10717_v7  ;;  %14888 = vmatpush3.msra.mxu0 %v10717_v7 }
0x1497   :  { %14897 = vmatprep.subr.mxu0 %v15257_v19  ;;  %v10753_v0 = vsub.f32 %v10684_v5, %v10752_v11 }
0x1498   :  { %v10795_v45 = vand.u32 4294901760, %v10794_v23 }
0x1499   :  { %v10754_v18 = vand.u32 4294901760, %v10753_v0 }
0x149a   :  { %v10796_v12 = vsub.f32 %v10794_v23, %v10795_v45 }
0x149b   :  { %v10755_v22 = vsub.f32 %v10753_v0, %v10754_v18 }
0x149c   :  { %v10797_v34 = vand.u32 4294901760, %v10796_v12 }
0x149d   :  { %v15229_v36 = vpop.eup %15228  ;;  %v10756_v37 = vand.u32 4294901760, %v10755_v22 }
0x149e   :  { %v10676_v13 = vmul.f32 %v15229_v36, %v15225_v60  ;;  %14893 = vmatpush3.msra.mxu1 %v10797_v34 }
0x149f   :  { %14890 = vmatmul.mubr.f32.vlgmr.msra.gmra.mxu0 %v10756_v37  ;;  %14895 = vmatmul.mubr.f32.vlgmr.msra.gmra.mxu1 %v10752_v11 }
0x14a0   :  { %13448 = vst.msk [vmem:[%s17164_s19 + $0x38] sm:$0xff] %vm1784_vm3, %v10676_v13  ;;  %v11136_v44 = vsel %vm1784_vm3, %v10676_v13, 0  ;;  %14898 = vmatpush3.msra.mxu0 %v10794_v23  ;;  %14902 = vmatprep.subr.mxu1 %v15257_v19 }
0x14a1   :  { %v11204_v25 = vand.u32 4294901760, %v11136_v44  ;;  %14903 = vmatpush3.msra.mxu1 %v10717_v7  ;;  %14899 = vmatprep.mubr.msk.f32.mxu0 %vm15258_vm1, %v15257_v19 }
0x14a2   :  { %14904 = vmatprep.mubr.msk.f32.mxu1 %vm15258_vm1, %v15257_v19  ;;  %14907 = vmatprep.subr.mxu0 %v15257_v19 }
0x14a3   :  { %14912 = vmatprep.subr.mxu1 %v15257_v19  ;;  %14900 = vmatmul.mubr.f32.vlgmr.msra.gmra.mxu0 %v10753_v0  ;;  %v11205_v48 = vsub.f32 %v11136_v44, %v11204_v25 }
0x14a4   :  { %14905 = vmatmul.mubr.f32.vlgmr.msra.gmra.mxu1 %v10754_v18  ;;  %14908 = vmatpush3.msra.mxu0 %v10795_v45 }
0x14a5   :  { %14913 = vmatpush3.msra.mxu1 %v10717_v7  ;;  %14909 = vmatprep.mubr.msk.f32.mxu0 %vm15258_vm1, %v15257_v19  ;;  %v11206_v51 = vand.u32 4294901760, %v11205_v48 }
0x14a6   :  { %14914 = vmatprep.mubr.msk.f32.mxu1 %vm15258_vm1, %v15257_v19  ;;  %14917 = vmatprep.subr.mxu0 %v15257_v19 }
0x14a7   :  { %14922 = vmatprep.subr.mxu1 %v15257_v19  ;;  %14910 = vmatmul.mubr.f32.vlgmr.msra.gmra.mxu0 %v10752_v11  ;;  %v11207_v59 = vsub.f32 %v11205_v48, %v11206_v51 }
0x14a8   :  { %14915 = vmatmul.mubr.f32.vlgmr.msra.gmra.mxu1 %v10752_v11  ;;  %14918 = vmatpush3.msra.mxu0 %v11169_v31 }
0x14a9   :  { %14923 = vmatpush3.msra.mxu1 %v11249_v52  ;;  %14919 = vmatprep.mubr.msk.f32.mxu0 %vm15258_vm1, %v15257_v19  ;;  %v11208_v54 = vand.u32 4294901760, %v11207_v59 }
0x14aa   :  { %14924 = vmatprep.mubr.msk.f32.mxu1 %vm15258_vm1, %v15257_v19  ;;  %14927 = vmatprep.subr.mxu0 %v15257_v19 }
0x14ab   :  { %14932 = vmatprep.subr.mxu1 %v15257_v19  ;;  %14920 = vmatmul.mubr.f32.vlgmr.msra.gmra.mxu0 %v11208_v54 }
0x14ac   :  { %14925 = vmatmul.mubr.f32.vlgmr.msra.gmra.mxu1 %v11204_v25  ;;  %14928 = vmatpush3.msra.mxu0 %v11246_v17 }
0x14ad   :  { %14933 = vmatpush3.msra.mxu1 %v11169_v31  ;;  %14929 = vmatprep.mubr.msk.f32.mxu0 %vm15258_vm1, %v15257_v19 }
0x14ae   :  { %14934 = vmatprep.mubr.msk.f32.mxu1 %vm15258_vm1, %v15257_v19  ;;  %14937 = vmatprep.subr.mxu0 %v15257_v19 }
0x14af   :  { %14942 = vmatprep.subr.mxu1 %v15257_v19  ;;  %14930 = vmatmul.mubr.f32.vlgmr.msra.gmra.mxu0 %v11205_v48 }
0x14b0   :  { %14935 = vmatmul.mubr.f32.vlgmr.msra.gmra.mxu1 %v11206_v51  ;;  %14938 = vmatpush3.msra.mxu0 %v11247_v39 }
0x14b1   :  { %14943 = vmatpush3.msra.mxu1 %v11169_v31  ;;  %14939 = vmatprep.mubr.msk.f32.mxu0 %vm15258_vm1, %v15257_v19 }
0x14b2   :  { %14944 = vmatprep.mubr.msk.f32.mxu1 %vm15258_vm1, %v15257_v19  ;;  %14947 = vmatprep.subr.mxu0 %v16757_v56  ;;  %v16770_v19 = vand.u32 4294901760, %v16763_v57 }
0x14b3   :  { %14940 = vmatmul.mubr.f32.vlgmr.msra.gmra.mxu0 %v11204_v25 }
0x14b4   :  { %14945 = vmatmul.mubr.f32.vlgmr.msra.gmra.mxu1 %v11204_v25  ;;  %14948 = vmatpush3.msra.mxu0 %v16757_v56  ;;  %v11711_v61 = vsub.f32 %v16763_v57, %v16770_v19 }
0x14b5   :  { %14949 = vmatprep.subr.mxu0 %v16765_v27 }
0x14b6   :  { %14950 = vmatpush3.msra.mxu0 %v16765_v27  ;;  %v11712_v30 = vand.u32 4294901760, %v11711_v61 }
0x14b7   :  { %14961 = vmatprep.subr.mxu0 %v16763_v57 }
0x14b8   :  { %14954 = vmatprep.subr.mxu1 %v11712_v30 }
0x14b9   :  { %14955 = vmatpush3.msra.mxu1 %v11712_v30 }
0x14ba   :  { %14956 = vmatprep.subr.mxu1 %v11719_v35 }
0x14bb   :  { %14957 = vmatpush3.msra.mxu1 %v11719_v35 }
0x14bc   :  { %14968 = vmatprep.subr.mxu1 %v16757_v56 }
0x155f   :  { %v10758_v4 = vpop.f32.mrf.mxu0  ;;  %v10834_v62 = vpop.f32.mrf.mxu1 }
0x1560   :  { %v10835_v14 = vadd.f32 %v10834_v62, %v10758_v4 }
0x1561   :  { %v14891_v43 = vpop.f32.mrf.mxu0  ;;  %v14896_v42 = vpop.f32.mrf.mxu1 }
0x1563   :  { %v10908_v15 = vpop.f32.mrf.mxu0 }
0x1564   :  { %v10909_v16 = vadd.f32 %v10908_v15, %v10835_v14  ;;  %v10982_v20 = vpop.f32.mrf.mxu1 }
0x1565   :  { %v14901_v29 = vpop.f32.mrf.mxu0 }
0x1566   :  { %v10983_v28 = vadd.f32 %v10982_v20, %v10909_v16  ;;  %v14906_v21 = vpop.f32.mrf.mxu1 }
0x1567   :  { %v11056_v46 = vpop.f32.mrf.mxu0 }
0x1568   :  { %v11057_v49 = vadd.f32 %v11056_v46, %v10983_v28  ;;  %v11128_v55 = vpop.f32.mrf.mxu1 }
0x1569   :  { %v14911_v53 = vpop.f32.mrf.mxu0 }
0x156a   :  { %v11129_v58 = vadd.f32 %v11128_v55, %v11057_v49  ;;  %v14916_v60 = vpop.f32.mrf.mxu1 }
0x156b   :  { %v11210_v50 = vpop.f32.mrf.mxu0 }
0x156c   :  { %v11587_v32 = vsel %vm866_vm2, %v11129_v58, 0  ;;  %v11286_v38 = vpop.f32.mrf.mxu1 }
0x156d   :  { %v11659_v1 = vand.u32 4294901760, %v11587_v32  ;;  %v14921_v2 = vpop.f32.mrf.mxu0  ;;  %v11287_v3 = vadd.f32 %v11286_v38, %v11210_v50 }
0x156e   :  { %v14926_v63 = vpop.f32.mrf.mxu1 }
0x156f   :  { %v11660_v5 = vsub.f32 %v11587_v32, %v11659_v1  ;;  %v11360_v7 = vpop.f32.mrf.mxu0  ;;  %14958 = vmatprep.mubr.f32.mxu1 %v11659_v1 }
0x1570   :  { %v11361_v11 = vadd.f32 %v11360_v7, %v11287_v3  ;;  %v11434_v23 = vpop.f32.mrf.mxu1  ;;  %v13457_v7 = vld [vmem:[%s17156_s11 + $0x30] sm:$0xff] }
0x1571   :  { %v14931_v31 = vpop.f32.mrf.mxu0  ;;  %v11661_v0 = vand.u32 4294901760, %v11660_v5 }
0x1572   :  { %v11435_v45 = vadd.f32 %v11434_v23, %v11361_v11  ;;  %v14936_v18 = vpop.f32.mrf.mxu1  ;;  %v16824_v23 = vand.u32 4294901760, %v13457_v7  ;;  %v13456_v31 = vld [vmem:[%s17156_s11 + $0x28] sm:$0xff] }
0x1573   :  { %v11508_v12 = vpop.f32.mrf.mxu0  ;;  %v11662_v17 = vsub.f32 %v11660_v5, %v11661_v0  ;;  %v16837_v18 = vand.u32 4294901760, %v13456_v31 }
0x1574   :  { %v11509_v22 = vadd.f32 %v11508_v12, %v11435_v45  ;;  %v11580_v34 = vpop.f32.mrf.mxu1  ;;  %v16835_v45 = vsub.f32 %v13457_v7, %v16824_v23  ;;  %v13455_v12 = vld [vmem:[%s17156_s11 + $0x20] sm:$0xff]  ;;  %v13464_v7 = vld [vmem:[%s17158_s13 + $0x58] sm:$0xff] }
0x1575   :  { %v14941_v36 = vpop.f32.mrf.mxu0  ;;  %v11663_v37 = vand.u32 4294901760, %v11662_v17 }
0x1576   :  { %v11581_v13 = vadd.f32 %v11580_v34, %v11509_v22  ;;  %v14946_v39 = vpop.f32.mrf.mxu1  ;;  %v16847_v22 = vand.u32 4294901760, %v16835_v45  ;;  %v16850_v34 = vsub.f32 %v13456_v31, %v16837_v18  ;;  %v16852_v36 = vand.u32 4294901760, %v13455_v12 }
0x1577   :  { %14951 = vmatprep.mubr.f32.mxu0 %v11663_v37 }
0x1578   :  { %v11590_v44 = vsel %vm866_vm2, %v11581_v13, 0  ;;  %v12287_v13 = vsub.f32 %v16835_v45, %v16847_v22  ;;  %v16859_v39 = vand.u32 4294901760, %v16850_v34 }
0x1579   :  { %v11669_v25 = vand.u32 4294901760, %v11590_v44 }
0x157b   :  { %v11670_v47 = vsub.f32 %v11590_v44, %v11669_v25  ;;  %14959 = vmatmul.mubr.f32.vlgmr.msra.gmra.mxu1 %v11669_v25  ;;  %v16862_v44 = vsub.f32 %v13455_v12, %v16852_v36 }
0x157c   :  { %14969 = vmatpush3.msra.mxu1 %v16757_v56  ;;  %14972 = vmatprep.mubr.f32.mxu1 %v11661_v0 }
0x157d   :  { %v11671_v48 = vand.u32 4294901760, %v11670_v47  ;;  %14970 = vmatprep.subr.mxu1 %v16765_v27 }
0x157e   :  { %14971 = vmatpush3.msra.mxu1 %v16765_v27 }
0x157f   :  { %v11672_v51 = vsub.f32 %v11670_v47, %v11671_v48  ;;  %14973 = vmatmul.mubr.f32.vlgmr.msra.gmra.mxu1 %v11671_v48  ;;  %14982 = vmatprep.subr.mxu1 %v16757_v56  ;;  %v16869_v48 = vand.u32 4294901760, %v16862_v44 }
0x1580   :  { %14983 = vmatpush3.msra.mxu1 %v16757_v56  ;;  %14986 = vmatprep.mubr.f32.mxu1 %v11659_v1 }
0x1581   :  { %v11673_v52 = vand.u32 4294901760, %v11672_v51  ;;  %14984 = vmatprep.subr.mxu1 %v16765_v27 }
0x1582   :  { %14985 = vmatpush3.msra.mxu1 %v16765_v27 }
0x1583   :  { %14952 = vmatmul.mubr.f32.vlgmr.msra.gmra.mxu0 %v11673_v52  ;;  %14987 = vmatmul.mubr.f32.vlgmr.msra.gmra.mxu1 %v11669_v25  ;;  %v12301_v52 = vsub.f32 %v16862_v44, %v16869_v48 }
0x1584   :  { %14962 = vmatpush3.msra.mxu0 %v16763_v57  ;;  %14965 = vmatprep.mubr.f32.mxu0 %v11660_v5 }
0x1585   :  { %14963 = vmatprep.subr.mxu0 %v16773_v33 }
0x1586   :  { %14964 = vmatpush3.msra.mxu0 %v16773_v33 }
0x1587   :  { %14966 = vmatmul.mubr.f32.vlgmr.msra.gmra.mxu0 %v11670_v47  ;;  %14975 = vmatprep.subr.mxu0 %v16770_v19  ;;  %v12294_v47 = vsub.f32 %v16850_v34, %v16859_v39 }
0x1588   :  { %14976 = vmatpush3.msra.mxu0 %v16770_v19  ;;  %14979 = vmatprep.mubr.f32.mxu0 %v11659_v1  ;;  %v13446_v19 = vld [vmem:[%s17153_s8 + $0x1] ss:$0 sm:$0xff] }
0x1589   :  { %14977 = vmatprep.subr.mxu0 %v16780_v41  ;;  %v9742_v15 = vadd.f32 %v13446_v19, %v16700_v26  ;;  %v9741_v28 = vadd.f32 %v13446_v19, %v16702_v6  ;;  %v12295_v51 = vand.u32 4294901760, %v12294_v47 }
0x158a   :  { %14978 = vmatpush3.msra.mxu0 %v16780_v41 }
0x158b   :  { %14980 = vmatmul.mubr.f32.vlgmr.msra.gmra.mxu0 %v11669_v25  ;;  %v12288_v25 = vand.u32 4294901760, %v12287_v13 }
0x163b   :  { %v14960_v59 = vpop.f32.mrf.mxu1 }
0x163d   :  { %v11756_v54 = vpop.f32.mrf.mxu1 }
0x163f   :  { %v14974_v8 = vpop.f32.mrf.mxu1 }
0x1641   :  { %v11920_v27 = vpop.f32.mrf.mxu1 }
0x1643   :  { %v14953_v56 = vpop.f32.mrf.mxu0  ;;  %v14988_v62 = vpop.f32.mrf.mxu1 }
0x1644   :  { %v11763_v57 = vadd.f32 %v14960_v59, %v14953_v56  ;;  %v12302_v59 = vand.u32 4294901760, %v12301_v52 }
0x1645   :  { %v11665_v24 = vpop.f32.mrf.mxu0  ;;  %v12084_v29 = vpop.f32.mrf.mxu1 }
0x1646   :  { %v11757_v33 = vadd.f32 %v11756_v54, %v11665_v24 }
0x1647   :  { %v14967_v61 = vpop.f32.mrf.mxu0 }
0x1648   :  { %v11846_v30 = vadd.f32 %v14967_v61, %v11763_v57 }
0x1649   :  { %v11838_v40 = vpop.f32.mrf.mxu0 }
0x164a   :  { %v11839_v35 = vadd.f32 %v11838_v40, %v11757_v33  ;;  %v11929_v4 = vadd.f32 %v14974_v8, %v11846_v30  ;;  %v13453_v33 = vld [vmem:[%s17154_s9 + $0x1] ss:$0 sm:$0xff]  ;;  %s17176_s9 = sld [smem:[#allocation9_spill]] }
0x164b   :  { %v14981_v41 = vpop.f32.mrf.mxu0 }
0x164c   :  { %v12012_v43 = vadd.f32 %v14981_v41, %v11929_v4  ;;  %v11921_v42 = vadd.f32 %v11920_v27, %v11839_v35  ;;  %v13454_v35 = vld [vmem:[%s17155_s10 + $0x1] ss:$0 sm:$0xff] }
0x164d   :  { %v12005_v14 = vpop.f32.mrf.mxu0 }
0x164e   :  { %v12091_v16 = vadd.f32 %v14988_v62, %v12012_v43  ;;  %v12006_v20 = vadd.f32 %v12005_v14, %v11921_v42 }
0x1650   :  { %v12085_v21 = vadd.f32 %v12084_v29, %v12006_v20  ;;  %v12095_v46 = vadd.f32 %v12091_v16, %v9742_v15 }
0x1652   :  { %v12097_v49 = vadd.f32 %v12095_v46, %v16403_v9  ;;  %v12094_v55 = vadd.f32 %v12085_v21, %v9741_v28 }
0x1654   :  { %v12105_v53 = vsel %vm245_vm0, %v12097_v49, 0.0  ;;  %v12096_v58 = vadd.f32 %v12094_v55, %v16405_v10  ;;  %v13458_v10 = vld [vmem:[%s17156_s11 + $0x38] sm:$0xff] }
0x1655   :  { %12106 = vadd.xlane.f32.xlu0 %v12105_v53  ;;  %v16816_v5 = vand.u32 4294901760, %v13458_v10 }
0x1656   :  { %v12102_v60 = vsel %vm245_vm0, %v12096_v58, 0.0 }
0x1657   :  { %12103 = vadd.xlane.f32.xlu1 %v12102_v60  ;;  %v16822_v11 = vsub.f32 %v13458_v10, %v16816_v5  ;;  %14989 = vmatprep.subr.mxu0 %v16816_v5 }
0x1658   :  { %14990 = vmatpush3.msra.mxu0 %v16816_v5 }
0x1659   :  { %v16832_v0 = vand.u32 4294901760, %v16822_v11  ;;  %14991 = vmatprep.subr.mxu0 %v16824_v23 }
0x165a   :  { %14992 = vmatpush3.msra.mxu0 %v16824_v23 }
0x165b   :  { %v12280_v17 = vsub.f32 %v16822_v11, %v16832_v0  ;;  %14993 = vmatprep.subr.mxu0 %v16837_v18 }
0x165c   :  { %14994 = vmatpush3.msra.mxu0 %v16837_v18 }
0x165d   :  { %v12281_v37 = vand.u32 4294901760, %v12280_v17  ;;  %14995 = vmatprep.subr.mxu0 %v16852_v36 }
0x165e   :  { %14996 = vmatpush3.msra.mxu0 %v16852_v36 }
0x165f   :  { %15000 = vmatprep.subr.mxu1 %v12281_v37  ;;  %15011 = vmatprep.subr.mxu0 %v16822_v11 }
0x1660   :  { %15001 = vmatpush3.msra.mxu1 %v12281_v37  ;;  %v13462_v37 = vld [vmem:[%s17158_s13 + $0x48] sm:$0xff] }
0x1661   :  { %15002 = vmatprep.subr.mxu1 %v12288_v25 }
0x1662   :  { %15003 = vmatpush3.msra.mxu1 %v12288_v25  ;;  %v16999_v25 = vand.u32 4294901760, %v13462_v37 }
0x1663   :  { %15004 = vmatprep.subr.mxu1 %v12295_v51 }
0x1664   :  { %15005 = vmatpush3.msra.mxu1 %v12295_v51 }
0x1665   :  { %15006 = vmatprep.subr.mxu1 %v12302_v59 }
0x1666   :  { %15007 = vmatpush3.msra.mxu1 %v12302_v59  ;;  %v17013_v59 = vsub.f32 %v13462_v37, %v16999_v25 }
0x1667   :  { %15022 = vmatprep.subr.mxu1 %v16816_v5 }
0x16de   :  { %v12107_v50 = vpop.xlane.xlu0 %12106 }
0x16df   :  { %v12109_v26 = vmul.f32 0.03125, %v12107_v50  ;;  %v13467_v50 = vld [vmem:[%s17158_s13 + $0x70] sm:$0xff] }
0x16e0   :  { %v12104_v32 = vpop.xlane.xlu1 %12103 }
0x16e1   :  { %v12111_v38 = vsub.f32 %v12097_v49, %v12109_v26  ;;  %v12108_v1 = vmul.f32 0.03125, %v12104_v32  ;;  %v16930_v32 = vand.u32 4294901760, %v13467_v50 }
0x16e3   :  { %v12110_v2 = vsub.f32 %v12096_v58, %v12108_v1  ;;  %v12113_v6 = vmul.f32 %v12111_v38, %v12111_v38  ;;  %v13468_v58 = vld [vmem:[%s17158_s13 + $0x78] sm:$0xff] }
0x16e4   :  { %v16922_v60 = vand.u32 4294901760, %v13468_v58 }
0x16e5   :  { %v12117_v3 = vsel %vm245_vm0, %v12113_v6, 0.0  ;;  %v12112_v63 = vmul.f32 %v12110_v2, %v12110_v2 }
0x16e6   :  { %12118 = vadd.xlane.f32.xlu1 %v12117_v3  ;;  %v16928_v26 = vsub.f32 %v13468_v58, %v16922_v60  ;;  %v13465_v3 = vld [vmem:[%s17158_s13 + $0x60] sm:$0xff] }
0x16e7   :  { %v12114_v9 = vsel %vm245_vm0, %v12112_v63, 0.0 }
0x16e8   :  { %12115 = vadd.xlane.f32.xlu0 %v12114_v9  ;;  %v16938_v1 = vand.u32 4294901760, %v16928_v26 }
0x16ea   :  { %v12837_v63 = vsub.f32 %v16928_v26, %v16938_v1 }
0x176f   :  { %v12119_v54 = vpop.xlane.xlu1 %12118 }
0x1770   :  { %v12121_v8 = vmul.f32 0.03125, %v12119_v54 }
0x1771   :  { %v12116_v56 = vpop.xlane.xlu0 %12115 }
0x1772   :  { %v12123_v24 = vadd.f32 1e-12, %v12121_v8  ;;  %v12120_v57 = vmul.f32 0.03125, %v12116_v56 }
0x1774   :  { %15230 = vrsqrt.f32 %v12123_v24  ;;  %v12122_v27 = vadd.f32 1e-12, %v12120_v57  ;;  %v17024_v24 = vand.u32 4294901760, %v17013_v59 }
0x1776   :  { %15232 = vrsqrt.f32 %v12122_v27 }
0x1781   :  { %v15231_v61 = vpop.eup %15230 }
0x1782   :  { %v12127_v30 = vmul.f32 %v15231_v61, %v12111_v38  ;;  %v13466_v38 = vld [vmem:[%s17158_s13 + $0x68] sm:$0xff] }
0x1783   :  { %v15233_v40 = vpop.eup %15232  ;;  %v16943_v6 = vand.u32 4294901760, %v13466_v38 }
0x1784   :  { %v12126_v4 = vmul.f32 %v15233_v40, %v12110_v2  ;;  %v12135_v19 = vmul.f32 %v13453_v33, %v12127_v30  ;;  %v16941_v2 = vsub.f32 %v13467_v50, %v16930_v32 }
0x1785   :  { %v16956_v10 = vsub.f32 %v13466_v38, %v16943_v6 }
0x1786   :  { %v12134_v62 = vmul.f32 %v13453_v33, %v12126_v4  ;;  %v16881_v41 = vadd.f32 %v13454_v35, %v12135_v19  ;;  %v16953_v9 = vand.u32 4294901760, %v16941_v2  ;;  %v12879_v33 = vsub.f32 %v17013_v59, %v17024_v24 }
0x1787   :  { %v16968_v31 = vand.u32 4294901760, %v16956_v10 }
0x1788   :  { %v16883_v43 = vadd.f32 %v13454_v35, %v12134_v62  ;;  %v12161_v42 = vsel %vm245_vm0, %v16881_v41, 0  ;;  %v12880_v40 = vand.u32 4294901760, %v12879_v33  ;;  %v13460_v62 = vld [vmem:[%s17157_s12 + $0x1] ss:$0 sm:$0xff] }
0x1789   :  { %v12242_v14 = vand.u32 4294901760, %v12161_v42  ;;  %v12851_v17 = vsub.f32 %v16956_v10, %v16968_v31 }
0x178a   :  { %v12158_v15 = vsel %vm245_vm0, %v16883_v43, 0 }
0x178b   :  { %v12232_v16 = vand.u32 4294901760, %v12158_v15  ;;  %v12243_v20 = vsub.f32 %v12161_v42, %v12242_v14  ;;  %v12852_v13 = vand.u32 4294901760, %v12851_v17 }
0x178d   :  { %15008 = vmatprep.mubr.f32.mxu1 %v12232_v16  ;;  %v12233_v29 = vsub.f32 %v12158_v15, %v12232_v16  ;;  %v12244_v28 = vand.u32 4294901760, %v12243_v20 }
0x178e   :  { %15009 = vmatmul.mubr.f32.vlgmr.msra.gmra.mxu1 %v12242_v14 }
0x178f   :  { %15023 = vmatpush3.msra.mxu1 %v16816_v5  ;;  %v12234_v21 = vand.u32 4294901760, %v12233_v29  ;;  %v12245_v49 = vsub.f32 %v12243_v20, %v12244_v28 }
0x1790   :  { %15024 = vmatprep.subr.mxu1 %v16824_v23 }
0x1791   :  { %15025 = vmatpush3.msra.mxu1 %v16824_v23  ;;  %15030 = vmatprep.mubr.f32.mxu1 %v12234_v21  ;;  %v12235_v46 = vsub.f32 %v12233_v29, %v12234_v21  ;;  %v12246_v53 = vand.u32 4294901760, %v12245_v49 }
0x1792   :  { %15026 = vmatprep.subr.mxu1 %v16837_v18 }
0x1793   :  { %15027 = vmatpush3.msra.mxu1 %v16837_v18  ;;  %v12236_v55 = vand.u32 4294901760, %v12235_v46 }
0x1794   :  { %15028 = vmatprep.subr.mxu1 %v16852_v36 }
0x1795   :  { %15029 = vmatpush3.msra.mxu1 %v16852_v36  ;;  %14997 = vmatprep.mubr.f32.mxu0 %v12236_v55 }
0x1796   :  { %15031 = vmatmul.mubr.f32.vlgmr.msra.gmra.mxu1 %v12244_v28  ;;  %15044 = vmatprep.subr.mxu1 %v16816_v5 }
0x1797   :  { %14998 = vmatmul.mubr.f32.vlgmr.msra.gmra.mxu0 %v12246_v53  ;;  %15045 = vmatpush3.msra.mxu1 %v16816_v5  ;;  %v16958_v5 = vand.u32 4294901760, %v13465_v3 }
0x1798   :  { %15012 = vmatpush3.msra.mxu0 %v16822_v11  ;;  %15052 = vmatprep.mubr.f32.mxu1 %v12232_v16  ;;  %v12838_v11 = vand.u32 4294901760, %v12837_v63 }
0x1799   :  { %15013 = vmatprep.subr.mxu0 %v16835_v45  ;;  %15019 = vmatprep.mubr.f32.mxu0 %v12233_v29 }
0x179a   :  { %15046 = vmatprep.subr.mxu1 %v16824_v23  ;;  %15014 = vmatpush3.msra.mxu0 %v16835_v45  ;;  %v16974_v45 = vand.u32 4294901760, %v13464_v7 }
0x179b   :  { %15047 = vmatpush3.msra.mxu1 %v16824_v23  ;;  %15015 = vmatprep.subr.mxu0 %v16850_v34  ;;  %v12844_v23 = vsub.f32 %v16941_v2, %v16953_v9 }
0x179c   :  { %15048 = vmatprep.subr.mxu1 %v16837_v18  ;;  %15016 = vmatpush3.msra.mxu0 %v16850_v34 }
0x179d   :  { %15049 = vmatpush3.msra.mxu1 %v16837_v18  ;;  %15017 = vmatprep.subr.mxu0 %v16862_v44  ;;  %v13463_v18 = vld [vmem:[%s17158_s13 + $0x50] sm:$0xff]  ;;  %v12845_v12 = vand.u32 4294901760, %v12844_v23 }
0x179e   :  { %15050 = vmatprep.subr.mxu1 %v16852_v36  ;;  %15018 = vmatpush3.msra.mxu0 %v16862_v44  ;;  %v16985_v34 = vand.u32 4294901760, %v13463_v18 }
0x179f   :  { %15051 = vmatpush3.msra.mxu1 %v16852_v36  ;;  %15020 = vmatmul.mubr.f32.vlgmr.msra.gmra.mxu0 %v12243_v20  ;;  %v16988_v36 = vsub.f32 %v13464_v7, %v16974_v45 }
0x17a0   :  { %15033 = vmatprep.subr.mxu0 %v16832_v0  ;;  %15053 = vmatmul.mubr.f32.vlgmr.msra.gmra.mxu1 %v12242_v14  ;;  %v16997_v44 = vsub.f32 %v13463_v18, %v16985_v34 }
0x17a1   :  { %15034 = vmatpush3.msra.mxu0 %v16832_v0  ;;  %15041 = vmatprep.mubr.f32.mxu0 %v12232_v16  ;;  %v16971_v0 = vsub.f32 %v13465_v3, %v16958_v5  ;;  %v17003_v47 = vand.u32 4294901760, %v16988_v36 }
0x17a2   :  { %15035 = vmatprep.subr.mxu0 %v16847_v22  ;;  %15074 = vmatprep.subr.mxu1 %v12838_v11  ;;  %v17010_v52 = vand.u32 4294901760, %v16997_v44 }
0x17a3   :  { %15036 = vmatpush3.msra.mxu0 %v16847_v22  ;;  %v16983_v22 = vand.u32 4294901760, %v16971_v0  ;;  %15075 = vmatpush3.msra.mxu1 %v12838_v11  ;;  %v12865_v8 = vsub.f32 %v16988_v36, %v17003_v47 }
0x17a4   :  { %15037 = vmatprep.subr.mxu0 %v16859_v39  ;;  %15076 = vmatprep.subr.mxu1 %v12845_v12  ;;  %v12872_v56 = vsub.f32 %v16997_v44, %v17010_v52 }
0x17a5   :  { %15038 = vmatpush3.msra.mxu0 %v16859_v39  ;;  %v12858_v39 = vsub.f32 %v16971_v0, %v16983_v22  ;;  %15077 = vmatpush3.msra.mxu1 %v12845_v12  ;;  %v12866_v27 = vand.u32 4294901760, %v12865_v8 }
0x17a6   :  { %15039 = vmatprep.subr.mxu0 %v16869_v48  ;;  %15078 = vmatprep.subr.mxu1 %v12852_v13  ;;  %v12873_v61 = vand.u32 4294901760, %v12872_v56 }
0x17a7   :  { %15040 = vmatpush3.msra.mxu0 %v16869_v48  ;;  %v13461_v48 = vld [vmem:[%s17158_s13 + $0x40] sm:$0xff]  ;;  %v12859_v51 = vand.u32 4294901760, %v12858_v39  ;;  %15079 = vmatpush3.msra.mxu1 %v12852_v13 }
0x17a8   :  { %15042 = vmatmul.mubr.f32.vlgmr.msra.gmra.mxu0 %v12242_v14  ;;  %15055 = vmatprep.subr.mxu0 %v16922_v60  ;;  %v17015_v54 = vand.u32 4294901760, %v13461_v48 }
0x17a9   :  { %15056 = vmatpush3.msra.mxu0 %v16922_v60  ;;  %15080 = vmatprep.subr.mxu1 %v12859_v51 }
0x17aa   :  { %15057 = vmatprep.subr.mxu0 %v16930_v32  ;;  %v17027_v57 = vsub.f32 %v13461_v48, %v17015_v54  ;;  %15081 = vmatpush3.msra.mxu1 %v12859_v51 }
0x17ab   :  { %15058 = vmatpush3.msra.mxu0 %v16930_v32  ;;  %15082 = vmatprep.subr.mxu1 %v12866_v27 }
0x17ac   :  { %15059 = vmatprep.subr.mxu0 %v16943_v6  ;;  %v17034_v30 = vand.u32 4294901760, %v17027_v57  ;;  %15083 = vmatpush3.msra.mxu1 %v12866_v27 }
0x17ad   :  { %15060 = vmatpush3.msra.mxu0 %v16943_v6  ;;  %15084 = vmatprep.subr.mxu1 %v12873_v61 }
0x17ae   :  { %15061 = vmatprep.subr.mxu0 %v16958_v5  ;;  %v12886_v35 = vsub.f32 %v17027_v57, %v17034_v30  ;;  %15085 = vmatpush3.msra.mxu1 %v12873_v61 }
0x17af   :  { %15062 = vmatpush3.msra.mxu0 %v16958_v5  ;;  %15086 = vmatprep.subr.mxu1 %v12880_v40 }
0x17b0   :  { %15063 = vmatprep.subr.mxu0 %v16974_v45  ;;  %v12887_v4 = vand.u32 4294901760, %v12886_v35  ;;  %15087 = vmatpush3.msra.mxu1 %v12880_v40 }
0x17b1   :  { %15064 = vmatpush3.msra.mxu0 %v16974_v45 }
0x17b2   :  { %15065 = vmatprep.subr.mxu0 %v16985_v34  ;;  %15088 = vmatprep.subr.mxu1 %v12887_v4 }
0x17b3   :  { %15066 = vmatpush3.msra.mxu0 %v16985_v34  ;;  %15089 = vmatpush3.msra.mxu1 %v12887_v4 }
0x17b4   :  { %15067 = vmatprep.subr.mxu0 %v16999_v25  ;;  %15112 = vmatprep.subr.mxu1 %v16922_v60 }
0x17b5   :  { %15068 = vmatpush3.msra.mxu0 %v16999_v25 }
0x17b6   :  { %15069 = vmatprep.subr.mxu0 %v17015_v54 }
0x17b7   :  { %15070 = vmatpush3.msra.mxu0 %v17015_v54 }
0x17b8   :  { %15093 = vmatprep.subr.mxu0 %v16928_v26 }
0x184e   :  { %v15010_v42 = vpop.f32.mrf.mxu1 }
0x1850   :  { %v12339_v29 = vpop.f32.mrf.mxu1 }
0x1856   :  { %v15032_v21 = vpop.f32.mrf.mxu1 }
0x1857   :  { %v14999_v19 = vpop.f32.mrf.mxu0 }
0x1858   :  { %v12249_v15 = vadd.f32 %v14999_v19, %v13460_v62  ;;  %v12509_v58 = vpop.f32.mrf.mxu1 }
0x1859   :  { %v12238_v14 = vpop.f32.mrf.mxu0 }
0x185a   :  { %v12239_v16 = vadd.f32 %v13460_v62, %v12238_v14  ;;  %v12346_v28 = vadd.f32 %v15010_v42, %v12249_v15 }
0x185c   :  { %v12340_v55 = vadd.f32 %v12339_v29, %v12239_v16 }
0x185f   :  { %v15021_v20 = vpop.f32.mrf.mxu0 }
0x1860   :  { %v12433_v49 = vadd.f32 %v15021_v20, %v12346_v28  ;;  %v15054_v38 = vpop.f32.mrf.mxu1 }
0x1861   :  { %v12425_v46 = vpop.f32.mrf.mxu0 }
0x1862   :  { %v12426_v53 = vadd.f32 %v12425_v46, %v12340_v55  ;;  %v12518_v50 = vadd.f32 %v15032_v21, %v12433_v49  ;;  %v12681_v12 = vpop.f32.mrf.mxu1 }
0x1864   :  { %v12510_v7 = vadd.f32 %v12509_v58, %v12426_v53 }
0x1868   :  { %v15043_v3 = vpop.f32.mrf.mxu0 }
0x1869   :  { %v12607_v63 = vadd.f32 %v15043_v3, %v12518_v50 }
0x186a   :  { %v12600_v11 = vpop.f32.mrf.mxu0 }
0x186b   :  { %v12688_v23 = vadd.f32 %v15054_v38, %v12607_v63  ;;  %v12601_v18 = vadd.f32 %v12600_v11, %v12510_v7 }
0x186d   :  { %v12694_v17 = vmul.f32 0.70710677, %v12688_v23  ;;  %v12682_v37 = vadd.f32 %v12681_v12, %v12601_v18  ;;  %v12692_v48 = vmul.f32 0.5, %v12688_v23 }
0x186f   :  { %15234 = verf.f32 %v12694_v17  ;;  %v12693_v13 = vmul.f32 0.70710677, %v12682_v37  ;;  %v12691_v27 = vmul.f32 0.5, %v12682_v37 }
0x1871   :  { %15236 = verf.f32 %v12693_v13 }
0x187c   :  { %v15235_v39 = vpop.eup %15234 }
0x187d   :  { %v12698_v51 = vadd.f32 1.0, %v15235_v39 }
0x187e   :  { %v15237_v8 = vpop.eup %15236 }
0x187f   :  { %v12700_v56 = vmul.f32 %v12698_v51, %v12692_v48  ;;  %v12697_v61 = vadd.f32 1.0, %v15237_v8  ;;  %v13473_v51 = vld [vmem:[%s17160_s15 + $0x1] ss:$0 sm:$0xff] }
0x1881   :  { %v12722_v33 = vsel %vm6200_vm4, %v12700_v56, 0  ;;  %v12699_v40 = vmul.f32 %v12697_v61, %v12691_v27  ;;  %v13474_v27 = vld [vmem:[%s17161_s16 + $0x1] ss:$0 sm:$0xff] }
0x1882   :  { %v17045_v35 = vand.u32 4294901760, %v12722_v33 }
0x1883   :  { %v12719_v4 = vsel %vm6200_vm4, %v12699_v40, 0 }
0x1884   :  { %v12808_v19 = vsub.f32 %v12722_v33, %v17045_v35  ;;  %v12797_v62 = vand.u32 4294901760, %v12719_v4 }
0x1886   :  { %v12809_v42 = vand.u32 4294901760, %v12808_v19  ;;  %15090 = vmatprep.mubr.f32.mxu1 %v12797_v62  ;;  %v12798_v14 = vsub.f32 %v12719_v4, %v12797_v62 }
0x1887   :  { %15091 = vmatmul.mubr.f32.vlgmr.msra.gmra.mxu1 %v17045_v35 }
0x1888   :  { %15113 = vmatpush3.msra.mxu1 %v16922_v60  ;;  %v12799_v15 = vand.u32 4294901760, %v12798_v14  ;;  %v12810_v16 = vsub.f32 %v12808_v19, %v12809_v42 }
0x1889   :  { %15114 = vmatprep.subr.mxu1 %v16930_v32 }
0x188a   :  { %15115 = vmatpush3.msra.mxu1 %v16930_v32  ;;  %15128 = vmatprep.mubr.f32.mxu1 %v12799_v15  ;;  %v12800_v20 = vsub.f32 %v12798_v14, %v12799_v15  ;;  %v12811_v28 = vand.u32 4294901760, %v12810_v16 }
0x188b   :  { %15116 = vmatprep.subr.mxu1 %v16943_v6 }
0x188c   :  { %15117 = vmatpush3.msra.mxu1 %v16943_v6  ;;  %v12801_v29 = vand.u32 4294901760, %v12800_v20 }
0x188d   :  { %15118 = vmatprep.subr.mxu1 %v16958_v5 }
0x188e   :  { %15119 = vmatpush3.msra.mxu1 %v16958_v5  ;;  %15071 = vmatprep.mubr.f32.mxu0 %v12801_v29 }
0x188f   :  { %15120 = vmatprep.subr.mxu1 %v16974_v45  ;;  %15072 = vmatmul.mubr.f32.vlgmr.msra.gmra.mxu0 %v12811_v28 }
0x1890   :  { %15094 = vmatpush3.msra.mxu0 %v16928_v26  ;;  %15121 = vmatpush3.msra.mxu1 %v16974_v45  ;;  %v13470_v26 = vld [vmem:[%s17159_s14 + $0x1] ss:$0 sm:$0xff] }
0x1891   :  { %15095 = vmatprep.subr.mxu0 %v16941_v2  ;;  %15109 = vmatprep.mubr.f32.mxu0 %v12798_v14 }
0x1892   :  { %15122 = vmatprep.subr.mxu1 %v16985_v34  ;;  %15096 = vmatpush3.msra.mxu0 %v16941_v2 }
0x1893   :  { %15123 = vmatpush3.msra.mxu1 %v16985_v34  ;;  %15097 = vmatprep.subr.mxu0 %v16956_v10 }
0x1894   :  { %15124 = vmatprep.subr.mxu1 %v16999_v25  ;;  %15098 = vmatpush3.msra.mxu0 %v16956_v10 }
0x1895   :  { %15125 = vmatpush3.msra.mxu1 %v16999_v25  ;;  %15099 = vmatprep.subr.mxu0 %v16971_v0 }
0x1896   :  { %15126 = vmatprep.subr.mxu1 %v17015_v54  ;;  %15100 = vmatpush3.msra.mxu0 %v16971_v0 }
0x1897   :  { %15127 = vmatpush3.msra.mxu1 %v17015_v54  ;;  %15101 = vmatprep.subr.mxu0 %v16988_v36 }
0x1898   :  { %15129 = vmatmul.mubr.f32.vlgmr.msra.gmra.mxu1 %v12809_v42  ;;  %15150 = vmatprep.subr.mxu1 %v16922_v60 }
0x1899   :  { %15102 = vmatpush3.msra.mxu0 %v16988_v36  ;;  %15151 = vmatpush3.msra.mxu1 %v16922_v60 }
0x189a   :  { %15166 = vmatprep.mubr.f32.mxu1 %v12797_v62  ;;  %15103 = vmatprep.subr.mxu0 %v16997_v44 }
0x189b   :  { %15152 = vmatprep.subr.mxu1 %v16930_v32  ;;  %15104 = vmatpush3.msra.mxu0 %v16997_v44 }
0x189c   :  { %15153 = vmatpush3.msra.mxu1 %v16930_v32  ;;  %15105 = vmatprep.subr.mxu0 %v17013_v59 }
0x189d   :  { %15154 = vmatprep.subr.mxu1 %v16943_v6  ;;  %15106 = vmatpush3.msra.mxu0 %v17013_v59 }
0x189e   :  { %15155 = vmatpush3.msra.mxu1 %v16943_v6  ;;  %15107 = vmatprep.subr.mxu0 %v17027_v57 }
0x189f   :  { %15156 = vmatprep.subr.mxu1 %v16958_v5  ;;  %15108 = vmatpush3.msra.mxu0 %v17027_v57 }
0x18a0   :  { %15157 = vmatpush3.msra.mxu1 %v16958_v5  ;;  %15110 = vmatmul.mubr.f32.vlgmr.msra.gmra.mxu0 %v12808_v19 }
0x18a1   :  { %15131 = vmatprep.subr.mxu0 %v16938_v1  ;;  %15158 = vmatprep.subr.mxu1 %v16974_v45 }
0x18a2   :  { %15132 = vmatpush3.msra.mxu0 %v16938_v1  ;;  %15147 = vmatprep.mubr.f32.mxu0 %v12797_v62 }
0x18a3   :  { %15159 = vmatpush3.msra.mxu1 %v16974_v45  ;;  %15133 = vmatprep.subr.mxu0 %v16953_v9 }
0x18a4   :  { %15160 = vmatprep.subr.mxu1 %v16985_v34  ;;  %15134 = vmatpush3.msra.mxu0 %v16953_v9 }
0x18a5   :  { %15161 = vmatpush3.msra.mxu1 %v16985_v34  ;;  %15135 = vmatprep.subr.mxu0 %v16968_v31 }
0x18a6   :  { %15162 = vmatprep.subr.mxu1 %v16999_v25  ;;  %15136 = vmatpush3.msra.mxu0 %v16968_v31 }
0x18a7   :  { %15163 = vmatpush3.msra.mxu1 %v16999_v25  ;;  %15137 = vmatprep.subr.mxu0 %v16983_v22 }
0x18a8   :  { %15164 = vmatprep.subr.mxu1 %v17015_v54  ;;  %15138 = vmatpush3.msra.mxu0 %v16983_v22 }
0x18a9   :  { %15165 = vmatpush3.msra.mxu1 %v17015_v54  ;;  %15139 = vmatprep.subr.mxu0 %v17003_v47 }
0x18aa   :  { %15167 = vmatmul.mubr.f32.vlgmr.msra.gmra.mxu1 %v17045_v35  ;;  %15140 = vmatpush3.msra.mxu0 %v17003_v47 }
0x18ab   :  { %15141 = vmatprep.subr.mxu0 %v17010_v52 }
0x18ac   :  { %15142 = vmatpush3.msra.mxu0 %v17010_v52 }
0x18ad   :  { %15143 = vmatprep.subr.mxu0 %v17024_v24 }
0x18ae   :  { %15144 = vmatpush3.msra.mxu0 %v17024_v24 }
0x18af   :  { %15145 = vmatprep.subr.mxu0 %v17034_v30 }
0x18b0   :  { %15146 = vmatpush3.msra.mxu0 %v17034_v30 }
0x18b1   :  { %15148 = vmatmul.mubr.f32.vlgmr.msra.gmra.mxu0 %v17045_v35 }
0x1947   :  { %v15092_v32 = vpop.f32.mrf.mxu1 }
0x1949   :  { %v12924_v10 = vpop.f32.mrf.mxu1 }
0x194f   :  { %v15073_v60 = vpop.f32.mrf.mxu0 }
0x1950   :  { %v12814_v2 = vadd.f32 %v15073_v60, %v13470_v26 }
0x1951   :  { %v12803_v1 = vpop.f32.mrf.mxu0 }
0x1952   :  { %v12804_v9 = vadd.f32 %v13470_v26, %v12803_v1  ;;  %v12931_v5 = vadd.f32 %v15092_v32, %v12814_v2 }
0x1954   :  { %v12925_v22 = vadd.f32 %v12924_v10, %v12804_v9 }
0x1958   :  { %v15130_v31 = vpop.f32.mrf.mxu1 }
0x195a   :  { %v13106_v36 = vpop.f32.mrf.mxu1 }
0x1960   :  { %v15111_v6 = vpop.f32.mrf.mxu0 }
0x1961   :  { %v13026_v45 = vadd.f32 %v15111_v6, %v12931_v5 }
0x1962   :  { %v13018_v0 = vpop.f32.mrf.mxu0 }
0x1963   :  { %v13019_v34 = vadd.f32 %v13018_v0, %v12925_v22  ;;  %v13115_v44 = vadd.f32 %v15130_v31, %v13026_v45 }
0x1965   :  { %v13107_v59 = vadd.f32 %v13106_v36, %v13019_v34 }
0x196a   :  { %v15168_v25 = vpop.f32.mrf.mxu1 }
0x196c   :  { %v13294_v30 = vpop.f32.mrf.mxu1 }
0x1971   :  { %v15149_v47 = vpop.f32.mrf.mxu0 }
0x1972   :  { %v13216_v52 = vadd.f32 %v15149_v47, %v13115_v44 }
0x1973   :  { %v13209_v54 = vpop.f32.mrf.mxu0 }
0x1974   :  { %v13301_v24 = vadd.f32 %v15168_v25, %v13216_v52  ;;  %v13210_v57 = vadd.f32 %v13209_v54, %v13107_v59 }
0x1976   :  { %v13295_v21 = vadd.f32 %v13294_v30, %v13210_v57  ;;  %v13305_v46 = vadd.f32 %v13301_v24, %v16881_v41 }
0x1978   :  { %v13313_v49 = vsel %vm245_vm0, %v13305_v46, 0.0  ;;  %v13304_v55 = vadd.f32 %v13295_v21, %v16883_v43 }
0x1979   :  { %13314 = vadd.xlane.f32.xlu1 %v13313_v49 }
0x197a   :  { %v13310_v53 = vsel %vm245_vm0, %v13304_v55, 0.0 }
0x197b   :  { %13311 = vadd.xlane.f32.xlu0 %v13310_v53 }
0x1a02   :  { %v13315_v58 = vpop.xlane.xlu1 %13314 }
0x1a03   :  { %v13317_v50 = vmul.f32 0.03125, %v13315_v58 }
0x1a04   :  { %v13312_v38 = vpop.xlane.xlu0 %13311 }
0x1a05   :  { %v13319_v3 = vsub.f32 %v13305_v46, %v13317_v50  ;;  %v13316_v63 = vmul.f32 0.03125, %v13312_v38 }
0x1a07   :  { %v13318_v7 = vsub.f32 %v13304_v55, %v13316_v63  ;;  %v13321_v11 = vmul.f32 %v13319_v3, %v13319_v3 }
0x1a09   :  { %v13325_v23 = vsel %vm245_vm0, %v13321_v11, 0.0  ;;  %v13320_v18 = vmul.f32 %v13318_v7, %v13318_v7 }
0x1a0a   :  { %13326 = vadd.xlane.f32.xlu1 %v13325_v23 }
0x1a0b   :  { %v13322_v41 = vsel %vm245_vm0, %v13320_v18, 0.0 }
0x1a0c   :  { %13323 = vadd.xlane.f32.xlu0 %v13322_v41 }
0x1a93   :  { %v13327_v12 = vpop.xlane.xlu1 %13326 }
0x1a94   :  { %v13329_v43 = vmul.f32 0.03125, %v13327_v12 }
0x1a95   :  { %v13324_v17 = vpop.xlane.xlu0 %13323 }
0x1a96   :  { %v13331_v37 = vadd.f32 1e-12, %v13329_v43  ;;  %v13328_v13 = vmul.f32 0.03125, %v13324_v17 }
0x1a98   :  { %15238 = vrsqrt.f32 %v13331_v37  ;;  %v13330_v39 = vadd.f32 1e-12, %v13328_v13 }
0x1a9a   :  { %15240 = vrsqrt.f32 %v13330_v39 }
0x1aa5   :  { %v15239_v48 = vpop.eup %15238 }
0x1aa6   :  { %v13335_v8 = vmul.f32 %v15239_v48, %v13319_v3 }
0x1aa7   :  { %v15241_v56 = vpop.eup %15240 }
0x1aa8   :  { %v13343_v61 = vmul.f32 %v13473_v51, %v13335_v8  ;;  %v13334_v33 = vmul.f32 %v15241_v56, %v13318_v7 }
0x1aaa   :  { %v13351_v40 = vadd.f32 %v13474_v27, %v13343_v61  ;;  %v13342_v35 = vmul.f32 %v13473_v51, %v13334_v33 }
0x1aac   :  { %13476 = vst.msk [vmem:[%s17163_s18 + $0x28] sm:$0xff] %vm245_vm0, %v13351_v40  ;;  %13356 = vst.msk [vmem:[%s17176_s9 + $0x8] sm:$0xff] %vm245_vm0, %v13351_v40  ;;  %v13350_v4 = vadd.f32 %v13474_v27, %v13342_v35 }
0x1aae   :  { %13475 = vst.msk [vmem:[%s17163_s18 + $0x20] sm:$0xff] %vm245_vm0, %v13350_v4  ;;  %13355 = vst.msk [vmem:[%s17176_s9] sm:$0xff] %vm245_vm0, %v13350_v4 }
0x1aaf   :  { %13369 = vsyncpa [#allocation3], 1 }

</bundles_post_ra>
